<compile_context>
chip_gen: v6e
topology: v6e:2x2x1
jax: 0.10.0
libtpu: 0.0.40
codegen_flags: <defaults>
</compile_context>

<pallas_src>
import functools

import jax
import jax.numpy as jnp
from jax import lax
from jax.experimental import pallas as pl
from jax.experimental.pallas import tpu as pltpu

EPS = 1e-5                     # nn.BatchNorm2d default eps
LANE = 128                     # output-channel dims are zero-padded to this
VMEM_LIMIT = 32 * 1024 * 1024  # safe scoped-VMEM budget on v5e/v6e/v7x


def _cparams():
    # Single independent grid axis per call -> "parallel" lets Mosaic shard it
    # across the TensorCores (2 on v7x).
    return pltpu.CompilerParams(dimension_semantics=("parallel",),
                                vmem_limit_bytes=VMEM_LIMIT)


def _row_tile(m, target):
    """Largest multiple-of-8 divisor of m that is <= target (fallback: m)."""
    t = min(target, m)
    t -= t % 8
    while t >= 8 and m % t:
        t -= 8
    return t if t >= 8 else m


# ------------------------------ Pallas kernels -------------------------------

def _pw_conv_kernel(*refs, bn_relu_input):
    """1x1 conv over a row tile (+ optional fused input BN+ReLU) + BN partials.

    y = [relu(x*scale + shift)] @ W + b   (bf16 MXU operands, f32 accumulation)
    stats = [sum_rows(y); sum_rows(y*y)]  (f32, taken before the bf16 store)
    """
    if bn_relu_input:
        x_ref, w_ref, b_ref, sc_ref, sh_ref, y_ref, st_ref = refs
    else:
        x_ref, w_ref, b_ref, y_ref, st_ref = refs
    f32 = jnp.float32

    x = x_ref[...]
    if bn_relu_input:
        x = jnp.maximum(x.astype(f32) * sc_ref[...] + sh_ref[...], 0.0)
    y = jnp.dot(x.astype(jnp.bfloat16), w_ref[...],
                preferred_element_type=f32) + b_ref[...]
    y_ref[...] = y.astype(y_ref.dtype)                       # bf16 HBM store
    st_ref[0, 0:1, :] = jnp.sum(y, axis=0, keepdims=True)
    st_ref[0, 1:2, :] = jnp.sum(y * y, axis=0, keepdims=True)


def _conv3x3_kernel(y1_ref, w2_ref, b2_ref, sc_ref, sh_ref,
                    y2_ref, st_ref, pad_ref, acc_ref, *, S, H, W):
    """BN1+ReLU -> 3x3 conv (stride S, pad 1) for ONE image + BN partials.

    y1_ref : (S*S, 1, Ho, Wo, Cp) bf16 parity-major stage-1 pre-BN output.
    pad_ref: (S*S, Hp, Wp, Cp) bf16 parity-factored zero-bordered scratch.
    acc_ref: (Ho*Wo, Cp) f32 tap accumulator (keeps partials out of vregs).
    """
    f32 = jnp.float32
    Ho, Wo = H // S, W // S
    Hp = (H + 2 + S - 1) // S
    Wp = (W + 2 + S - 1) // S
    Cp = acc_ref.shape[-1]
    sc = sc_ref[...].reshape(1, 1, Cp)
    sh = sh_ref[...].reshape(1, 1, Cp)

    # BN1 + ReLU, scattered (bf16) into the parity-factored padded scratch.
    # Only the 1-pixel conv border is zero-filled; the interior is overwritten.
    # (Border is re-zeroed every image because with a "parallel" grid each core
    #  owns its own scratch instance.)
    for hp in range(S):
        for wp in range(S):
            pa, oh = (hp + 1) % S, (hp + 1) // S
            pb, ow = (wp + 1) % S, (wp + 1) // S
            pln = pa * S + pb
            if oh > 0:
                pad_ref[pln, 0:oh, :, :] = jnp.zeros((oh, Wp, Cp), pad_ref.dtype)
            if oh + Ho < Hp:
                pad_ref[pln, oh + Ho:Hp, :, :] = jnp.zeros(
                    (Hp - oh - Ho, Wp, Cp), pad_ref.dtype)
            if ow > 0:
                pad_ref[pln, :, 0:ow, :] = jnp.zeros((Hp, ow, Cp), pad_ref.dtype)
            if ow + Wo < Wp:
                pad_ref[pln, :, ow + Wo:Wp, :] = jnp.zeros(
                    (Hp, Wp - ow - Wo, Cp), pad_ref.dtype)
            a = jnp.maximum(y1_ref[hp * S + wp, 0].astype(f32) * sc + sh, 0.0)
            pad_ref[pln, oh:oh + Ho, ow:ow + Wo, :] = a.astype(pad_ref.dtype)

    # TODO(synk): the offset-1 scatter/tap windows are still sublane-unaligned
    # (masked vst / materialized copies); a pltpu.roll-based shift or 8-aligned
    # per-parity padding would make them zero-copy.

    # 3x3 conv = 9 accumulated MXU matmuls over statically sliced shifted views.
    first = True
    for dh in range(3):
        for dw in range(3):
            pln = (dh % S) * S + (dw % S)
            patch = pad_ref[pln, dh // S:dh // S + Ho, dw // S:dw // S + Wo, :]
            t = jnp.dot(patch.reshape(Ho * Wo, Cp), w2_ref[dh * 3 + dw],
                        preferred_element_type=f32)
            if first:
                acc_ref[...] = t
                first = False
            else:
                acc_ref[...] += t

    y = acc_ref[...] + b2_ref[...]
    y2_ref[...] = y.reshape(1, Ho, Wo, Cp).astype(y2_ref.dtype)
    st_ref[0, 0:1, :] = jnp.sum(y, axis=0, keepdims=True)
    st_ref[0, 1:2, :] = jnp.sum(y * y, axis=0, keepdims=True)


def _final_kernel(y3_ref, xr_ref, wr_ref, br_ref, sc_ref, sh_ref, o_ref):
    """BN3+ReLU of stage-3 output, fused strided 1x1 residual conv, add."""
    f32 = jnp.float32
    act = jnp.maximum(y3_ref[...].astype(f32) * sc_ref[...] + sh_ref[...], 0.0)
    res = jnp.dot(xr_ref[...], wr_ref[...],
                  preferred_element_type=f32) + br_ref[...]
    o_ref[...] = act + res                                    # lane-dense f32 store


# ------------------------------ host wrappers --------------------------------

def _pad_cols(w):
    return jnp.pad(w, ((0, 0), (0, LANE - w.shape[1])))


def _pad_vec(v):
    return jnp.pad(v, (0, LANE - v.shape[0]))


def _prep_params(p):
    """PyTorch-layout params -> matmul form, bf16 weights, zero-padded to 128.

    NOTE: bias/gamma/beta are ZERO-padded so padded channels stay exactly 0
    through BN (scale = 0*rsqrt(eps) = 0, shift = 0).  Do not change this.
    """
    bf = jnp.bfloat16
    C = p["w1_pt"].shape[0]
    Cout = p["w3_pt"].shape[0]
    w1 = _pad_cols(p["w1_pt"][:, :, 0, 0].T).astype(bf)                  # (Cin, Cp)
    w2 = jnp.transpose(p["w2_pt"], (2, 3, 1, 0)).reshape(9, C, C)
    w2 = jnp.pad(w2, ((0, 0), (0, LANE - C), (0, LANE - C))).astype(bf)  # (9, Cp, Cp)
    w3 = jnp.pad(p["w3_pt"][:, :, 0, 0].T,
                 ((0, LANE - C), (0, LANE - Cout))).astype(bf)           # (Cp, Cp)
    wr = _pad_cols(p["wr_pt"][:, :, 0, 0].T).astype(bf)                  # (Cin, Cp)
    row = lambda v: _pad_vec(v).reshape(1, LANE).astype(jnp.float32)
    return dict(
        w1=w1, w2=w2, w3=w3, wr=wr,
        b1=row(p["b1"]), b2=row(p["b2"]), b3=row(p["b3"]), br=row(p["br"]),
        g1=_pad_vec(p["g1"]), bt1=_pad_vec(p["bt1"]),
        g2=_pad_vec(p["g2"]), bt2=_pad_vec(p["bt2"]),
        g3=_pad_vec(p["g3"]), bt3=_pad_vec(p["bt3"]),
    )


def _bn_scale_shift(stats, count, gamma, beta):
    """Reduce per-tile partial sums into BN (batch-stats) scale / shift."""
    s = jnp.sum(stats[:, 0, :], axis=0)
    ss = jnp.sum(stats[:, 1, :], axis=0)
    mean = s / count
    var = jnp.maximum(ss / count - mean * mean, 0.0)   # clamp single-pass cancellation
    scale = gamma * lax.rsqrt(var + EPS)
    shift = beta - mean * scale
    return scale.reshape(1, LANE), shift.reshape(1, LANE)


def _pw_conv(x_rows, w, b, scale_shift, *, row_tile, flops):
    """Row-tiled 1x1-conv pallas_call (optionally fusing an input BN+ReLU)."""
    M, K = x_rows.shape
    Cp = w.shape[1]
    tm = _row_tile(M, row_tile)
    T = M // tm
    bn_in = scale_shift is not None
    operands = [x_rows, w, b] + (list(scale_shift) if bn_in else [])
    in_specs = [pl.BlockSpec((tm, K), lambda i: (i, 0)),
                pl.BlockSpec((K, Cp), lambda i: (0, 0)),
                pl.BlockSpec((1, Cp), lambda i: (0, 0))]
    if bn_in:
        in_specs += [pl.BlockSpec((1, K), lambda i: (0, 0)),
                     pl.BlockSpec((1, K), lambda i: (0, 0))]
    nbytes = (sum(int(a.size) * a.dtype.itemsize for a in operands)
              + M * Cp * 2 + T * 2 * Cp * 4)
    return pl.pallas_call(
        functools.partial(_pw_conv_kernel, bn_relu_input=bn_in),
        grid=(T,),
        in_specs=in_specs,
        out_specs=(pl.BlockSpec((tm, Cp), lambda i: (i, 0)),
                   pl.BlockSpec((1, 2, Cp), lambda i: (i, 0, 0))),
        out_shape=(jax.ShapeDtypeStruct((M, Cp), jnp.bfloat16),
                   jax.ShapeDtypeStruct((T, 2, Cp), jnp.float32)),
        compiler_params=_cparams(),
        cost_estimate=pl.CostEstimate(flops=flops, transcendentals=0,
                                      bytes_accessed=int(nbytes)),
    )(*operands)


def bottleneck_forward(x_nchw, p, stride, row_tile=128):
    """Bottle_neck forward (training-mode BatchNorm) via 4 tiled Pallas calls.

    row_tile=128 keeps the grid exercised at the toy test size; use >=512 rows
    per tile at real ResNet-50 sizes (HBM-roofline plateau).
    """
    N, Cin, H, W = x_nchw.shape
    C = p["w1_pt"].shape[0]                 # mid channels = out_channels // 4
    Cout = p["w3_pt"].shape[0]
    S = stride
    assert H % S == 0 and W % S == 0
    assert max(Cin, C, Cout) <= LANE        # TODO(synk): channel tiling >128
    Ho, Wo = H // S, W // S
    M1, M2 = N * H * W, N * Ho * Wo
    Cp = LANE
    q = _prep_params(p)

    # NCHW -> NHWC -> parity-major rows (h%S, w%S, n, h//S, w//S), bf16.
    # Parity-major order makes every strided access in the kernels (3x3 taps,
    # stride-S residual read) a static contiguous slice.
    x_rows = (jnp.transpose(x_nchw, (0, 2, 3, 1))
              .reshape(N, Ho, S, Wo, S, Cin)
              .transpose(2, 4, 0, 1, 3, 5)
              .reshape(M1, Cin)
              .astype(jnp.bfloat16))

    # ---- stage 1: 1x1 conv, row-tiled, partial BN stats ----------------------
    y1, st1 = _pw_conv(x_rows, q["w1"], q["b1"], None,
                       row_tile=row_tile, flops=2 * M1 * Cin * C)
    sc1, sh1 = _bn_scale_shift(st1, float(M1), q["g1"], q["bt1"])

    # ---- stage 2: BN1+ReLU + 3x3 conv (stride S, pad 1), grid over batch -----
    Hp = (H + 2 + S - 1) // S
    Wp = (W + 2 + S - 1) // S
    y1_5d = y1.reshape(S * S, N, Ho, Wo, Cp)
    nbytes2 = (int(y1_5d.size) * 2 + int(q["w2"].size) * 2 + 3 * Cp * 4
               + M2 * Cp * 2 + N * 2 * Cp * 4)
    y2, st2 = pl.pallas_call(
        functools.partial(_conv3x3_kernel, S=S, H=H, W=W),
        grid=(N,),
        in_specs=[pl.BlockSpec((S * S, 1, Ho, Wo, Cp), lambda n: (0, n, 0, 0, 0)),
                  pl.BlockSpec((9, Cp, Cp), lambda n: (0, 0, 0)),
                  pl.BlockSpec((1, Cp), lambda n: (0, 0)),
                  pl.BlockSpec((1, Cp), lambda n: (0, 0)),
                  pl.BlockSpec((1, Cp), lambda n: (0, 0))],
        out_specs=(pl.BlockSpec((1, Ho, Wo, Cp), lambda n: (n, 0, 0, 0)),
                   pl.BlockSpec((1, 2, Cp), lambda n: (n, 0, 0))),
        out_shape=(jax.ShapeDtypeStruct((N, Ho, Wo, Cp), jnp.bfloat16),
                   jax.ShapeDtypeStruct((N, 2, Cp), jnp.float32)),
        scratch_shapes=[pltpu.VMEM((S * S, Hp, Wp, Cp), jnp.bfloat16),
                        pltpu.VMEM((Ho * Wo, Cp), jnp.float32)],
        compiler_params=_cparams(),
        cost_estimate=pl.CostEstimate(flops=2 * M2 * 9 * C * C, transcendentals=0,
                                      bytes_accessed=int(nbytes2)),
    )(y1_5d, q["w2"], q["b2"], sc1, sh1)
    sc2, sh2 = _bn_scale_shift(st2, float(M2), q["g2"], q["bt2"])

    # ---- stage 3: BN2+ReLU + 1x1 conv, row-tiled -----------------------------
    y3, st3 = _pw_conv(y2.reshape(M2, Cp), q["w3"], q["b3"], (sc2, sh2),
                       row_tile=row_tile, flops=2 * M2 * C * Cout)
    sc3, sh3 = _bn_scale_shift(st3, float(M2), q["g3"], q["bt3"])

    # ---- finalize: BN3+ReLU + strided 1x1 residual conv + add ----------------
    x_res = x_rows[:M2]        # parity (0,0) rows == stride-S sampled pixels
    tmf = _row_tile(M2, row_tile)
    nbytesf = (M2 * Cp * 2 + M2 * Cin * 2 + Cin * Cp * 2 + 3 * Cp * 4
               + M2 * Cp * 4)
    out = pl.pallas_call(
        _final_kernel,
        grid=(M2 // tmf,),
        in_specs=[pl.BlockSpec((tmf, Cp), lambda i: (i, 0)),
                  pl.BlockSpec((tmf, Cin), lambda i: (i, 0)),
                  pl.BlockSpec((Cin, Cp), lambda i: (0, 0)),
                  pl.BlockSpec((1, Cp), lambda i: (0, 0)),
                  pl.BlockSpec((1, Cp), lambda i: (0, 0)),
                  pl.BlockSpec((1, Cp), lambda i: (0, 0))],
        out_specs=pl.BlockSpec((tmf, Cp), lambda i: (i, 0)),
        out_shape=jax.ShapeDtypeStruct((M2, Cp), jnp.float32),
        compiler_params=_cparams(),
        cost_estimate=pl.CostEstimate(flops=2 * M2 * Cin * Cout, transcendentals=0,
                                      bytes_accessed=int(nbytesf)),
    )(y3, x_res, q["wr"], q["br"], sc3, sh3)

    y = out.reshape(N, Ho, Wo, Cp)[:, :, :, :Cout]
    return jnp.transpose(y, (0, 3, 1, 2))              # back to NCHW


# ------------------------------ params / reference ---------------------------

def init_params(key, in_channels, out_channels):
    num_channels = out_channels // 4
    ks = jax.random.split(key, 8)
    scale = 0.1
    return {
        "w1_pt": scale * jax.random.normal(ks[0], (num_channels, in_channels, 1, 1), jnp.float32),
        "b1":    scale * jax.random.normal(ks[1], (num_channels,), jnp.float32),
        "w2_pt": scale * jax.random.normal(ks[2], (num_channels, num_channels, 3, 3), jnp.float32),
        "b2":    scale * jax.random.normal(ks[3], (num_channels,), jnp.float32),
        "w3_pt": scale * jax.random.normal(ks[4], (out_channels, num_channels, 1, 1), jnp.float32),
        "b3":    scale * jax.random.normal(ks[5], (out_channels,), jnp.float32),
        "wr_pt": scale * jax.random.normal(ks[6], (out_channels, in_channels, 1, 1), jnp.float32),
        "br":    scale * jax.random.normal(ks[7], (out_channels,), jnp.float32),
        "g1": jnp.ones((num_channels,), jnp.float32), "bt1": jnp.zeros((num_channels,), jnp.float32),
        "g2": jnp.ones((num_channels,), jnp.float32), "bt2": jnp.zeros((num_channels,), jnp.float32),
        "g3": jnp.ones((out_channels,), jnp.float32), "bt3": jnp.zeros((out_channels,), jnp.float32),
    }


def reference_forward(x, p, stride):
    """Pure-JAX reference (lax.conv), bf16 conv operands / f32 accumulation."""
    dn = ("NCHW", "OIHW", "NCHW")
    bf = jnp.bfloat16

    def conv(x, w, b, s, pad):
        y = lax.conv_general_dilated(x.astype(bf), w.astype(bf), (s, s), pad,
                                     dimension_numbers=dn,
                                     preferred_element_type=jnp.float32)
        return y + b[None, :, None, None]

    def bn(x, g, bt):
        mean = x.mean(axis=(0, 2, 3), keepdims=True)
        var = jnp.square(x - mean).mean(axis=(0, 2, 3), keepdims=True)
        return ((x - mean) * lax.rsqrt(var + EPS)
                * g[None, :, None, None] + bt[None, :, None, None])

    res = conv(x, p["wr_pt"], p["br"], stride, ((0, 0), (0, 0)))
    h = jax.nn.relu(bn(conv(x, p["w1_pt"], p["b1"], 1, ((0, 0), (0, 0))), p["g1"], p["bt1"]))
    h = jax.nn.relu(bn(conv(h, p["w2_pt"], p["b2"], stride, ((1, 1), (1, 1))), p["g2"], p["bt2"]))
    h = jax.nn.relu(bn(conv(h, p["w3_pt"], p["b3"], 1, ((0, 0), (0, 0))), p["g3"], p["bt3"]))
    return h + res


# ----------------------------------- main ------------------------------------

if __name__ == "__main__":
    N, Cin, H, W = 2, 4, 16, 16
    out_channels = 16

    key = jax.random.PRNGKey(0)
    kx, kp = jax.random.split(key)
    x = jax.random.normal(kx, (N, Cin, H, W), jnp.float32)
    params = init_params(kp, Cin, out_channels)

    fwd = jax.jit(bottleneck_forward, static_argnums=2)

    for stride in (2, 1):                     # stride=2 block and block_2=True block
        y = jax.block_until_ready(fwd(x, params, stride))
        y_ref = reference_forward(x, params, stride)
        assert y.shape == y_ref.shape
        err = float(jnp.max(jnp.abs(y - y_ref)))
        # Kernel stores inter-stage activations in bf16 (reference keeps f32), so
        # remaining differences are bf16-rounding / accumulation-order noise.
        assert bool(jnp.allclose(y, y_ref, atol=3e-2, rtol=3e-2)), (
            f"mismatch vs reference at stride={stride} (max abs err {err:.4f})")

    print("KERNEL_OK")
</pallas_src>

<mosaic_0001>
module attributes {stable_mosaic.version = 11 : i64} {
  func.func @_pw_conv_kernel(%arg0: i32, %arg1: memref<128x4xbf16, #tpu.memory_space<vmem>>, %arg2: memref<4x128xbf16, #tpu.memory_space<vmem>>, %arg3: memref<1x128xf32, #tpu.memory_space<vmem>>, %arg4: memref<128x128xbf16, #tpu.memory_space<vmem>>, %arg5: memref<1x2x128xf32, #tpu.memory_space<vmem>>) attributes {dimension_semantics = [#tpu.dimension_semantics<parallel>], iteration_bounds = array<i64: 4>, scalar_prefetch = 0 : i64, scratch_operands = 0 : i64, tpu.core_type = #tpu.core_type<tc>, window_params = [{transform_indices = @transform_0, window_bounds = array<i64: 128, 4>}, {pipeline_mode = #tpu.pipeline_mode<synchronous>, transform_indices = @transform_1, window_bounds = array<i64: 4, 128>}, {pipeline_mode = #tpu.pipeline_mode<synchronous>, transform_indices = @transform_2, window_bounds = array<i64: 1, 128>}, {transform_indices = @transform_3, window_bounds = array<i64: 128, 128>}, {transform_indices = @transform_4, window_bounds = array<i64: 1, 2, 128>}]} {
    %c0 = arith.constant 0 : index
    %c0_0 = arith.constant 0 : index
    %0 = vector.load %arg1[%c0, %c0_0] : memref<128x4xbf16, #tpu.memory_space<vmem>>, vector<128x4xbf16>
    %c0_1 = arith.constant 0 : index
    %c0_2 = arith.constant 0 : index
    %1 = vector.load %arg2[%c0_1, %c0_2] : memref<4x128xbf16, #tpu.memory_space<vmem>>, vector<4x128xbf16>
    %cst = arith.constant dense<0.000000e+00> : vector<128x128xf32>
    %2 = tpu.matmul %0, %1, %cst {dimension_numbers = #tpu.dot_dimension_numbers<[1], [0], [0], [1], [0, 0, 1, 1], [], []>} : vector<128x4xbf16>, vector<4x128xbf16>, vector<128x128xf32> -> vector<128x128xf32>
    %c0_3 = arith.constant 0 : index
    %c0_4 = arith.constant 0 : index
    %3 = vector.load %arg3[%c0_3, %c0_4] : memref<1x128xf32, #tpu.memory_space<vmem>>, vector<1x128xf32>
    %4 = vector.broadcast %3 : vector<1x128xf32> to vector<128x128xf32>
    %5 = arith.addf %2, %4 : vector<128x128xf32>
    %6 = arith.truncf %5 : vector<128x128xf32> to vector<128x128xbf16>
    %c0_5 = arith.constant 0 : index
    %c0_6 = arith.constant 0 : index
    %7 = vector.load %arg4[%c0_5, %c0_6] : memref<128x128xbf16, #tpu.memory_space<vmem>>, vector<128x128xbf16>
    tpu.vector_store %arg4[%c0_5, %c0_6], %6 {strides = array<i32>} : memref<128x128xbf16, #tpu.memory_space<vmem>>, vector<128x128xbf16>,
    %cst_7 = arith.constant dense<0.000000e+00> : vector<128xf32>
    %8 = vector.multi_reduction <add>, %5, %cst_7 [0] : vector<128x128xf32> to vector<128xf32>
    %9 = vector.shape_cast %8 : vector<128xf32> to vector<1x128xf32>
    %c0_8 = arith.constant 0 : index
    %c0_9 = arith.constant 0 : index
    %c0_10 = arith.constant 0 : index
    %10 = vector.load %arg5[%c0_8, %c0_9, %c0_10] : memref<1x2x128xf32, #tpu.memory_space<vmem>>, vector<1x1x128xf32>
    %11 = vector.shape_cast %10 : vector<1x1x128xf32> to vector<1x128xf32>
    %12 = vector.shape_cast %9 : vector<1x128xf32> to vector<1x1x128xf32>
    tpu.vector_store %arg5[%c0_8, %c0_9, %c0_10], %12 {strides = array<i32>} : memref<1x2x128xf32, #tpu.memory_space<vmem>>, vector<1x1x128xf32>,
    %13 = arith.mulf %5, %5 : vector<128x128xf32>
    %cst_11 = arith.constant dense<0.000000e+00> : vector<128xf32>
    %14 = vector.multi_reduction <add>, %13, %cst_11 [0] : vector<128x128xf32> to vector<128xf32>
    %15 = vector.shape_cast %14 : vector<128xf32> to vector<1x128xf32>
    %c0_12 = arith.constant 0 : index
    %c1 = arith.constant 1 : index
    %c0_13 = arith.constant 0 : index
    %16 = vector.load %arg5[%c0_12, %c1, %c0_13] : memref<1x2x128xf32, #tpu.memory_space<vmem>>, vector<1x1x128xf32>
    %17 = vector.shape_cast %16 : vector<1x1x128xf32> to vector<1x128xf32>
    %18 = vector.shape_cast %15 : vector<1x128xf32> to vector<1x1x128xf32>
    tpu.vector_store %arg5[%c0_12, %c1, %c0_13], %18 {strides = array<i32>} : memref<1x2x128xf32, #tpu.memory_space<vmem>>, vector<1x1x128xf32>,
    return
  }
  func.func @transform_0(%arg0: i32) -> (i32, i32) {
    %c0_i32 = arith.constant 0 : i32
    %c0_i32_0 = arith.constant 0 : i32
    return %arg0, %c0_i32 : i32, i32
  }
  func.func @transform_1(%arg0: i32) -> (i32, i32) {
    %c0_i32 = arith.constant 0 : i32
    %c0_i32_0 = arith.constant 0 : i32
    %c0_i32_1 = arith.constant 0 : i32
    return %c0_i32, %c0_i32_0 : i32, i32
  }
  func.func @transform_2(%arg0: i32) -> (i32, i32) {
    %c0_i32 = arith.constant 0 : i32
    %c0_i32_0 = arith.constant 0 : i32
    %c0_i32_1 = arith.constant 0 : i32
    return %c0_i32, %c0_i32_0 : i32, i32
  }
  func.func @transform_3(%arg0: i32) -> (i32, i32) {
    %c0_i32 = arith.constant 0 : i32
    %c0_i32_0 = arith.constant 0 : i32
    return %arg0, %c0_i32 : i32, i32
  }
  func.func @transform_4(%arg0: i32) -> (i32, i32, i32) {
    %c0_i32 = arith.constant 0 : i32
    %c0_i32_0 = arith.constant 0 : i32
    %c0_i32_1 = arith.constant 0 : i32
    return %arg0, %c0_i32, %c0_i32_0 : i32, i32, i32
  }
}

module attributes {stable_mosaic.version = 11 : i64} {
  func.func @_pw_conv_kernel(%arg0: i32, %arg1: memref<128x128xbf16, #tpu.memory_space<vmem>>, %arg2: memref<128x128xbf16, #tpu.memory_space<vmem>>, %arg3: memref<1x128xf32, #tpu.memory_space<vmem>>, %arg4: memref<1x128xf32, #tpu.memory_space<vmem>>, %arg5: memref<1x128xf32, #tpu.memory_space<vmem>>, %arg6: memref<128x128xbf16, #tpu.memory_space<vmem>>, %arg7: memref<1x2x128xf32, #tpu.memory_space<vmem>>) attributes {dimension_semantics = [#tpu.dimension_semantics<parallel>], iteration_bounds = array<i64: 1>, scalar_prefetch = 0 : i64, scratch_operands = 0 : i64, tpu.core_type = #tpu.core_type<tc>, window_params = [{transform_indices = @transform_0, window_bounds = array<i64: 128, 128>}, {pipeline_mode = #tpu.pipeline_mode<synchronous>, transform_indices = @transform_1, window_bounds = array<i64: 128, 128>}, {pipeline_mode = #tpu.pipeline_mode<synchronous>, transform_indices = @transform_2, window_bounds = array<i64: 1, 128>}, {pipeline_mode = #tpu.pipeline_mode<synchronous>, transform_indices = @transform_3, window_bounds = array<i64: 1, 128>}, {pipeline_mode = #tpu.pipeline_mode<synchronous>, transform_indices = @transform_4, window_bounds = array<i64: 1, 128>}, {transform_indices = @transform_5, window_bounds = array<i64: 128, 128>}, {transform_indices = @transform_6, window_bounds = array<i64: 1, 2, 128>}]} {
    %c0 = arith.constant 0 : index
    %c0_0 = arith.constant 0 : index
    %0 = vector.load %arg1[%c0, %c0_0] : memref<128x128xbf16, #tpu.memory_space<vmem>>, vector<128x128xbf16>
    %1 = arith.extf %0 : vector<128x128xbf16> to vector<128x128xf32>
    %c0_1 = arith.constant 0 : index
    %c0_2 = arith.constant 0 : index
    %2 = vector.load %arg4[%c0_1, %c0_2] : memref<1x128xf32, #tpu.memory_space<vmem>>, vector<1x128xf32>
    %3 = vector.broadcast %2 : vector<1x128xf32> to vector<128x128xf32>
    %4 = arith.mulf %1, %3 : vector<128x128xf32>
    %c0_3 = arith.constant 0 : index
    %c0_4 = arith.constant 0 : index
    %5 = vector.load %arg5[%c0_3, %c0_4] : memref<1x128xf32, #tpu.memory_space<vmem>>, vector<1x128xf32>
    %6 = vector.broadcast %5 : vector<1x128xf32> to vector<128x128xf32>
    %7 = arith.addf %4, %6 : vector<128x128xf32>
    %cst = arith.constant 0.000000e+00 : f32
    %8 = vector.broadcast %cst : f32 to vector<128x128xf32>
    %9 = arith.maximumf %7, %8 : vector<128x128xf32>
    %10 = arith.truncf %9 : vector<128x128xf32> to vector<128x128xbf16>
    %c0_5 = arith.constant 0 : index
    %c0_6 = arith.constant 0 : index
    %11 = vector.load %arg2[%c0_5, %c0_6] : memref<128x128xbf16, #tpu.memory_space<vmem>>, vector<128x128xbf16>
    %cst_7 = arith.constant dense<0.000000e+00> : vector<128x128xf32>
    %12 = tpu.matmul %10, %11, %cst_7 {dimension_numbers = #tpu.dot_dimension_numbers<[1], [0], [0], [1], [0, 0, 1, 1], [], []>} : vector<128x128xbf16>, vector<128x128xbf16>, vector<128x128xf32> -> vector<128x128xf32>
    %c0_8 = arith.constant 0 : index
    %c0_9 = arith.constant 0 : index
    %13 = vector.load %arg3[%c0_8, %c0_9] : memref<1x128xf32, #tpu.memory_space<vmem>>, vector<1x128xf32>
    %14 = vector.broadcast %13 : vector<1x128xf32> to vector<128x128xf32>
    %15 = arith.addf %12, %14 : vector<128x128xf32>
    %16 = arith.truncf %15 : vector<128x128xf32> to vector<128x128xbf16>
    %c0_10 = arith.constant 0 : index
    %c0_11 = arith.constant 0 : index
    %17 = vector.load %arg6[%c0_10, %c0_11] : memref<128x128xbf16, #tpu.memory_space<vmem>>, vector<128x128xbf16>
    tpu.vector_store %arg6[%c0_10, %c0_11], %16 {strides = array<i32>} : memref<128x128xbf16, #tpu.memory_space<vmem>>, vector<128x128xbf16>,
    %cst_12 = arith.constant dense<0.000000e+00> : vector<128xf32>
    %18 = vector.multi_reduction <add>, %15, %cst_12 [0] : vector<128x128xf32> to vector<128xf32>
    %19 = vector.shape_cast %18 : vector<128xf32> to vector<1x128xf32>
    %c0_13 = arith.constant 0 : index
    %c0_14 = arith.constant 0 : index
    %c0_15 = arith.constant 0 : index
    %20 = vector.load %arg7[%c0_13, %c0_14, %c0_15] : memref<1x2x128xf32, #tpu.memory_space<vmem>>, vector<1x1x128xf32>
    %21 = vector.shape_cast %20 : vector<1x1x128xf32> to vector<1x128xf32>
    %22 = vector.shape_cast %19 : vector<1x128xf32> to vector<1x1x128xf32>
    tpu.vector_store %arg7[%c0_13, %c0_14, %c0_15], %22 {strides = array<i32>} : memref<1x2x128xf32, #tpu.memory_space<vmem>>, vector<1x1x128xf32>,
    %23 = arith.mulf %15, %15 : vector<128x128xf32>
    %cst_16 = arith.constant dense<0.000000e+00> : vector<128xf32>
    %24 = vector.multi_reduction <add>, %23, %cst_16 [0] : vector<128x128xf32> to vector<128xf32>
    %25 = vector.shape_cast %24 : vector<128xf32> to vector<1x128xf32>
    %c0_17 = arith.constant 0 : index
    %c1 = arith.constant 1 : index
    %c0_18 = arith.constant 0 : index
    %26 = vector.load %arg7[%c0_17, %c1, %c0_18] : memref<1x2x128xf32, #tpu.memory_space<vmem>>, vector<1x1x128xf32>
    %27 = vector.shape_cast %26 : vector<1x1x128xf32> to vector<1x128xf32>
    %28 = vector.shape_cast %25 : vector<1x128xf32> to vector<1x1x128xf32>
    tpu.vector_store %arg7[%c0_17, %c1, %c0_18], %28 {strides = array<i32>} : memref<1x2x128xf32, #tpu.memory_space<vmem>>, vector<1x1x128xf32>,
    return
  }
  func.func @transform_0(%arg0: i32) -> (i32, i32) {
    %c0_i32 = arith.constant 0 : i32
    %c0_i32_0 = arith.constant 0 : i32
    return %arg0, %c0_i32 : i32, i32
  }
  func.func @transform_1(%arg0: i32) -> (i32, i32) {
    %c0_i32 = arith.constant 0 : i32
    %c0_i32_0 = arith.constant 0 : i32
    %c0_i32_1 = arith.constant 0 : i32
    return %c0_i32, %c0_i32_0 : i32, i32
  }
  func.func @transform_2(%arg0: i32) -> (i32, i32) {
    %c0_i32 = arith.constant 0 : i32
    %c0_i32_0 = arith.constant 0 : i32
    %c0_i32_1 = arith.constant 0 : i32
    return %c0_i32, %c0_i32_0 : i32, i32
  }
  func.func @transform_3(%arg0: i32) -> (i32, i32) {
    %c0_i32 = arith.constant 0 : i32
    %c0_i32_0 = arith.constant 0 : i32
    %c0_i32_1 = arith.constant 0 : i32
    return %c0_i32, %c0_i32_0 : i32, i32
  }
  func.func @transform_4(%arg0: i32) -> (i32, i32) {
    %c0_i32 = arith.constant 0 : i32
    %c0_i32_0 = arith.constant 0 : i32
    %c0_i32_1 = arith.constant 0 : i32
    return %c0_i32, %c0_i32_0 : i32, i32
  }
  func.func @transform_5(%arg0: i32) -> (i32, i32) {
    %c0_i32 = arith.constant 0 : i32
    %c0_i32_0 = arith.constant 0 : i32
    return %arg0, %c0_i32 : i32, i32
  }
  func.func @transform_6(%arg0: i32) -> (i32, i32, i32) {
    %c0_i32 = arith.constant 0 : i32
    %c0_i32_0 = arith.constant 0 : i32
    %c0_i32_1 = arith.constant 0 : i32
    return %arg0, %c0_i32, %c0_i32_0 : i32, i32, i32
  }
}

module attributes {stable_mosaic.version = 11 : i64} {
  func.func @_final_kernel(%arg0: i32, %arg1: memref<128x128xbf16, #tpu.memory_space<vmem>>, %arg2: memref<128x4xbf16, #tpu.memory_space<vmem>>, %arg3: memref<4x128xbf16, #tpu.memory_space<vmem>>, %arg4: memref<1x128xf32, #tpu.memory_space<vmem>>, %arg5: memref<1x128xf32, #tpu.memory_space<vmem>>, %arg6: memref<1x128xf32, #tpu.memory_space<vmem>>, %arg7: memref<128x128xf32, #tpu.memory_space<vmem>>) attributes {dimension_semantics = [#tpu.dimension_semantics<parallel>], iteration_bounds = array<i64: 1>, scalar_prefetch = 0 : i64, scratch_operands = 0 : i64, tpu.core_type = #tpu.core_type<tc>, window_params = [{transform_indices = @transform_0, window_bounds = array<i64: 128, 128>}, {transform_indices = @transform_1, window_bounds = array<i64: 128, 4>}, {pipeline_mode = #tpu.pipeline_mode<synchronous>, transform_indices = @transform_2, window_bounds = array<i64: 4, 128>}, {pipeline_mode = #tpu.pipeline_mode<synchronous>, transform_indices = @transform_3, window_bounds = array<i64: 1, 128>}, {pipeline_mode = #tpu.pipeline_mode<synchronous>, transform_indices = @transform_4, window_bounds = array<i64: 1, 128>}, {pipeline_mode = #tpu.pipeline_mode<synchronous>, transform_indices = @transform_5, window_bounds = array<i64: 1, 128>}, {transform_indices = @transform_6, window_bounds = array<i64: 128, 128>}]} {
    %c0 = arith.constant 0 : index
    %c0_0 = arith.constant 0 : index
    %0 = vector.load %arg1[%c0, %c0_0] : memref<128x128xbf16, #tpu.memory_space<vmem>>, vector<128x128xbf16>
    %1 = arith.extf %0 : vector<128x128xbf16> to vector<128x128xf32>
    %c0_1 = arith.constant 0 : index
    %c0_2 = arith.constant 0 : index
    %2 = vector.load %arg5[%c0_1, %c0_2] : memref<1x128xf32, #tpu.memory_space<vmem>>, vector<1x128xf32>
    %3 = vector.broadcast %2 : vector<1x128xf32> to vector<128x128xf32>
    %4 = arith.mulf %1, %3 : vector<128x128xf32>
    %c0_3 = arith.constant 0 : index
    %c0_4 = arith.constant 0 : index
    %5 = vector.load %arg6[%c0_3, %c0_4] : memref<1x128xf32, #tpu.memory_space<vmem>>, vector<1x128xf32>
    %6 = vector.broadcast %5 : vector<1x128xf32> to vector<128x128xf32>
    %7 = arith.addf %4, %6 : vector<128x128xf32>
    %cst = arith.constant 0.000000e+00 : f32
    %8 = vector.broadcast %cst : f32 to vector<128x128xf32>
    %9 = arith.maximumf %7, %8 : vector<128x128xf32>
    %c0_5 = arith.constant 0 : index
    %c0_6 = arith.constant 0 : index
    %10 = vector.load %arg2[%c0_5, %c0_6] : memref<128x4xbf16, #tpu.memory_space<vmem>>, vector<128x4xbf16>
    %c0_7 = arith.constant 0 : index
    %c0_8 = arith.constant 0 : index
    %11 = vector.load %arg3[%c0_7, %c0_8] : memref<4x128xbf16, #tpu.memory_space<vmem>>, vector<4x128xbf16>
    %cst_9 = arith.constant dense<0.000000e+00> : vector<128x128xf32>
    %12 = tpu.matmul %10, %11, %cst_9 {dimension_numbers = #tpu.dot_dimension_numbers<[1], [0], [0], [1], [0, 0, 1, 1], [], []>} : vector<128x4xbf16>, vector<4x128xbf16>, vector<128x128xf32> -> vector<128x128xf32>
    %c0_10 = arith.constant 0 : index
    %c0_11 = arith.constant 0 : index
    %13 = vector.load %arg4[%c0_10, %c0_11] : memref<1x128xf32, #tpu.memory_space<vmem>>, vector<1x128xf32>
    %14 = vector.broadcast %13 : vector<1x128xf32> to vector<128x128xf32>
    %15 = arith.addf %12, %14 : vector<128x128xf32>
    %16 = arith.addf %9, %15 : vector<128x128xf32>
    %c0_12 = arith.constant 0 : index
    %c0_13 = arith.constant 0 : index
    %17 = vector.load %arg7[%c0_12, %c0_13] : memref<128x128xf32, #tpu.memory_space<vmem>>, vector<128x128xf32>
    tpu.vector_store %arg7[%c0_12, %c0_13], %16 {strides = array<i32>} : memref<128x128xf32, #tpu.memory_space<vmem>>, vector<128x128xf32>,
    return
  }
  func.func @transform_0(%arg0: i32) -> (i32, i32) {
    %c0_i32 = arith.constant 0 : i32
    %c0_i32_0 = arith.constant 0 : i32
    return %arg0, %c0_i32 : i32, i32
  }
  func.func @transform_1(%arg0: i32) -> (i32, i32) {
    %c0_i32 = arith.constant 0 : i32
    %c0_i32_0 = arith.constant 0 : i32
    return %arg0, %c0_i32 : i32, i32
  }
  func.func @transform_2(%arg0: i32) -> (i32, i32) {
    %c0_i32 = arith.constant 0 : i32
    %c0_i32_0 = arith.constant 0 : i32
    %c0_i32_1 = arith.constant 0 : i32
    return %c0_i32, %c0_i32_0 : i32, i32
  }
  func.func @transform_3(%arg0: i32) -> (i32, i32) {
    %c0_i32 = arith.constant 0 : i32
    %c0_i32_0 = arith.constant 0 : i32
    %c0_i32_1 = arith.constant 0 : i32
    return %c0_i32, %c0_i32_0 : i32, i32
  }
  func.func @transform_4(%arg0: i32) -> (i32, i32) {
    %c0_i32 = arith.constant 0 : i32
    %c0_i32_0 = arith.constant 0 : i32
    %c0_i32_1 = arith.constant 0 : i32
    return %c0_i32, %c0_i32_0 : i32, i32
  }
  func.func @transform_5(%arg0: i32) -> (i32, i32) {
    %c0_i32 = arith.constant 0 : i32
    %c0_i32_0 = arith.constant 0 : i32
    %c0_i32_1 = arith.constant 0 : i32
    return %c0_i32, %c0_i32_0 : i32, i32
  }
  func.func @transform_6(%arg0: i32) -> (i32, i32) {
    %c0_i32 = arith.constant 0 : i32
    %c0_i32_0 = arith.constant 0 : i32
    return %arg0, %c0_i32 : i32, i32
  }
}

module attributes {stable_mosaic.version = 11 : i64} {
  func.func @_conv3x3_kernel(%arg0: i32, %arg1: memref<4x1x8x8x128xbf16, #tpu.memory_space<vmem>>, %arg2: memref<9x128x128xbf16, #tpu.memory_space<vmem>>, %arg3: memref<1x128xf32, #tpu.memory_space<vmem>>, %arg4: memref<1x128xf32, #tpu.memory_space<vmem>>, %arg5: memref<1x128xf32, #tpu.memory_space<vmem>>, %arg6: memref<1x8x8x128xbf16, #tpu.memory_space<vmem>>, %arg7: memref<1x2x128xf32, #tpu.memory_space<vmem>>, %arg8: memref<4x9x9x128xbf16, #tpu.memory_space<vmem>>, %arg9: memref<64x128xf32, #tpu.memory_space<vmem>>) attributes {dimension_semantics = [#tpu.dimension_semantics<parallel>], iteration_bounds = array<i64: 2>, scalar_prefetch = 0 : i64, scratch_operands = 2 : i64, tpu.core_type = #tpu.core_type<tc>, window_params = [{transform_indices = @transform_0, window_bounds = array<i64: 4, 1, 8, 8, 128>}, {pipeline_mode = #tpu.pipeline_mode<synchronous>, transform_indices = @transform_1, window_bounds = array<i64: 9, 128, 128>}, {pipeline_mode = #tpu.pipeline_mode<synchronous>, transform_indices = @transform_2, window_bounds = array<i64: 1, 128>}, {pipeline_mode = #tpu.pipeline_mode<synchronous>, transform_indices = @transform_3, window_bounds = array<i64: 1, 128>}, {pipeline_mode = #tpu.pipeline_mode<synchronous>, transform_indices = @transform_4, window_bounds = array<i64: 1, 128>}, {transform_indices = @transform_5, window_bounds = array<i64: 1, 8, 8, 128>}, {transform_indices = @transform_6, window_bounds = array<i64: 1, 2, 128>}]} {
    %c0 = arith.constant 0 : index
    %c0_0 = arith.constant 0 : index
    %0 = vector.load %arg4[%c0, %c0_0] : memref<1x128xf32, #tpu.memory_space<vmem>>, vector<1x128xf32>
    %1 = vector.shape_cast %0 : vector<1x128xf32> to vector<1x1x128xf32>
    %c0_1 = arith.constant 0 : index
    %c0_2 = arith.constant 0 : index
    %2 = vector.load %arg5[%c0_1, %c0_2] : memref<1x128xf32, #tpu.memory_space<vmem>>, vector<1x128xf32>
    %3 = vector.shape_cast %2 : vector<1x128xf32> to vector<1x1x128xf32>
    %cst = arith.constant 0.000000e+00 : bf16
    %4 = vector.broadcast %cst : bf16 to vector<1x9x128xbf16>
    %c3 = arith.constant 3 : index
    %c8 = arith.constant 8 : index
    %c0_3 = arith.constant 0 : index
    %c0_4 = arith.constant 0 : index
    %5 = vector.load %arg8[%c3, %c8, %c0_3, %c0_4] : memref<4x9x9x128xbf16, #tpu.memory_space<vmem>>, vector<1x1x9x128xbf16>
    %6 = vector.shape_cast %5 : vector<1x1x9x128xbf16> to vector<1x9x128xbf16>
    %7 = vector.shape_cast %4 : vector<1x9x128xbf16> to vector<1x1x9x128xbf16>
    tpu.vector_store %arg8[%c3, %c8, %c0_3, %c0_4], %7 {strides = array<i32>} : memref<4x9x9x128xbf16, #tpu.memory_space<vmem>>, vector<1x1x9x128xbf16>,
    %cst_5 = arith.constant 0.000000e+00 : bf16
    %8 = vector.broadcast %cst_5 : bf16 to vector<9x1x128xbf16>
    %c3_6 = arith.constant 3 : index
    %c0_7 = arith.constant 0 : index
    %c8_8 = arith.constant 8 : index
    %c0_9 = arith.constant 0 : index
    %9 = vector.load %arg8[%c3_6, %c0_7, %c8_8, %c0_9] : memref<4x9x9x128xbf16, #tpu.memory_space<vmem>>, vector<1x9x1x128xbf16>
    %10 = vector.shape_cast %9 : vector<1x9x1x128xbf16> to vector<9x1x128xbf16>
    %11 = vector.shape_cast %8 : vector<9x1x128xbf16> to vector<1x9x1x128xbf16>
    tpu.vector_store %arg8[%c3_6, %c0_7, %c8_8, %c0_9], %11 {strides = array<i32>} : memref<4x9x9x128xbf16, #tpu.memory_space<vmem>>, vector<1x9x1x128xbf16>,
    %c0_10 = arith.constant 0 : index
    %c0_11 = arith.constant 0 : index
    %c0_12 = arith.constant 0 : index
    %c0_13 = arith.constant 0 : index
    %c0_14 = arith.constant 0 : index
    %12 = vector.load %arg1[%c0_10, %c0_11, %c0_12, %c0_13, %c0_14] : memref<4x1x8x8x128xbf16, #tpu.memory_space<vmem>>, vector<1x1x8x8x128xbf16>
    %13 = vector.shape_cast %12 : vector<1x1x8x8x128xbf16> to vector<8x8x128xbf16>
    %14 = arith.extf %13 : vector<8x8x128xbf16> to vector<8x8x128xf32>
    %15 = vector.broadcast %1 : vector<1x1x128xf32> to vector<8x8x128xf32>
    %16 = arith.mulf %14, %15 : vector<8x8x128xf32>
    %17 = vector.broadcast %3 : vector<1x1x128xf32> to vector<8x8x128xf32>
    %18 = arith.addf %16, %17 : vector<8x8x128xf32>
    %cst_15 = arith.constant 0.000000e+00 : f32
    %19 = vector.broadcast %cst_15 : f32 to vector<8x8x128xf32>
    %20 = arith.maximumf %18, %19 : vector<8x8x128xf32>
    %21 = arith.truncf %20 : vector<8x8x128xf32> to vector<8x8x128xbf16>
    %c3_16 = arith.constant 3 : index
    %c0_17 = arith.constant 0 : index
    %c0_18 = arith.constant 0 : index
    %c0_19 = arith.constant 0 : index
    %22 = vector.load %arg8[%c3_16, %c0_17, %c0_18, %c0_19] : memref<4x9x9x128xbf16, #tpu.memory_space<vmem>>, vector<1x8x8x128xbf16>
    %23 = vector.shape_cast %22 : vector<1x8x8x128xbf16> to vector<8x8x128xbf16>
    %24 = vector.shape_cast %21 : vector<8x8x128xbf16> to vector<1x8x8x128xbf16>
    tpu.vector_store %arg8[%c3_16, %c0_17, %c0_18, %c0_19], %24 {strides = array<i32>} : memref<4x9x9x128xbf16, #tpu.memory_space<vmem>>, vector<1x8x8x128xbf16>,
    %cst_20 = arith.constant 0.000000e+00 : bf16
    %25 = vector.broadcast %cst_20 : bf16 to vector<1x9x128xbf16>
    %c2 = arith.constant 2 : index
    %c8_21 = arith.constant 8 : index
    %c0_22 = arith.constant 0 : index
    %c0_23 = arith.constant 0 : index
    %26 = vector.load %arg8[%c2, %c8_21, %c0_22, %c0_23] : memref<4x9x9x128xbf16, #tpu.memory_space<vmem>>, vector<1x1x9x128xbf16>
    %27 = vector.shape_cast %26 : vector<1x1x9x128xbf16> to vector<1x9x128xbf16>
    %28 = vector.shape_cast %25 : vector<1x9x128xbf16> to vector<1x1x9x128xbf16>
    tpu.vector_store %arg8[%c2, %c8_21, %c0_22, %c0_23], %28 {strides = array<i32>} : memref<4x9x9x128xbf16, #tpu.memory_space<vmem>>, vector<1x1x9x128xbf16>,
    %cst_24 = arith.constant 0.000000e+00 : bf16
    %29 = vector.broadcast %cst_24 : bf16 to vector<9x1x128xbf16>
    %c2_25 = arith.constant 2 : index
    %c0_26 = arith.constant 0 : index
    %c0_27 = arith.constant 0 : index
    %c0_28 = arith.constant 0 : index
    %30 = vector.load %arg8[%c2_25, %c0_26, %c0_27, %c0_28] : memref<4x9x9x128xbf16, #tpu.memory_space<vmem>>, vector<1x9x1x128xbf16>
    %31 = vector.shape_cast %30 : vector<1x9x1x128xbf16> to vector<9x1x128xbf16>
    %32 = vector.shape_cast %29 : vector<9x1x128xbf16> to vector<1x9x1x128xbf16>
    tpu.vector_store %arg8[%c2_25, %c0_26, %c0_27, %c0_28], %32 {strides = array<i32>} : memref<4x9x9x128xbf16, #tpu.memory_space<vmem>>, vector<1x9x1x128xbf16>,
    %c1 = arith.constant 1 : index
    %c0_29 = arith.constant 0 : index
    %c0_30 = arith.constant 0 : index
    %c0_31 = arith.constant 0 : index
    %c0_32 = arith.constant 0 : index
    %33 = vector.load %arg1[%c1, %c0_29, %c0_30, %c0_31, %c0_32] : memref<4x1x8x8x128xbf16, #tpu.memory_space<vmem>>, vector<1x1x8x8x128xbf16>
    %34 = vector.shape_cast %33 : vector<1x1x8x8x128xbf16> to vector<8x8x128xbf16>
    %35 = arith.extf %34 : vector<8x8x128xbf16> to vector<8x8x128xf32>
    %36 = vector.broadcast %1 : vector<1x1x128xf32> to vector<8x8x128xf32>
    %37 = arith.mulf %35, %36 : vector<8x8x128xf32>
    %38 = vector.broadcast %3 : vector<1x1x128xf32> to vector<8x8x128xf32>
    %39 = arith.addf %37, %38 : vector<8x8x128xf32>
    %cst_33 = arith.constant 0.000000e+00 : f32
    %40 = vector.broadcast %cst_33 : f32 to vector<8x8x128xf32>
    %41 = arith.maximumf %39, %40 : vector<8x8x128xf32>
    %42 = arith.truncf %41 : vector<8x8x128xf32> to vector<8x8x128xbf16>
    %c2_34 = arith.constant 2 : index
    %c0_35 = arith.constant 0 : index
    %c1_36 = arith.constant 1 : index
    %c0_37 = arith.constant 0 : index
    %43 = vector.load %arg8[%c2_34, %c0_35, %c1_36, %c0_37] : memref<4x9x9x128xbf16, #tpu.memory_space<vmem>>, vector<1x8x8x128xbf16>
    %44 = vector.shape_cast %43 : vector<1x8x8x128xbf16> to vector<8x8x128xbf16>
    %45 = vector.shape_cast %42 : vector<8x8x128xbf16> to vector<1x8x8x128xbf16>
    tpu.vector_store %arg8[%c2_34, %c0_35, %c1_36, %c0_37], %45 {strides = array<i32>} : memref<4x9x9x128xbf16, #tpu.memory_space<vmem>>, vector<1x8x8x128xbf16>,
    %cst_38 = arith.constant 0.000000e+00 : bf16
    %46 = vector.broadcast %cst_38 : bf16 to vector<1x9x128xbf16>
    %c1_39 = arith.constant 1 : index
    %c0_40 = arith.constant 0 : index
    %c0_41 = arith.constant 0 : index
    %c0_42 = arith.constant 0 : index
    %47 = vector.load %arg8[%c1_39, %c0_40, %c0_41, %c0_42] : memref<4x9x9x128xbf16, #tpu.memory_space<vmem>>, vector<1x1x9x128xbf16>
    %48 = vector.shape_cast %47 : vector<1x1x9x128xbf16> to vector<1x9x128xbf16>
    %49 = vector.shape_cast %46 : vector<1x9x128xbf16> to vector<1x1x9x128xbf16>
    tpu.vector_store %arg8[%c1_39, %c0_40, %c0_41, %c0_42], %49 {strides = array<i32>} : memref<4x9x9x128xbf16, #tpu.memory_space<vmem>>, vector<1x1x9x128xbf16>,
    %cst_43 = arith.constant 0.000000e+00 : bf16
    %50 = vector.broadcast %cst_43 : bf16 to vector<9x1x128xbf16>
    %c1_44 = arith.constant 1 : index
    %c0_45 = arith.constant 0 : index
    %c8_46 = arith.constant 8 : index
    %c0_47 = arith.constant 0 : index
    %51 = vector.load %arg8[%c1_44, %c0_45, %c8_46, %c0_47] : memref<4x9x9x128xbf16, #tpu.memory_space<vmem>>, vector<1x9x1x128xbf16>
    %52 = vector.shape_cast %51 : vector<1x9x1x128xbf16> to vector<9x1x128xbf16>
    %53 = vector.shape_cast %50 : vector<9x1x128xbf16> to vector<1x9x1x128xbf16>
    tpu.vector_store %arg8[%c1_44, %c0_45, %c8_46, %c0_47], %53 {strides = array<i32>} : memref<4x9x9x128xbf16, #tpu.memory_space<vmem>>, vector<1x9x1x128xbf16>,
    %c2_48 = arith.constant 2 : index
    %c0_49 = arith.constant 0 : index
    %c0_50 = arith.constant 0 : index
    %c0_51 = arith.constant 0 : index
    %c0_52 = arith.constant 0 : index
    %54 = vector.load %arg1[%c2_48, %c0_49, %c0_50, %c0_51, %c0_52] : memref<4x1x8x8x128xbf16, #tpu.memory_space<vmem>>, vector<1x1x8x8x128xbf16>
    %55 = vector.shape_cast %54 : vector<1x1x8x8x128xbf16> to vector<8x8x128xbf16>
    %56 = arith.extf %55 : vector<8x8x128xbf16> to vector<8x8x128xf32>
    %57 = vector.broadcast %1 : vector<1x1x128xf32> to vector<8x8x128xf32>
    %58 = arith.mulf %56, %57 : vector<8x8x128xf32>
    %59 = vector.broadcast %3 : vector<1x1x128xf32> to vector<8x8x128xf32>
    %60 = arith.addf %58, %59 : vector<8x8x128xf32>
    %cst_53 = arith.constant 0.000000e+00 : f32
    %61 = vector.broadcast %cst_53 : f32 to vector<8x8x128xf32>
    %62 = arith.maximumf %60, %61 : vector<8x8x128xf32>
    %63 = arith.truncf %62 : vector<8x8x128xf32> to vector<8x8x128xbf16>
    %c1_54 = arith.constant 1 : index
    %c1_55 = arith.constant 1 : index
    %c0_56 = arith.constant 0 : index
    %c0_57 = arith.constant 0 : index
    %64 = vector.load %arg8[%c1_54, %c1_55, %c0_56, %c0_57] : memref<4x9x9x128xbf16, #tpu.memory_space<vmem>>, vector<1x8x8x128xbf16>
    %65 = vector.shape_cast %64 : vector<1x8x8x128xbf16> to vector<8x8x128xbf16>
    %66 = vector.shape_cast %63 : vector<8x8x128xbf16> to vector<1x8x8x128xbf16>
    tpu.vector_store %arg8[%c1_54, %c1_55, %c0_56, %c0_57], %66 {strides = array<i32>} : memref<4x9x9x128xbf16, #tpu.memory_space<vmem>>, vector<1x8x8x128xbf16>,
    %cst_58 = arith.constant 0.000000e+00 : bf16
    %67 = vector.broadcast %cst_58 : bf16 to vector<1x9x128xbf16>
    %c0_59 = arith.constant 0 : index
    %c0_60 = arith.constant 0 : index
    %c0_61 = arith.constant 0 : index
    %c0_62 = arith.constant 0 : index
    %68 = vector.load %arg8[%c0_59, %c0_60, %c0_61, %c0_62] : memref<4x9x9x128xbf16, #tpu.memory_space<vmem>>, vector<1x1x9x128xbf16>
    %69 = vector.shape_cast %68 : vector<1x1x9x128xbf16> to vector<1x9x128xbf16>
    %70 = vector.shape_cast %67 : vector<1x9x128xbf16> to vector<1x1x9x128xbf16>
    tpu.vector_store %arg8[%c0_59, %c0_60, %c0_61, %c0_62], %70 {strides = array<i32>} : memref<4x9x9x128xbf16, #tpu.memory_space<vmem>>, vector<1x1x9x128xbf16>,
    %cst_63 = arith.constant 0.000000e+00 : bf16
    %71 = vector.broadcast %cst_63 : bf16 to vector<9x1x128xbf16>
    %c0_64 = arith.constant 0 : index
    %c0_65 = arith.constant 0 : index
    %c0_66 = arith.constant 0 : index
    %c0_67 = arith.constant 0 : index
    %72 = vector.load %arg8[%c0_64, %c0_65, %c0_66, %c0_67] : memref<4x9x9x128xbf16, #tpu.memory_space<vmem>>, vector<1x9x1x128xbf16>
    %73 = vector.shape_cast %72 : vector<1x9x1x128xbf16> to vector<9x1x128xbf16>
    %74 = vector.shape_cast %71 : vector<9x1x128xbf16> to vector<1x9x1x128xbf16>
    tpu.vector_store %arg8[%c0_64, %c0_65, %c0_66, %c0_67], %74 {strides = array<i32>} : memref<4x9x9x128xbf16, #tpu.memory_space<vmem>>, vector<1x9x1x128xbf16>,
    %c3_68 = arith.constant 3 : index
    %c0_69 = arith.constant 0 : index
    %c0_70 = arith.constant 0 : index
    %c0_71 = arith.constant 0 : index
    %c0_72 = arith.constant 0 : index
    %75 = vector.load %arg1[%c3_68, %c0_69, %c0_70, %c0_71, %c0_72] : memref<4x1x8x8x128xbf16, #tpu.memory_space<vmem>>, vector<1x1x8x8x128xbf16>
    %76 = vector.shape_cast %75 : vector<1x1x8x8x128xbf16> to vector<8x8x128xbf16>
    %77 = arith.extf %76 : vector<8x8x128xbf16> to vector<8x8x128xf32>
    %78 = vector.broadcast %1 : vector<1x1x128xf32> to vector<8x8x128xf32>
    %79 = arith.mulf %77, %78 : vector<8x8x128xf32>
    %80 = vector.broadcast %3 : vector<1x1x128xf32> to vector<8x8x128xf32>
    %81 = arith.addf %79, %80 : vector<8x8x128xf32>
    %cst_73 = arith.constant 0.000000e+00 : f32
    %82 = vector.broadcast %cst_73 : f32 to vector<8x8x128xf32>
    %83 = arith.maximumf %81, %82 : vector<8x8x128xf32>
    %84 = arith.truncf %83 : vector<8x8x128xf32> to vector<8x8x128xbf16>
    %c0_74 = arith.constant 0 : index
    %c1_75 = arith.constant 1 : index
    %c1_76 = arith.constant 1 : index
    %c0_77 = arith.constant 0 : index
    %85 = vector.load %arg8[%c0_74, %c1_75, %c1_76, %c0_77] : memref<4x9x9x128xbf16, #tpu.memory_space<vmem>>, vector<1x8x8x128xbf16>
    %86 = vector.shape_cast %85 : vector<1x8x8x128xbf16> to vector<8x8x128xbf16>
    %87 = vector.shape_cast %84 : vector<8x8x128xbf16> to vector<1x8x8x128xbf16>
    tpu.vector_store %arg8[%c0_74, %c1_75, %c1_76, %c0_77], %87 {strides = array<i32>} : memref<4x9x9x128xbf16, #tpu.memory_space<vmem>>, vector<1x8x8x128xbf16>,
    %c0_78 = arith.constant 0 : index
    %c0_79 = arith.constant 0 : index
    %c0_80 = arith.constant 0 : index
    %c0_81 = arith.constant 0 : index
    %88 = vector.load %arg8[%c0_78, %c0_79, %c0_80, %c0_81] : memref<4x9x9x128xbf16, #tpu.memory_space<vmem>>, vector<1x8x8x128xbf16>
    %89 = vector.shape_cast %88 : vector<1x8x8x128xbf16> to vector<8x8x128xbf16>
    %90 = vector.shape_cast %89 : vector<8x8x128xbf16> to vector<64x128xbf16>
    %c0_82 = arith.constant 0 : index
    %c0_83 = arith.constant 0 : index
    %c0_84 = arith.constant 0 : index
    %91 = vector.load %arg2[%c0_82, %c0_83, %c0_84] : memref<9x128x128xbf16, #tpu.memory_space<vmem>>, vector<1x128x128xbf16>
    %92 = vector.shape_cast %91 : vector<1x128x128xbf16> to vector<128x128xbf16>
    %cst_85 = arith.constant dense<0.000000e+00> : vector<64x128xf32>
    %93 = tpu.matmul %90, %92, %cst_85 {dimension_numbers = #tpu.dot_dimension_numbers<[1], [0], [0], [1], [0, 0, 1, 1], [], []>} : vector<64x128xbf16>, vector<128x128xbf16>, vector<64x128xf32> -> vector<64x128xf32>
    %c0_86 = arith.constant 0 : index
    %c0_87 = arith.constant 0 : index
    %94 = vector.load %arg9[%c0_86, %c0_87] : memref<64x128xf32, #tpu.memory_space<vmem>>, vector<64x128xf32>
    tpu.vector_store %arg9[%c0_86, %c0_87], %93 {strides = array<i32>} : memref<64x128xf32, #tpu.memory_space<vmem>>, vector<64x128xf32>,
    %c1_88 = arith.constant 1 : index
    %c0_89 = arith.constant 0 : index
    %c0_90 = arith.constant 0 : index
    %c0_91 = arith.constant 0 : index
    %95 = vector.load %arg8[%c1_88, %c0_89, %c0_90, %c0_91] : memref<4x9x9x128xbf16, #tpu.memory_space<vmem>>, vector<1x8x8x128xbf16>
    %96 = vector.shape_cast %95 : vector<1x8x8x128xbf16> to vector<8x8x128xbf16>
    %97 = vector.shape_cast %96 : vector<8x8x128xbf16> to vector<64x128xbf16>
    %c1_92 = arith.constant 1 : index
    %c0_93 = arith.constant 0 : index
    %c0_94 = arith.constant 0 : index
    %98 = vector.load %arg2[%c1_92, %c0_93, %c0_94] : memref<9x128x128xbf16, #tpu.memory_space<vmem>>, vector<1x128x128xbf16>
    %99 = vector.shape_cast %98 : vector<1x128x128xbf16> to vector<128x128xbf16>
    %cst_95 = arith.constant dense<0.000000e+00> : vector<64x128xf32>
    %100 = tpu.matmul %97, %99, %cst_95 {dimension_numbers = #tpu.dot_dimension_numbers<[1], [0], [0], [1], [0, 0, 1, 1], [], []>} : vector<64x128xbf16>, vector<128x128xbf16>, vector<64x128xf32> -> vector<64x128xf32>
    %c0_96 = arith.constant 0 : index
    %c0_97 = arith.constant 0 : index
    %101 = vector.load %arg9[%c0_96, %c0_97] : memref<64x128xf32, #tpu.memory_space<vmem>>, vector<64x128xf32>
    %102 = arith.addf %101, %100 : vector<64x128xf32>
    %c0_98 = arith.constant 0 : index
    %c0_99 = arith.constant 0 : index
    %103 = vector.load %arg9[%c0_98, %c0_99] : memref<64x128xf32, #tpu.memory_space<vmem>>, vector<64x128xf32>
    tpu.vector_store %arg9[%c0_98, %c0_99], %102 {strides = array<i32>} : memref<64x128xf32, #tpu.memory_space<vmem>>, vector<64x128xf32>,
    %c0_100 = arith.constant 0 : index
    %c0_101 = arith.constant 0 : index
    %c1_102 = arith.constant 1 : index
    %c0_103 = arith.constant 0 : index
    %104 = vector.load %arg8[%c0_100, %c0_101, %c1_102, %c0_103] : memref<4x9x9x128xbf16, #tpu.memory_space<vmem>>, vector<1x8x8x128xbf16>
    %105 = vector.shape_cast %104 : vector<1x8x8x128xbf16> to vector<8x8x128xbf16>
    %106 = vector.shape_cast %105 : vector<8x8x128xbf16> to vector<64x128xbf16>
    %c2_104 = arith.constant 2 : index
    %c0_105 = arith.constant 0 : index
    %c0_106 = arith.constant 0 : index
    %107 = vector.load %arg2[%c2_104, %c0_105, %c0_106] : memref<9x128x128xbf16, #tpu.memory_space<vmem>>, vector<1x128x128xbf16>
    %108 = vector.shape_cast %107 : vector<1x128x128xbf16> to vector<128x128xbf16>
    %cst_107 = arith.constant dense<0.000000e+00> : vector<64x128xf32>
    %109 = tpu.matmul %106, %108, %cst_107 {dimension_numbers = #tpu.dot_dimension_numbers<[1], [0], [0], [1], [0, 0, 1, 1], [], []>} : vector<64x128xbf16>, vector<128x128xbf16>, vector<64x128xf32> -> vector<64x128xf32>
    %c0_108 = arith.constant 0 : index
    %c0_109 = arith.constant 0 : index
    %110 = vector.load %arg9[%c0_108, %c0_109] : memref<64x128xf32, #tpu.memory_space<vmem>>, vector<64x128xf32>
    %111 = arith.addf %110, %109 : vector<64x128xf32>
    %c0_110 = arith.constant 0 : index
    %c0_111 = arith.constant 0 : index
    %112 = vector.load %arg9[%c0_110, %c0_111] : memref<64x128xf32, #tpu.memory_space<vmem>>, vector<64x128xf32>
    tpu.vector_store %arg9[%c0_110, %c0_111], %111 {strides = array<i32>} : memref<64x128xf32, #tpu.memory_space<vmem>>, vector<64x128xf32>,
    %c2_112 = arith.constant 2 : index
    %c0_113 = arith.constant 0 : index
    %c0_114 = arith.constant 0 : index
    %c0_115 = arith.constant 0 : index
    %113 = vector.load %arg8[%c2_112, %c0_113, %c0_114, %c0_115] : memref<4x9x9x128xbf16, #tpu.memory_space<vmem>>, vector<1x8x8x128xbf16>
    %114 = vector.shape_cast %113 : vector<1x8x8x128xbf16> to vector<8x8x128xbf16>
    %115 = vector.shape_cast %114 : vector<8x8x128xbf16> to vector<64x128xbf16>
    %c3_116 = arith.constant 3 : index
    %c0_117 = arith.constant 0 : index
    %c0_118 = arith.constant 0 : index
    %116 = vector.load %arg2[%c3_116, %c0_117, %c0_118] : memref<9x128x128xbf16, #tpu.memory_space<vmem>>, vector<1x128x128xbf16>
    %117 = vector.shape_cast %116 : vector<1x128x128xbf16> to vector<128x128xbf16>
    %cst_119 = arith.constant dense<0.000000e+00> : vector<64x128xf32>
    %118 = tpu.matmul %115, %117, %cst_119 {dimension_numbers = #tpu.dot_dimension_numbers<[1], [0], [0], [1], [0, 0, 1, 1], [], []>} : vector<64x128xbf16>, vector<128x128xbf16>, vector<64x128xf32> -> vector<64x128xf32>
    %c0_120 = arith.constant 0 : index
    %c0_121 = arith.constant 0 : index
    %119 = vector.load %arg9[%c0_120, %c0_121] : memref<64x128xf32, #tpu.memory_space<vmem>>, vector<64x128xf32>
    %120 = arith.addf %119, %118 : vector<64x128xf32>
    %c0_122 = arith.constant 0 : index
    %c0_123 = arith.constant 0 : index
    %121 = vector.load %arg9[%c0_122, %c0_123] : memref<64x128xf32, #tpu.memory_space<vmem>>, vector<64x128xf32>
    tpu.vector_store %arg9[%c0_122, %c0_123], %120 {strides = array<i32>} : memref<64x128xf32, #tpu.memory_space<vmem>>, vector<64x128xf32>,
    %c3_124 = arith.constant 3 : index
    %c0_125 = arith.constant 0 : index
    %c0_126 = arith.constant 0 : index
    %c0_127 = arith.constant 0 : index
    %122 = vector.load %arg8[%c3_124, %c0_125, %c0_126, %c0_127] : memref<4x9x9x128xbf16, #tpu.memory_space<vmem>>, vector<1x8x8x128xbf16>
    %123 = vector.shape_cast %122 : vector<1x8x8x128xbf16> to vector<8x8x128xbf16>
    %124 = vector.shape_cast %123 : vector<8x8x128xbf16> to vector<64x128xbf16>
    %c4 = arith.constant 4 : index
    %c0_128 = arith.constant 0 : index
    %c0_129 = arith.constant 0 : index
    %125 = vector.load %arg2[%c4, %c0_128, %c0_129] : memref<9x128x128xbf16, #tpu.memory_space<vmem>>, vector<1x128x128xbf16>
    %126 = vector.shape_cast %125 : vector<1x128x128xbf16> to vector<128x128xbf16>
    %cst_130 = arith.constant dense<0.000000e+00> : vector<64x128xf32>
    %127 = tpu.matmul %124, %126, %cst_130 {dimension_numbers = #tpu.dot_dimension_numbers<[1], [0], [0], [1], [0, 0, 1, 1], [], []>} : vector<64x128xbf16>, vector<128x128xbf16>, vector<64x128xf32> -> vector<64x128xf32>
    %c0_131 = arith.constant 0 : index
    %c0_132 = arith.constant 0 : index
    %128 = vector.load %arg9[%c0_131, %c0_132] : memref<64x128xf32, #tpu.memory_space<vmem>>, vector<64x128xf32>
    %129 = arith.addf %128, %127 : vector<64x128xf32>
    %c0_133 = arith.constant 0 : index
    %c0_134 = arith.constant 0 : index
    %130 = vector.load %arg9[%c0_133, %c0_134] : memref<64x128xf32, #tpu.memory_space<vmem>>, vector<64x128xf32>
    tpu.vector_store %arg9[%c0_133, %c0_134], %129 {strides = array<i32>} : memref<64x128xf32, #tpu.memory_space<vmem>>, vector<64x128xf32>,
    %c2_135 = arith.constant 2 : index
    %c0_136 = arith.constant 0 : index
    %c1_137 = arith.constant 1 : index
    %c0_138 = arith.constant 0 : index
    %131 = vector.load %arg8[%c2_135, %c0_136, %c1_137, %c0_138] : memref<4x9x9x128xbf16, #tpu.memory_space<vmem>>, vector<1x8x8x128xbf16>
    %132 = vector.shape_cast %131 : vector<1x8x8x128xbf16> to vector<8x8x128xbf16>
    %133 = vector.shape_cast %132 : vector<8x8x128xbf16> to vector<64x128xbf16>
    %c5 = arith.constant 5 : index
    %c0_139 = arith.constant 0 : index
    %c0_140 = arith.constant 0 : index
    %134 = vector.load %arg2[%c5, %c0_139, %c0_140] : memref<9x128x128xbf16, #tpu.memory_space<vmem>>, vector<1x128x128xbf16>
    %135 = vector.shape_cast %134 : vector<1x128x128xbf16> to vector<128x128xbf16>
    %cst_141 = arith.constant dense<0.000000e+00> : vector<64x128xf32>
    %136 = tpu.matmul %133, %135, %cst_141 {dimension_numbers = #tpu.dot_dimension_numbers<[1], [0], [0], [1], [0, 0, 1, 1], [], []>} : vector<64x128xbf16>, vector<128x128xbf16>, vector<64x128xf32> -> vector<64x128xf32>
    %c0_142 = arith.constant 0 : index
    %c0_143 = arith.constant 0 : index
    %137 = vector.load %arg9[%c0_142, %c0_143] : memref<64x128xf32, #tpu.memory_space<vmem>>, vector<64x128xf32>
    %138 = arith.addf %137, %136 : vector<64x128xf32>
    %c0_144 = arith.constant 0 : index
    %c0_145 = arith.constant 0 : index
    %139 = vector.load %arg9[%c0_144, %c0_145] : memref<64x128xf32, #tpu.memory_space<vmem>>, vector<64x128xf32>
    tpu.vector_store %arg9[%c0_144, %c0_145], %138 {strides = array<i32>} : memref<64x128xf32, #tpu.memory_space<vmem>>, vector<64x128xf32>,
    %c0_146 = arith.constant 0 : index
    %c1_147 = arith.constant 1 : index
    %c0_148 = arith.constant 0 : index
    %c0_149 = arith.constant 0 : index
    %140 = vector.load %arg8[%c0_146, %c1_147, %c0_148, %c0_149] : memref<4x9x9x128xbf16, #tpu.memory_space<vmem>>, vector<1x8x8x128xbf16>
    %141 = vector.shape_cast %140 : vector<1x8x8x128xbf16> to vector<8x8x128xbf16>
    %142 = vector.shape_cast %141 : vector<8x8x128xbf16> to vector<64x128xbf16>
    %c6 = arith.constant 6 : index
    %c0_150 = arith.constant 0 : index
    %c0_151 = arith.constant 0 : index
    %143 = vector.load %arg2[%c6, %c0_150, %c0_151] : memref<9x128x128xbf16, #tpu.memory_space<vmem>>, vector<1x128x128xbf16>
    %144 = vector.shape_cast %143 : vector<1x128x128xbf16> to vector<128x128xbf16>
    %cst_152 = arith.constant dense<0.000000e+00> : vector<64x128xf32>
    %145 = tpu.matmul %142, %144, %cst_152 {dimension_numbers = #tpu.dot_dimension_numbers<[1], [0], [0], [1], [0, 0, 1, 1], [], []>} : vector<64x128xbf16>, vector<128x128xbf16>, vector<64x128xf32> -> vector<64x128xf32>
    %c0_153 = arith.constant 0 : index
    %c0_154 = arith.constant 0 : index
    %146 = vector.load %arg9[%c0_153, %c0_154] : memref<64x128xf32, #tpu.memory_space<vmem>>, vector<64x128xf32>
    %147 = arith.addf %146, %145 : vector<64x128xf32>
    %c0_155 = arith.constant 0 : index
    %c0_156 = arith.constant 0 : index
    %148 = vector.load %arg9[%c0_155, %c0_156] : memref<64x128xf32, #tpu.memory_space<vmem>>, vector<64x128xf32>
    tpu.vector_store %arg9[%c0_155, %c0_156], %147 {strides = array<i32>} : memref<64x128xf32, #tpu.memory_space<vmem>>, vector<64x128xf32>,
    %c1_157 = arith.constant 1 : index
    %c1_158 = arith.constant 1 : index
    %c0_159 = arith.constant 0 : index
    %c0_160 = arith.constant 0 : index
    %149 = vector.load %arg8[%c1_157, %c1_158, %c0_159, %c0_160] : memref<4x9x9x128xbf16, #tpu.memory_space<vmem>>, vector<1x8x8x128xbf16>
    %150 = vector.shape_cast %149 : vector<1x8x8x128xbf16> to vector<8x8x128xbf16>
    %151 = vector.shape_cast %150 : vector<8x8x128xbf16> to vector<64x128xbf16>
    %c7 = arith.constant 7 : index
    %c0_161 = arith.constant 0 : index
    %c0_162 = arith.constant 0 : index
    %152 = vector.load %arg2[%c7, %c0_161, %c0_162] : memref<9x128x128xbf16, #tpu.memory_space<vmem>>, vector<1x128x128xbf16>
    %153 = vector.shape_cast %152 : vector<1x128x128xbf16> to vector<128x128xbf16>
    %cst_163 = arith.constant dense<0.000000e+00> : vector<64x128xf32>
    %154 = tpu.matmul %151, %153, %cst_163 {dimension_numbers = #tpu.dot_dimension_numbers<[1], [0], [0], [1], [0, 0, 1, 1], [], []>} : vector<64x128xbf16>, vector<128x128xbf16>, vector<64x128xf32> -> vector<64x128xf32>
    %c0_164 = arith.constant 0 : index
    %c0_165 = arith.constant 0 : index
    %155 = vector.load %arg9[%c0_164, %c0_165] : memref<64x128xf32, #tpu.memory_space<vmem>>, vector<64x128xf32>
    %156 = arith.addf %155, %154 : vector<64x128xf32>
    %c0_166 = arith.constant 0 : index
    %c0_167 = arith.constant 0 : index
    %157 = vector.load %arg9[%c0_166, %c0_167] : memref<64x128xf32, #tpu.memory_space<vmem>>, vector<64x128xf32>
    tpu.vector_store %arg9[%c0_166, %c0_167], %156 {strides = array<i32>} : memref<64x128xf32, #tpu.memory_space<vmem>>, vector<64x128xf32>,
    %c0_168 = arith.constant 0 : index
    %c1_169 = arith.constant 1 : index
    %c1_170 = arith.constant 1 : index
    %c0_171 = arith.constant 0 : index
    %158 = vector.load %arg8[%c0_168, %c1_169, %c1_170, %c0_171] : memref<4x9x9x128xbf16, #tpu.memory_space<vmem>>, vector<1x8x8x128xbf16>
    %159 = vector.shape_cast %158 : vector<1x8x8x128xbf16> to vector<8x8x128xbf16>
    %160 = vector.shape_cast %159 : vector<8x8x128xbf16> to vector<64x128xbf16>
    %c8_172 = arith.constant 8 : index
    %c0_173 = arith.constant 0 : index
    %c0_174 = arith.constant 0 : index
    %161 = vector.load %arg2[%c8_172, %c0_173, %c0_174] : memref<9x128x128xbf16, #tpu.memory_space<vmem>>, vector<1x128x128xbf16>
    %162 = vector.shape_cast %161 : vector<1x128x128xbf16> to vector<128x128xbf16>
    %cst_175 = arith.constant dense<0.000000e+00> : vector<64x128xf32>
    %163 = tpu.matmul %160, %162, %cst_175 {dimension_numbers = #tpu.dot_dimension_numbers<[1], [0], [0], [1], [0, 0, 1, 1], [], []>} : vector<64x128xbf16>, vector<128x128xbf16>, vector<64x128xf32> -> vector<64x128xf32>
    %c0_176 = arith.constant 0 : index
    %c0_177 = arith.constant 0 : index
    %164 = vector.load %arg9[%c0_176, %c0_177] : memref<64x128xf32, #tpu.memory_space<vmem>>, vector<64x128xf32>
    %165 = arith.addf %164, %163 : vector<64x128xf32>
    %c0_178 = arith.constant 0 : index
    %c0_179 = arith.constant 0 : index
    %166 = vector.load %arg9[%c0_178, %c0_179] : memref<64x128xf32, #tpu.memory_space<vmem>>, vector<64x128xf32>
    tpu.vector_store %arg9[%c0_178, %c0_179], %165 {strides = array<i32>} : memref<64x128xf32, #tpu.memory_space<vmem>>, vector<64x128xf32>,
    %c0_180 = arith.constant 0 : index
    %c0_181 = arith.constant 0 : index
    %167 = vector.load %arg9[%c0_180, %c0_181] : memref<64x128xf32, #tpu.memory_space<vmem>>, vector<64x128xf32>
    %c0_182 = arith.constant 0 : index
    %c0_183 = arith.constant 0 : index
    %168 = vector.load %arg3[%c0_182, %c0_183] : memref<1x128xf32, #tpu.memory_space<vmem>>, vector<1x128xf32>
    %169 = vector.broadcast %168 : vector<1x128xf32> to vector<64x128xf32>
    %170 = arith.addf %167, %169 : vector<64x128xf32>
    %171 = vector.shape_cast %170 : vector<64x128xf32> to vector<1x8x8x128xf32>
    %172 = arith.truncf %171 : vector<1x8x8x128xf32> to vector<1x8x8x128xbf16>
    %c0_184 = arith.constant 0 : index
    %c0_185 = arith.constant 0 : index
    %c0_186 = arith.constant 0 : index
    %c0_187 = arith.constant 0 : index
    %173 = vector.load %arg6[%c0_184, %c0_185, %c0_186, %c0_187] : memref<1x8x8x128xbf16, #tpu.memory_space<vmem>>, vector<1x8x8x128xbf16>
    tpu.vector_store %arg6[%c0_184, %c0_185, %c0_186, %c0_187], %172 {strides = array<i32>} : memref<1x8x8x128xbf16, #tpu.memory_space<vmem>>, vector<1x8x8x128xbf16>,
    %cst_188 = arith.constant dense<0.000000e+00> : vector<128xf32>
    %174 = vector.multi_reduction <add>, %170, %cst_188 [0] : vector<64x128xf32> to vector<128xf32>
    %175 = vector.shape_cast %174 : vector<128xf32> to vector<1x128xf32>
    %c0_189 = arith.constant 0 : index
    %c0_190 = arith.constant 0 : index
    %c0_191 = arith.constant 0 : index
    %176 = vector.load %arg7[%c0_189, %c0_190, %c0_191] : memref<1x2x128xf32, #tpu.memory_space<vmem>>, vector<1x1x128xf32>
    %177 = vector.shape_cast %176 : vector<1x1x128xf32> to vector<1x128xf32>
    %178 = vector.shape_cast %175 : vector<1x128xf32> to vector<1x1x128xf32>
    tpu.vector_store %arg7[%c0_189, %c0_190, %c0_191], %178 {strides = array<i32>} : memref<1x2x128xf32, #tpu.memory_space<vmem>>, vector<1x1x128xf32>,
    %179 = arith.mulf %170, %170 : vector<64x128xf32>
    %cst_192 = arith.constant dense<0.000000e+00> : vector<128xf32>
    %180 = vector.multi_reduction <add>, %179, %cst_192 [0] : vector<64x128xf32> to vector<128xf32>
    %181 = vector.shape_cast %180 : vector<128xf32> to vector<1x128xf32>
    %c0_193 = arith.constant 0 : index
    %c1_194 = arith.constant 1 : index
    %c0_195 = arith.constant 0 : index
    %182 = vector.load %arg7[%c0_193, %c1_194, %c0_195] : memref<1x2x128xf32, #tpu.memory_space<vmem>>, vector<1x1x128xf32>
    %183 = vector.shape_cast %182 : vector<1x1x128xf32> to vector<1x128xf32>
    %184 = vector.shape_cast %181 : vector<1x128xf32> to vector<1x1x128xf32>
    tpu.vector_store %arg7[%c0_193, %c1_194, %c0_195], %184 {strides = array<i32>} : memref<1x2x128xf32, #tpu.memory_space<vmem>>, vector<1x1x128xf32>,
    return
  }
  func.func @transform_0(%arg0: i32) -> (i32, i32, i32, i32, i32) {
    %c0_i32 = arith.constant 0 : i32
    %c0_i32_0 = arith.constant 0 : i32
    %c0_i32_1 = arith.constant 0 : i32
    %c0_i32_2 = arith.constant 0 : i32
    %c0_i32_3 = arith.constant 0 : i32
    return %c0_i32, %arg0, %c0_i32_0, %c0_i32_1, %c0_i32_2 : i32, i32, i32, i32, i32
  }
  func.func @transform_1(%arg0: i32) -> (i32, i32, i32) {
    %c0_i32 = arith.constant 0 : i32
    %c0_i32_0 = arith.constant 0 : i32
    %c0_i32_1 = arith.constant 0 : i32
    %c0_i32_2 = arith.constant 0 : i32
    return %c0_i32, %c0_i32_0, %c0_i32_1 : i32, i32, i32
  }
  func.func @transform_2(%arg0: i32) -> (i32, i32) {
    %c0_i32 = arith.constant 0 : i32
    %c0_i32_0 = arith.constant 0 : i32
    %c0_i32_1 = arith.constant 0 : i32
    return %c0_i32, %c0_i32_0 : i32, i32
  }
  func.func @transform_3(%arg0: i32) -> (i32, i32) {
    %c0_i32 = arith.constant 0 : i32
    %c0_i32_0 = arith.constant 0 : i32
    %c0_i32_1 = arith.constant 0 : i32
    return %c0_i32, %c0_i32_0 : i32, i32
  }
  func.func @transform_4(%arg0: i32) -> (i32, i32) {
    %c0_i32 = arith.constant 0 : i32
    %c0_i32_0 = arith.constant 0 : i32
    %c0_i32_1 = arith.constant 0 : i32
    return %c0_i32, %c0_i32_0 : i32, i32
  }
  func.func @transform_5(%arg0: i32) -> (i32, i32, i32, i32) {
    %c0_i32 = arith.constant 0 : i32
    %c0_i32_0 = arith.constant 0 : i32
    %c0_i32_1 = arith.constant 0 : i32
    %c0_i32_2 = arith.constant 0 : i32
    return %arg0, %c0_i32, %c0_i32_0, %c0_i32_1 : i32, i32, i32, i32
  }
  func.func @transform_6(%arg0: i32) -> (i32, i32, i32) {
    %c0_i32 = arith.constant 0 : i32
    %c0_i32_0 = arith.constant 0 : i32
    %c0_i32_1 = arith.constant 0 : i32
    return %arg0, %c0_i32, %c0_i32_0 : i32, i32, i32
  }
}

</mosaic_0001>

<bundles_post_ra>
// kernel: bottleneck_forward.4
= control target key start
LH: loop header
LB: loop body
LE: loop exit
PB: predicated region body
PF: predicated region fallthrough
CT: control target
= control target key end

     0   :  { %s818_s15 = smov 0   ;;  %s876_s0 = inlined_call_operand.vmem [shape: bf16[512,4], index: 0, kind: input, shape index: {}]   ;;  %s877_s1 = inlined_call_operand.vmem [shape: bf16[4,128], index: 1, kind: input, shape index: {}]   ;;  %s878_s2 = inlined_call_operand.vmem [shape: f32[1,128], index: 2, kind: input, shape index: {}]   ;;  %s879_s3 = inlined_call_operand.vmem [shape: bf16[512,128], index: 3, kind: output, shape index: {0}]   ;;  %s880_s4 = inlined_call_operand.vmem [shape: f32[4,2,128], index: 4, kind: output, shape index: {1}]  }
   0x1 LB: > { %s824_s16 = sadd.s32 4294967295, %s791_s15   ;;  %p634_p0 = scmp.ge.s32.totalorder %s791_s15, 1  ;;  %s791_s15 = sphi %s818_s15, %s15_s15  }
   0x2   : > { %p166_p1 = scmp.lt.s32.totalorder %s791_s15, 5 }
   0x4   : > { %p167_p2 = pnand %p634_p0, %p166_p1 }
   0x5   : > { %s635_s19 = sshll.u32 (!%p167_p2), %s824_s16, 4  ;;  %p208_p4 = scmp.lt.s32.totalorder (!%p167_p2), %s824_s16, 3 }
   0x6   : > { %170 = sbr.rel (%p167_p2) target bundleno = 262 (0x106), region = 32  ;;  %p197_p3 = scmp.lt.s32.totalorder (!%p167_p2), %s635_s19, 63 }
   0xb   : > { %v229_v0 = vld [vmem:[%s877_s1] sm:$0x3]  ;;  %vm302_vm0 = vcmask 1041408   ;;  %s882_s19 = smov (!%p197_p3, %s635_s19), 63  ;;  %vm277_vm1 = vcmask 31744   ;;  %s884_s16 = smov (!%p208_p4, %s824_s16), 3 }
   0xc   : > { %767 = vmatprep.subr.msk.bf16.mxu0 %vm302_vm0, %v229_v0  ;;  %v304_v1 = vsel %vm302_vm0, %v229_v0, 0  ;;  %768 = vmatprep.subr.msk.bf16.mxu1 %vm302_vm0, %v229_v0  ;;  %s636_s20 = sshll.u32 %s882_s19, 2  ;;  %v640_v11 = vld [vmem:[%s878_s2] ss:$0 sm:$0xff]  ;;  %s639_s29 = sshll.u32 %s884_s16, 1 }
   0xd   : > { %748 = vmatpush3.bf16.msra.mxu0 %v304_v1  ;;  %766 = vmatpush3.bf16.msra.mxu1 %v304_v1  ;;  %s200_s23 = scalar_lea.vmem %s876_s0, %s636_s20  ;;  %s852_s28 = scalar_lea.vmem %s879_s3, %s636_s20 }
   0xe   : > { %v777_v2 = vld [vmem:[%s200_s23] sm:$0xff]   ;;  %v778_v3 = vld [vmem:[%s200_s23 + $0x8] sm:$0xff]   ;;  %v779_v4 = vld [vmem:[%s200_s23 + $0x10] sm:$0xff]   ;;  %s211_s6 = scalar_lea.vmem %s880_s4, %s639_s29 }
   0xf   : > { %749 = vmatprep.mubr.msk.bf16.mxu0 %vm277_vm1, %v777_v2  ;;  %v781_v5 = vld [vmem:[%s200_s23 + $0x20] sm:$0xff]   ;;  %v782_v6 = vld [vmem:[%s200_s23 + $0x28] sm:$0xff]   ;;  %v783_v7 = vld [vmem:[%s200_s23 + $0x30] sm:$0xff]  }
  0x10   : > { %750 = vmatmul.mubr.msk.bf16.vlgmr.msra.gmra.mxu0 %vm277_vm1, %v778_v3  ;;  %757 = vmatprep.mubr.msk.bf16.mxu1 %vm277_vm1, %v781_v5  ;;  %v780_v8 = vld [vmem:[%s200_s23 + $0x18] sm:$0xff]  }
  0x11   : > { %753 = vmatprep.mubr.msk.bf16.mxu0 %vm277_vm1, %v779_v4  ;;  %758 = vmatmul.mubr.msk.bf16.vlgmr.msra.gmra.mxu1 %vm277_vm1, %v782_v6  ;;  %v784_v9 = vld [vmem:[%s200_s23 + $0x38] sm:$0xff]  }
  0x12   : > { %761 = vmatprep.mubr.msk.bf16.mxu1 %vm277_vm1, %v783_v7 }
  0x18   : > { %754 = vmatmul.mubr.msk.bf16.gmra.mxu0 %vm277_vm1, %v780_v8 }
  0x19   : > { %762 = vmatmul.mubr.msk.bf16.gmra.mxu1 %vm277_vm1, %v784_v9 }
  0xd0   : > { %v751_v10 = vpop.f32.mrf.mxu0 }
  0xd1   : > { %v759_v14 = vpop.f32.mrf.mxu1  ;;  %v349_v15 = vadd.f32 %v751_v10, %v640_v11 }
  0xd2   : > { %v340_v12 = vpop.f32.mrf.mxu0  ;;  %v854_v23 = vadd.f32 %v759_v14, %v640_v11 }
  0xd3   : > { %v341_v16 = vadd.f32 %v640_v11, %v340_v12  ;;  %v372_v19 = vpop.f32.mrf.mxu1  ;;  %v507_v33 = vmul.f32 %v349_v15, %v349_v15 }
  0xd4   : > { %v752_v13 = vpop.f32.mrf.mxu0  ;;  %v373_v30 = vadd.f32 %v640_v11, %v372_v19 }
  0xd5   : > { %v352_v17 = vadd.f32 %v752_v13, %v640_v11  ;;  %v760_v24 = vpop.f32.mrf.mxu1  ;;  %v505_v25 = vmul.f32 %v341_v16, %v341_v16 }
  0xd6   : > { %v343_v18 = vpop.f32.mrf.mxu0  ;;  %v384_v31 = vadd.f32 %v760_v24, %v640_v11  ;;  %v513_v8 = vmul.f32 %v373_v30, %v373_v30 }
  0xd7   : > { %v699_v20 = vpack.c.bf16 %v352_v17, %v349_v15  ;;  %v344_v21 = vadd.f32 %v640_v11, %v343_v18  ;;  %v375_v32 = vpop.f32.mrf.mxu1  ;;  %v508_v37 = vmul.f32 %v352_v17, %v352_v17 }
  0xd8   : > { %v755_v22 = vpop.f32.mrf.mxu0  ;;  %v719_v39 = vpack.c.bf16 %v384_v31, %v854_v23  ;;  %v376_v40 = vadd.f32 %v640_v11, %v375_v32 }
  0xd9   : > { %731 = vst [vmem:[%s852_s28 + $0x8] sm:$0xff] %v699_v20   ;;  %v694_v26 = vpack.c.bf16 %v344_v21, %v341_v16  ;;  %v483_v27 = vadd.f32 %v344_v21, %v341_v16  ;;  %v506_v28 = vmul.f32 %v344_v21, %v344_v21  ;;  %v763_v41 = vpop.f32.mrf.mxu1  ;;  %v365_v43 = vadd.f32 %v755_v22, %v640_v11 }
  0xda   : > { %v356_v29 = vpop.f32.mrf.mxu0  ;;  %735 = vst [vmem:[%s852_s28 + $0x28] sm:$0xff] %v719_v39   ;;  %v714_v48 = vpack.c.bf16 %v376_v40, %v373_v30  ;;  %v397_v53 = vadd.f32 %v763_v41, %v640_v11  ;;  %v514_v13 = vmul.f32 %v376_v40, %v376_v40 }
  0xdb   : > { %695 = vst [vmem:[%s852_s28] sm:$0xff] %v694_v26   ;;  %v484_v34 = vadd.f32 %v483_v27, %v349_v15  ;;  %v521_v35 = vadd.f32 %v506_v28, %v505_v25  ;;  %v357_v36 = vadd.f32 %v640_v11, %v356_v29  ;;  %v388_v49 = vpop.f32.mrf.mxu1  ;;  %v511_v1 = vmul.f32 %v365_v43, %v365_v43 }
  0xdc   : > { %v756_v38 = vpop.f32.mrf.mxu0  ;;  %734 = vst [vmem:[%s852_s28 + $0x20] sm:$0xff] %v714_v48   ;;  %v389_v57 = vadd.f32 %v640_v11, %v388_v49  ;;  %v515_v15 = vmul.f32 %v854_v23, %v854_v23  ;;  %v519_v27 = vmul.f32 %v397_v53, %v397_v53 }
  0xdd   : > { %v522_v42 = vadd.f32 %v521_v35, %v507_v33  ;;  %v485_v44 = vadd.f32 %v484_v34, %v352_v17  ;;  %v368_v45 = vadd.f32 %v756_v38, %v640_v11  ;;  %v509_v46 = vmul.f32 %v357_v36, %v357_v36  ;;  %v764_v55 = vpop.f32.mrf.mxu1 }
  0xde   : > { %v359_v47 = vpop.f32.mrf.mxu0  ;;  %v400_v58 = vadd.f32 %v764_v55, %v640_v11  ;;  %v516_v17 = vmul.f32 %v384_v31, %v384_v31  ;;  %v517_v21 = vmul.f32 %v389_v57, %v389_v57 }
  0xdf   : > { %v486_v50 = vadd.f32 %v485_v44, %v357_v36  ;;  %v523_v51 = vadd.f32 %v522_v42, %v508_v37  ;;  %v709_v52 = vpack.c.bf16 %v368_v45, %v365_v43  ;;  %v360_v54 = vadd.f32 %v640_v11, %v359_v47  ;;  %v391_v62 = vpop.f32.mrf.mxu1 }
  0xe0   : > { %v729_v63 = vpack.c.bf16 %v400_v58, %v397_v53  ;;  %v392_v0 = vadd.f32 %v640_v11, %v391_v62  ;;  %v512_v5 = vmul.f32 %v368_v45, %v368_v45 }
  0xe1   : > { %v524_v56 = vadd.f32 %v523_v51, %v509_v46  ;;  %733 = vst [vmem:[%s852_s28 + $0x18] sm:$0xff] %v709_v52   ;;  %v704_v59 = vpack.c.bf16 %v360_v54, %v357_v36  ;;  %v487_v60 = vadd.f32 %v486_v50, %v360_v54  ;;  %v510_v61 = vmul.f32 %v360_v54, %v360_v54 }
  0xe2   : > { %737 = vst [vmem:[%s852_s28 + $0x38] sm:$0xff] %v729_v63   ;;  %v724_v4 = vpack.c.bf16 %v392_v0, %v389_v57  ;;  %v518_v26 = vmul.f32 %v392_v0, %v392_v0 }
  0xe3   : > { %732 = vst [vmem:[%s852_s28 + $0x10] sm:$0xff] %v704_v59   ;;  %v488_v2 = vadd.f32 %v487_v60, %v365_v43  ;;  %v525_v3 = vadd.f32 %v524_v56, %v510_v61 }
  0xe4   : > { %736 = vst [vmem:[%s852_s28 + $0x30] sm:$0xff] %v724_v4  }
  0xe5   : > { %v526_v6 = vadd.f32 %v525_v3, %v511_v1  ;;  %v489_v7 = vadd.f32 %v488_v2, %v368_v45 }
  0xe7   : > { %v490_v9 = vadd.f32 %v489_v7, %v373_v30  ;;  %v527_v10 = vadd.f32 %v526_v6, %v512_v5  ;;  %v520_v30 = vmul.f32 %v400_v58, %v400_v58 }
  0xe9   : > { %v491_v12 = vadd.f32 %v490_v9, %v376_v40  ;;  %v528_v14 = vadd.f32 %v527_v10, %v513_v8 }
  0xeb   : > { %v492_v11 = vadd.f32 %v491_v12, %v854_v23  ;;  %v529_v16 = vadd.f32 %v528_v14, %v514_v13 }
  0xed   : > { %v530_v18 = vadd.f32 %v529_v16, %v515_v15  ;;  %v493_v19 = vadd.f32 %v492_v11, %v384_v31 }
  0xef   : > { %v494_v20 = vadd.f32 %v493_v19, %v389_v57  ;;  %v531_v22 = vadd.f32 %v530_v18, %v516_v17 }
  0xf1   : > { %v532_v24 = vadd.f32 %v531_v22, %v517_v21  ;;  %v495_v25 = vadd.f32 %v494_v20, %v392_v0 }
  0xf3   : > { %v496_v28 = vadd.f32 %v495_v25, %v397_v53  ;;  %v533_v29 = vadd.f32 %v532_v24, %v518_v26 }
  0xf5   : > { %v497_v32 = vadd.f32 %v496_v28, %v400_v58  ;;  %v534_v33 = vadd.f32 %v533_v29, %v519_v27 }
  0xf7   : > { %v498_v34 = vrot.slane %v497_v32, 4  ;;  %v535_v23 = vadd.f32 %v534_v33, %v520_v30 }
  0xf9   : > { %v499_v35 = vadd.f32 %v498_v34, %v497_v32  ;;  %v536_v36 = vrot.slane %v535_v23, 4 }
  0xfb   : > { %v500_v31 = vrot.slane %v499_v35, 2  ;;  %v537_v37 = vadd.f32 %v536_v36, %v535_v23 }
  0xfd   : > { %v501_v38 = vadd.f32 %v500_v31, %v499_v35  ;;  %v538_v39 = vrot.slane %v537_v37, 2 }
  0xff   : > { %v502_v40 = vrot.slane %v501_v38, 1  ;;  %v539_v41 = vadd.f32 %v538_v39, %v537_v37 }
 0x101   : > { %v503_v42 = vadd.f32 %v502_v40, %v501_v38  ;;  %v540_v43 = vrot.slane %v539_v41, 1 }
 0x103   : > { %504 = vst [vmem:[%s211_s6] sm:$0x1] %v503_v42  ;;  %v541_v44 = vadd.f32 %v540_v43, %v539_v41 }
 0x105   : > { %542 = vst [vmem:[%s211_s6 + $0x1] sm:$0x1] %v541_v44 }
 0x106 PF: > { %s15_s15 = sadd.s32 1, %s791_s15  }
 0x107   : > { %p12_p5 = scmp.ge.s32.totalorder %s15_s15, 6  }
 0x109   :  { %14 = sbr.rel (!%p12_p5) target bundleno = 1 (0x1), region = 74 }

// kernel: bottleneck_forward.6
= control target key start
LH: loop header
LB: loop body
LE: loop exit
PB: predicated region body
PF: predicated region fallthrough
CT: control target
= control target key end

     0   :  { %s812_s1 = inlined_call_operand.vmem [shape: bf16[128,128], index: 1, kind: input, shape index: {}]   ;;  %s813_s0 = inlined_call_operand.vmem [shape: bf16[128,128], index: 0, kind: input, shape index: {}]   ;;  %s814_s3 = inlined_call_operand.vmem [shape: f32[1,128], index: 3, kind: input, shape index: {}]   ;;  %s815_s4 = inlined_call_operand.vmem [shape: f32[1,128], index: 4, kind: input, shape index: {}]   ;;  %s816_s2 = inlined_call_operand.vmem [shape: f32[1,128], index: 2, kind: input, shape index: {}]   ;;  %s817_s5 = inlined_call_operand.vmem [shape: bf16[128,128], index: 5, kind: output, shape index: {0}]   ;;  %s818_s6 = inlined_call_operand.vmem [shape: f32[1,2,128], index: 6, kind: output, shape index: {1}]  }
   0x1   :  { %v634_v0 = vld [vmem:[%s812_s1 + $0x38] sm:$0xff]   ;;  %v635_v1 = vld [vmem:[%s812_s1 + $0x30] sm:$0xff]   ;;  %v636_v2 = vld [vmem:[%s812_s1 + $0x28] sm:$0xff]  }
   0x2   :  { %586 = vmatprep.subr.bf16.mxu0 %v634_v0  ;;  %618 = vmatprep.subr.bf16.mxu1 %v634_v0  ;;  %v637_v3 = vld [vmem:[%s812_s1 + $0x20] sm:$0xff]   ;;  %v556_v8 = vld [vmem:[%s813_s0 + $0x8] sm:$0xff]   ;;  %v557_v9 = vld [vmem:[%s813_s0 + $0x10] sm:$0xff]  }
   0x3   :  { %587 = vmatpush3.bf16.msra.mxu0 %v634_v0  ;;  %626 = vmatpush3.bf16.msra.mxu1 %v634_v0  ;;  %v485_v4 = vld [vmem:[%s813_s0] sm:$0xff]   ;;  %v490_v11 = vunpack.c.l.bf16 %v556_v8  ;;  %v491_v14 = vunpack.c.h.bf16 %v556_v8  ;;  %v638_v16 = vld [vmem:[%s812_s1 + $0x18] sm:$0xff]   ;;  %v494_v17 = vunpack.c.l.bf16 %v557_v9  ;;  %v495_v21 = vunpack.c.h.bf16 %v557_v9  ;;  %v560_v27 = vld [vmem:[%s813_s0 + $0x28] sm:$0xff]  }
   0x4   :  { %588 = vmatprep.subr.bf16.mxu0 %v635_v1  ;;  %619 = vmatprep.subr.bf16.mxu1 %v635_v1  ;;  %v695_v5 = vld [vmem:[%s814_s3] ss:$0 sm:$0xff]  ;;  %v486_v6 = vunpack.c.l.bf16 %v485_v4  ;;  %v487_v7 = vunpack.c.h.bf16 %v485_v4  ;;  %v558_v22 = vld [vmem:[%s813_s0 + $0x18] sm:$0xff]   ;;  %v639_v28 = vld [vmem:[%s812_s1 + $0x10] sm:$0xff]   ;;  %v506_v38 = vunpack.c.l.bf16 %v560_v27  ;;  %v507_v42 = vunpack.c.h.bf16 %v560_v27 }
   0x5   :  { %v706_v10 = vld [vmem:[%s815_s4] ss:$0 sm:$0xff]  ;;  %v64_v20 = vmul.f32 %v490_v11, %v695_v5  ;;  %v65_v26 = vmul.f32 %v491_v14, %v695_v5  ;;  %v66_v29 = vmul.f32 %v494_v17, %v695_v5  ;;  %v561_v30 = vld [vmem:[%s813_s0 + $0x30] sm:$0xff]   ;;  %v498_v32 = vunpack.c.l.bf16 %v558_v22  ;;  %v562_v39 = vld [vmem:[%s813_s0 + $0x38] sm:$0xff]  }
   0x6   :  { %v62_v12 = vmul.f32 %v486_v6, %v695_v5  ;;  %v63_v13 = vmul.f32 %v487_v7, %v695_v5  ;;  %v559_v15 = vld [vmem:[%s813_s0 + $0x20] sm:$0xff]   ;;  %v499_v33 = vunpack.c.h.bf16 %v558_v22  ;;  %v67_v36 = vmul.f32 %v495_v21, %v695_v5  ;;  %v640_v44 = vld [vmem:[%s812_s1 + $0x8] sm:$0xff]  }
   0x7   :  { %589 = vmatpush3.bf16.msra.mxu0 %v635_v1  ;;  %627 = vmatpush3.bf16.msra.mxu1 %v635_v1  ;;  %v502_v23 = vunpack.c.l.bf16 %v559_v15  ;;  %v503_v34 = vunpack.c.h.bf16 %v559_v15  ;;  %v87_v35 = vadd.f32 %v706_v10, %v64_v20  ;;  %v88_v40 = vadd.f32 %v706_v10, %v65_v26  ;;  %v641_v61 = vld [vmem:[%s812_s1] sm:$0xff]  }
   0x8   :  { %590 = vmatprep.subr.bf16.mxu0 %v636_v2  ;;  %620 = vmatprep.subr.bf16.mxu1 %v636_v2  ;;  %v85_v18 = vadd.f32 %v706_v10, %v62_v12  ;;  %v86_v19 = vadd.f32 %v706_v10, %v63_v13  ;;  %v510_v43 = vunpack.c.l.bf16 %v561_v30  ;;  %v89_v45 = vadd.f32 %v706_v10, %v66_v29 }
   0x9   :  { %v70_v37 = vmul.f32 %v502_v23, %v695_v5  ;;  %v71_v41 = vmul.f32 %v503_v34, %v695_v5  ;;  %v72_v47 = vmul.f32 %v506_v38, %v695_v5  ;;  %v511_v48 = vunpack.c.h.bf16 %v561_v30 }
   0xa   :  { %v101_v24 = vmax.f32 %v85_v18, 0.0  ;;  %v102_v25 = vmax.f32 %v86_v19, 0.0  ;;  %v73_v50 = vmul.f32 %v507_v42, %v695_v5  ;;  %v74_v51 = vmul.f32 %v510_v43, %v695_v5 }
   0xb   :  { %591 = vmatpush3.bf16.msra.mxu0 %v636_v2  ;;  %628 = vmatpush3.bf16.msra.mxu1 %v636_v2  ;;  %v93_v46 = vadd.f32 %v706_v10, %v70_v37  ;;  %v94_v49 = vadd.f32 %v706_v10, %v71_v41  ;;  %v514_v52 = vunpack.c.l.bf16 %v562_v39  ;;  %v95_v54 = vadd.f32 %v706_v10, %v72_v47 }
   0xc   :  { %592 = vmatprep.subr.bf16.mxu0 %v637_v3  ;;  %621 = vmatprep.subr.bf16.mxu1 %v637_v3  ;;  %v117_v31 = vpack.c.bf16 %v102_v25, %v101_v24  ;;  %v75_v55 = vmul.f32 %v511_v48, %v695_v5  ;;  %v515_v56 = vunpack.c.h.bf16 %v562_v39  ;;  %v90_v57 = vadd.f32 %v706_v10, %v67_v36 }
   0xd   :  { %v109_v53 = vmax.f32 %v93_v46, 0.0  ;;  %v110_v58 = vmax.f32 %v94_v49, 0.0  ;;  %v96_v59 = vadd.f32 %v706_v10, %v73_v50  ;;  %v97_v60 = vadd.f32 %v706_v10, %v74_v51 }
   0xe   :  { %602 = vmatprep.mubr.bf16.mxu0 %v117_v31  ;;  %v68_v62 = vmul.f32 %v498_v32, %v695_v5  ;;  %v98_v63 = vadd.f32 %v706_v10, %v75_v55  ;;  %v103_v0 = vmax.f32 %v87_v35, 0.0  ;;  %v104_v1 = vmax.f32 %v88_v40, 0.0 }
   0xf   :  { %593 = vmatpush3.bf16.msra.mxu0 %v637_v3  ;;  %629 = vmatpush3.bf16.msra.mxu1 %v637_v3  ;;  %v69_v2 = vmul.f32 %v499_v33, %v695_v5  ;;  %v121_v3 = vpack.c.bf16 %v110_v58, %v109_v53  ;;  %v111_v4 = vmax.f32 %v95_v54, 0.0  ;;  %v112_v6 = vmax.f32 %v96_v59, 0.0 }
  0x10   :  { %594 = vmatprep.subr.bf16.mxu0 %v638_v16  ;;  %622 = vmatprep.subr.bf16.mxu1 %v638_v16  ;;  %v76_v7 = vmul.f32 %v514_v52, %v695_v5  ;;  %v77_v8 = vmul.f32 %v515_v56, %v695_v5  ;;  %v105_v9 = vmax.f32 %v89_v45, 0.0  ;;  %v106_v11 = vmax.f32 %v90_v57, 0.0 }
  0x11   :  { %v113_v12 = vmax.f32 %v97_v60, 0.0  ;;  %v114_v13 = vmax.f32 %v98_v63, 0.0  ;;  %v91_v14 = vadd.f32 %v706_v10, %v68_v62  ;;  %v92_v15 = vadd.f32 %v706_v10, %v69_v2  ;;  %610 = vmatprep.mubr.bf16.mxu1 %v121_v3 }
  0x12   :  { %v122_v17 = vpack.c.bf16 %v112_v6, %v111_v4  ;;  %v99_v18 = vadd.f32 %v706_v10, %v76_v7  ;;  %v100_v19 = vadd.f32 %v706_v10, %v77_v8  ;;  %v119_v5 = vpack.c.bf16 %v106_v11, %v105_v9  ;;  %v443_v10 = vld [vmem:[%s816_s2] ss:$0 sm:$0xff] }
  0x13   :  { %595 = vmatpush3.bf16.msra.mxu0 %v638_v16  ;;  %630 = vmatpush3.bf16.msra.mxu1 %v638_v16  ;;  %v118_v16 = vpack.c.bf16 %v104_v1, %v103_v0  ;;  %v123_v20 = vpack.c.bf16 %v114_v13, %v113_v12  ;;  %v107_v21 = vmax.f32 %v91_v14, 0.0  ;;  %v108_v22 = vmax.f32 %v92_v15, 0.0 }
  0x14   :  { %596 = vmatprep.subr.bf16.mxu0 %v639_v28  ;;  %623 = vmatprep.subr.bf16.mxu1 %v639_v28  ;;  %v115_v23 = vmax.f32 %v99_v18, 0.0  ;;  %v116_v24 = vmax.f32 %v100_v19, 0.0 }
  0x15   :  { %v120_v25 = vpack.c.bf16 %v108_v22, %v107_v21 }
  0x16   :  { %v124_v26 = vpack.c.bf16 %v116_v24, %v115_v23 }
  0x17   :  { %597 = vmatpush3.bf16.msra.mxu0 %v639_v28  ;;  %631 = vmatpush3.bf16.msra.mxu1 %v639_v28 }
  0x18   :  { %598 = vmatprep.subr.bf16.mxu0 %v640_v44  ;;  %624 = vmatprep.subr.bf16.mxu1 %v640_v44 }
  0x1b   :  { %599 = vmatpush3.bf16.msra.mxu0 %v640_v44  ;;  %632 = vmatpush3.bf16.msra.mxu1 %v640_v44 }
  0x1c   :  { %600 = vmatprep.subr.bf16.mxu0 %v641_v61  ;;  %625 = vmatprep.subr.bf16.mxu1 %v641_v61 }
  0x1f   :  { %601 = vmatpush3.bf16.msra.mxu0 %v641_v61  ;;  %633 = vmatpush3.bf16.msra.mxu1 %v641_v61 }
  0x22   :  { %603 = vmatmul.mubr.bf16.vlgmr.msra.gmra.mxu0 %v118_v16  ;;  %611 = vmatmul.mubr.bf16.vlgmr.msra.gmra.mxu1 %v122_v17 }
  0x23   :  { %606 = vmatprep.mubr.bf16.mxu0 %v119_v5  ;;  %614 = vmatprep.mubr.bf16.mxu1 %v123_v20 }
  0x2a   :  { %607 = vmatmul.mubr.bf16.gmra.mxu0 %v120_v25  ;;  %615 = vmatmul.mubr.bf16.gmra.mxu1 %v124_v26 }
  0xe2   :  { %v604_v27 = vpop.f32.mrf.mxu0  ;;  %v612_v28 = vpop.f32.mrf.mxu1 }
  0xe3   :  { %v770_v31 = vadd.f32 %v612_v28, %v443_v10  ;;  %v239_v34 = vadd.f32 %v604_v27, %v443_v10 }
  0xe4   :  { %v230_v29 = vpop.f32.mrf.mxu0  ;;  %v262_v30 = vpop.f32.mrf.mxu1 }
  0xe5   :  { %v231_v35 = vadd.f32 %v443_v10, %v230_v29  ;;  %v263_v39 = vadd.f32 %v443_v10, %v262_v30  ;;  %v397_v54 = vmul.f32 %v239_v34, %v239_v34  ;;  %v405_v30 = vmul.f32 %v770_v31, %v770_v31 }
  0xe6   :  { %v605_v32 = vpop.f32.mrf.mxu0  ;;  %v613_v33 = vpop.f32.mrf.mxu1 }
  0xe7   :  { %v242_v36 = vadd.f32 %v605_v32, %v443_v10  ;;  %v772_v37 = vadd.f32 %v613_v33, %v443_v10  ;;  %v395_v47 = vmul.f32 %v231_v35, %v231_v35  ;;  %v403_v25 = vmul.f32 %v263_v39, %v263_v39 }
  0xe8   :  { %v233_v38 = vpop.f32.mrf.mxu0  ;;  %v265_v40 = vpop.f32.mrf.mxu1 }
  0xe9   :  { %v524_v41 = vpack.c.bf16 %v242_v36, %v239_v34  ;;  %v234_v42 = vadd.f32 %v443_v10, %v233_v38  ;;  %v544_v43 = vpack.c.bf16 %v772_v37, %v770_v31  ;;  %v266_v45 = vadd.f32 %v443_v10, %v265_v40 }
  0xea   :  { %v608_v44 = vpop.f32.mrf.mxu0  ;;  %v616_v46 = vpop.f32.mrf.mxu1  ;;  %v398_v58 = vmul.f32 %v242_v36, %v242_v36 }
  0xeb   :  { %563 = vst [vmem:[%s817_s5 + $0x8] sm:$0xff] %v524_v41   ;;  %v519_v48 = vpack.c.bf16 %v234_v42, %v231_v35  ;;  %v373_v49 = vadd.f32 %v234_v42, %v231_v35  ;;  %v396_v50 = vmul.f32 %v234_v42, %v234_v42  ;;  %567 = vst [vmem:[%s817_s5 + $0x28] sm:$0xff] %v544_v43  }
  0xec   :  { %v246_v51 = vpop.f32.mrf.mxu0  ;;  %v539_v52 = vpack.c.bf16 %v266_v45, %v263_v39  ;;  %v278_v53 = vpop.f32.mrf.mxu1  ;;  %v287_v60 = vadd.f32 %v616_v46, %v443_v10  ;;  %v255_v63 = vadd.f32 %v608_v44, %v443_v10 }
  0xed   :  { %520 = vst [vmem:[%s817_s5] sm:$0xff] %v519_v48   ;;  %v374_v55 = vadd.f32 %v373_v49, %v239_v34  ;;  %v411_v56 = vadd.f32 %v396_v50, %v395_v47  ;;  %v247_v57 = vadd.f32 %v443_v10, %v246_v51  ;;  %v279_v3 = vadd.f32 %v443_v10, %v278_v53 }
  0xee   :  { %v609_v59 = vpop.f32.mrf.mxu0  ;;  %566 = vst [vmem:[%s817_s5 + $0x20] sm:$0xff] %v539_v52   ;;  %v617_v61 = vpop.f32.mrf.mxu1  ;;  %v401_v5 = vmul.f32 %v255_v63, %v255_v63  ;;  %v406_v34 = vmul.f32 %v772_v37, %v772_v37  ;;  %v409_v44 = vmul.f32 %v287_v60, %v287_v60 }
  0xef   :  { %v412_v62 = vadd.f32 %v411_v56, %v397_v54  ;;  %v375_v0 = vadd.f32 %v374_v55, %v242_v36  ;;  %v258_v1 = vadd.f32 %v609_v59, %v443_v10  ;;  %v290_v4 = vadd.f32 %v617_v61, %v443_v10 }
  0xf0   :  { %v249_v2 = vpop.f32.mrf.mxu0  ;;  %v281_v6 = vpop.f32.mrf.mxu1  ;;  %v399_v8 = vmul.f32 %v247_v57, %v247_v57  ;;  %v407_v40 = vmul.f32 %v279_v3, %v279_v3 }
  0xf1   :  { %v376_v7 = vadd.f32 %v375_v0, %v247_v57  ;;  %v413_v9 = vadd.f32 %v412_v62, %v398_v58  ;;  %v534_v11 = vpack.c.bf16 %v258_v1, %v255_v63  ;;  %v250_v12 = vadd.f32 %v443_v10, %v249_v2 }
  0xf2   :  { %v554_v13 = vpack.c.bf16 %v290_v4, %v287_v60  ;;  %v282_v14 = vadd.f32 %v443_v10, %v281_v6  ;;  %v402_v22 = vmul.f32 %v258_v1, %v258_v1  ;;  %v404_v10 = vmul.f32 %v266_v45, %v266_v45 }
  0xf3   :  { %v414_v15 = vadd.f32 %v413_v9, %v399_v8  ;;  %565 = vst [vmem:[%s817_s5 + $0x18] sm:$0xff] %v534_v11   ;;  %v529_v16 = vpack.c.bf16 %v250_v12, %v247_v57  ;;  %v377_v17 = vadd.f32 %v376_v7, %v250_v12  ;;  %v400_v18 = vmul.f32 %v250_v12, %v250_v12 }
  0xf4   :  { %569 = vst [vmem:[%s817_s5 + $0x38] sm:$0xff] %v554_v13   ;;  %v549_v19 = vpack.c.bf16 %v282_v14, %v279_v3  ;;  %v408_v43 = vmul.f32 %v282_v14, %v282_v14  ;;  %v410_v47 = vmul.f32 %v290_v4, %v290_v4 }
  0xf5   :  { %564 = vst [vmem:[%s817_s5 + $0x10] sm:$0xff] %v529_v16   ;;  %v378_v20 = vadd.f32 %v377_v17, %v255_v63  ;;  %v415_v21 = vadd.f32 %v414_v15, %v400_v18 }
  0xf6   :  { %568 = vst [vmem:[%s817_s5 + $0x30] sm:$0xff] %v549_v19  }
  0xf7   :  { %v416_v23 = vadd.f32 %v415_v21, %v401_v5  ;;  %v379_v24 = vadd.f32 %v378_v20, %v258_v1 }
  0xf9   :  { %v380_v26 = vadd.f32 %v379_v24, %v263_v39  ;;  %v417_v27 = vadd.f32 %v416_v23, %v402_v22 }
  0xfb   :  { %v381_v28 = vadd.f32 %v380_v26, %v266_v45  ;;  %v418_v29 = vadd.f32 %v417_v27, %v403_v25 }
  0xfd   :  { %v382_v32 = vadd.f32 %v381_v28, %v770_v31  ;;  %v419_v33 = vadd.f32 %v418_v29, %v404_v10 }
  0xff   :  { %v420_v35 = vadd.f32 %v419_v33, %v405_v30  ;;  %v383_v36 = vadd.f32 %v382_v32, %v772_v37 }
 0x101   :  { %v384_v38 = vadd.f32 %v383_v36, %v279_v3  ;;  %v421_v41 = vadd.f32 %v420_v35, %v406_v34 }
 0x103   :  { %v422_v39 = vadd.f32 %v421_v41, %v407_v40  ;;  %v385_v42 = vadd.f32 %v384_v38, %v282_v14 }
 0x105   :  { %v386_v45 = vadd.f32 %v385_v42, %v287_v60  ;;  %v423_v46 = vadd.f32 %v422_v39, %v408_v43 }
 0x107   :  { %v387_v48 = vadd.f32 %v386_v45, %v290_v4  ;;  %v424_v49 = vadd.f32 %v423_v46, %v409_v44 }
 0x109   :  { %v388_v31 = vrot.slane %v387_v48, 4  ;;  %v425_v50 = vadd.f32 %v424_v49, %v410_v47 }
 0x10b   :  { %v389_v51 = vadd.f32 %v388_v31, %v387_v48  ;;  %v426_v52 = vrot.slane %v425_v50, 4 }
 0x10d   :  { %v390_v53 = vrot.slane %v389_v51, 2  ;;  %v427_v54 = vadd.f32 %v426_v52, %v425_v50 }
 0x10f   :  { %v391_v55 = vadd.f32 %v390_v53, %v389_v51  ;;  %v428_v37 = vrot.slane %v427_v54, 2 }
 0x111   :  { %v392_v56 = vrot.slane %v391_v55, 1  ;;  %v429_v57 = vadd.f32 %v428_v37, %v427_v54 }
 0x113   :  { %v393_v58 = vadd.f32 %v392_v56, %v391_v55  ;;  %v430_v59 = vrot.slane %v429_v57, 1 }
 0x115   :  { %394 = vst [vmem:[%s818_s6] sm:$0x1] %v393_v58  ;;  %v431_v60 = vadd.f32 %v430_v59, %v429_v57 }
 0x117   :  { %432 = vst [vmem:[%s818_s6 + $0x1] sm:$0x1] %v431_v60 }

// kernel: bottleneck_forward.7
= control target key start
LH: loop header
LB: loop body
LE: loop exit
PB: predicated region body
PF: predicated region fallthrough
CT: control target
= control target key end

     0   :  { %vm207_vm0 = vcmask 1041408   ;;  %vm182_vm1 = vcmask 31744   ;;  %s646_s2 = inlined_call_operand.vmem [shape: bf16[4,128], index: 2, kind: input, shape index: {}]   ;;  %s647_s1 = inlined_call_operand.vmem [shape: bf16[128,4], index: 1, kind: input, shape index: {}]   ;;  %s648_s0 = inlined_call_operand.vmem [shape: bf16[128,128], index: 0, kind: input, shape index: {}]   ;;  %s649_s4 = inlined_call_operand.vmem [shape: f32[1,128], index: 4, kind: input, shape index: {}]   ;;  %s650_s5 = inlined_call_operand.vmem [shape: f32[1,128], index: 5, kind: input, shape index: {}]   ;;  %s651_s3 = inlined_call_operand.vmem [shape: f32[1,128], index: 3, kind: input, shape index: {}]   ;;  %s652_s6 = inlined_call_operand.vmem [shape: f32[128,128], index: 6, kind: output, shape index: {}]  }
   0x1   :  { %v134_v0 = vld [vmem:[%s646_s2] sm:$0x3]  ;;  %v435_v4 = vld [vmem:[%s647_s1 + $0x8] sm:$0xff]   ;;  %v437_v6 = vld [vmem:[%s647_s1 + $0x10] sm:$0xff]  }
   0x2   :  { %431 = vmatprep.subr.msk.bf16.mxu0 %vm207_vm0, %v134_v0  ;;  %432 = vmatprep.subr.msk.bf16.mxu1 %vm207_vm0, %v134_v0  ;;  %v209_v1 = vsel %vm207_vm0, %v134_v0, 0  ;;  %v433_v2 = vld [vmem:[%s647_s1] sm:$0xff]   ;;  %v436_v5 = vld [vmem:[%s647_s1 + $0x28] sm:$0xff]   ;;  %v438_v7 = vld [vmem:[%s647_s1 + $0x30] sm:$0xff]  }
   0x3   :  { %412 = vmatpush3.bf16.msra.mxu0 %v209_v1  ;;  %430 = vmatpush3.bf16.msra.mxu1 %v209_v1  ;;  %v434_v3 = vld [vmem:[%s647_s1 + $0x20] sm:$0xff]   ;;  %v439_v8 = vld [vmem:[%s647_s1 + $0x18] sm:$0xff]   ;;  %v395_v10 = vld [vmem:[%s648_s0 + $0x8] sm:$0xff]  }
   0x4   :  { %413 = vmatprep.mubr.msk.bf16.mxu0 %vm182_vm1, %v433_v2  ;;  %421 = vmatprep.mubr.msk.bf16.mxu1 %vm182_vm1, %v434_v3  ;;  %v440_v9 = vld [vmem:[%s647_s1 + $0x38] sm:$0xff]   ;;  %v399_v11 = vld [vmem:[%s648_s0 + $0x28] sm:$0xff]   ;;  %v364_v12 = vld [vmem:[%s648_s0] sm:$0xff]   ;;  %v369_v14 = vunpack.c.l.bf16 %v395_v10  ;;  %v370_v19 = vunpack.c.h.bf16 %v395_v10 }
   0x5   :  { %v398_v13 = vld [vmem:[%s648_s0 + $0x20] sm:$0xff]   ;;  %v385_v15 = vunpack.c.l.bf16 %v399_v11  ;;  %v365_v17 = vunpack.c.l.bf16 %v364_v12  ;;  %v386_v20 = vunpack.c.h.bf16 %v399_v11  ;;  %v366_v23 = vunpack.c.h.bf16 %v364_v12  ;;  %v397_v24 = vld [vmem:[%s648_s0 + $0x18] sm:$0xff]   ;;  %v396_v36 = vld [vmem:[%s648_s0 + $0x10] sm:$0xff]  }
   0x6   :  { %414 = vmatmul.mubr.msk.bf16.vlgmr.msra.gmra.mxu0 %vm182_vm1, %v435_v4  ;;  %422 = vmatmul.mubr.msk.bf16.vlgmr.msra.gmra.mxu1 %vm182_vm1, %v436_v5  ;;  %v526_v16 = vld [vmem:[%s649_s4] ss:$0 sm:$0xff]  ;;  %v381_v18 = vunpack.c.l.bf16 %v398_v13  ;;  %v382_v28 = vunpack.c.h.bf16 %v398_v13  ;;  %v377_v31 = vunpack.c.l.bf16 %v397_v24  ;;  %v401_v32 = vld [vmem:[%s648_s0 + $0x38] sm:$0xff]   ;;  %v400_v40 = vld [vmem:[%s648_s0 + $0x30] sm:$0xff]   ;;  %v373_v45 = vunpack.c.l.bf16 %v396_v36 }
   0x7   :  { %417 = vmatprep.mubr.msk.bf16.mxu0 %vm182_vm1, %v437_v6  ;;  %425 = vmatprep.mubr.msk.bf16.mxu1 %vm182_vm1, %v438_v7  ;;  %v65_v21 = vmul.f32 %v369_v14, %v526_v16  ;;  %v73_v22 = vmul.f32 %v385_v15, %v526_v16  ;;  %v536_v25 = vld [vmem:[%s650_s5] ss:$0 sm:$0xff]  ;;  %v63_v26 = vmul.f32 %v365_v17, %v526_v16  ;;  %v393_v43 = vunpack.c.l.bf16 %v401_v32 }
   0x8   :  { %v71_v27 = vmul.f32 %v381_v18, %v526_v16  ;;  %v66_v29 = vmul.f32 %v370_v19, %v526_v16  ;;  %v74_v30 = vmul.f32 %v386_v20, %v526_v16  ;;  %v64_v35 = vmul.f32 %v366_v23, %v526_v16  ;;  %v563_v47 = vld [vmem:[%s651_s3] ss:$0 sm:$0xff] }
   0x9   :  { %v88_v33 = vadd.f32 %v536_v25, %v65_v21  ;;  %v96_v34 = vadd.f32 %v536_v25, %v73_v22  ;;  %v86_v37 = vadd.f32 %v536_v25, %v63_v26  ;;  %v72_v39 = vmul.f32 %v382_v28, %v526_v16 }
   0xa   :  { %v94_v38 = vadd.f32 %v536_v25, %v71_v27  ;;  %v89_v41 = vadd.f32 %v536_v25, %v66_v29  ;;  %v97_v42 = vadd.f32 %v536_v25, %v74_v30  ;;  %v69_v44 = vmul.f32 %v377_v31, %v526_v16 }
   0xb   :  { %v104_v46 = vmax.f32 %v88_v33, 0.0  ;;  %v112_v48 = vmax.f32 %v96_v34, 0.0  ;;  %v87_v49 = vadd.f32 %v536_v25, %v64_v35  ;;  %v389_v50 = vunpack.c.l.bf16 %v400_v40 }
   0xc   :  { %v102_v51 = vmax.f32 %v86_v37, 0.0  ;;  %v110_v52 = vmax.f32 %v94_v38, 0.0  ;;  %v95_v53 = vadd.f32 %v536_v25, %v72_v39  ;;  %v378_v54 = vunpack.c.h.bf16 %v397_v24 }
   0xd   :  { %v105_v56 = vmax.f32 %v89_v41, 0.0  ;;  %v113_v57 = vmax.f32 %v97_v42, 0.0  ;;  %v77_v58 = vmul.f32 %v393_v43, %v526_v16  ;;  %v394_v59 = vunpack.c.h.bf16 %v401_v32 }
   0xe   :  { %418 = vmatmul.mubr.msk.bf16.gmra.mxu0 %vm182_vm1, %v439_v8  ;;  %426 = vmatmul.mubr.msk.bf16.gmra.mxu1 %vm182_vm1, %v440_v9  ;;  %v92_v62 = vadd.f32 %v536_v25, %v69_v44  ;;  %v67_v63 = vmul.f32 %v373_v45, %v526_v16  ;;  %v374_v0 = vunpack.c.h.bf16 %v396_v36  ;;  %v103_v3 = vmax.f32 %v87_v49, 0.0 }
   0xf   :  { %v75_v4 = vmul.f32 %v389_v50, %v526_v16  ;;  %v390_v5 = vunpack.c.h.bf16 %v400_v40  ;;  %v111_v9 = vmax.f32 %v95_v53, 0.0  ;;  %v70_v10 = vmul.f32 %v378_v54, %v526_v16 }
  0x10   :  { %v100_v14 = vadd.f32 %v536_v25, %v77_v58  ;;  %v78_v15 = vmul.f32 %v394_v59, %v526_v16  ;;  %v90_v20 = vadd.f32 %v536_v25, %v67_v63  ;;  %v68_v21 = vmul.f32 %v374_v0, %v526_v16 }
  0x11   :  { %v98_v26 = vadd.f32 %v536_v25, %v75_v4  ;;  %v76_v27 = vmul.f32 %v390_v5, %v526_v16  ;;  %v108_v31 = vmax.f32 %v92_v62, 0.0  ;;  %v93_v32 = vadd.f32 %v536_v25, %v70_v10 }
  0x12   :  { %v116_v16 = vmax.f32 %v100_v14, 0.0  ;;  %v101_v36 = vadd.f32 %v536_v25, %v78_v15  ;;  %v106_v40 = vmax.f32 %v90_v20, 0.0  ;;  %v91_v41 = vadd.f32 %v536_v25, %v68_v21 }
  0x13   :  { %v114_v45 = vmax.f32 %v98_v26, 0.0 }
  0x14   :  { %v107_v58 = vmax.f32 %v91_v41, 0.0 }
  0xc6   :  { %v415_v55 = vpop.f32.mrf.mxu0  ;;  %v423_v61 = vpop.f32.mrf.mxu1 }
  0xc7   :  { %v254_v60 = vadd.f32 %v415_v55, %v563_v47  ;;  %v286_v1 = vadd.f32 %v423_v61, %v563_v47  ;;  %v117_v55 = vmax.f32 %v101_v36, 0.0 }
  0xc8   :  { %v245_v2 = vpop.f32.mrf.mxu0  ;;  %v277_v8 = vpop.f32.mrf.mxu1 }
  0xc9   :  { %v310_v6 = vadd.f32 %v254_v60, %v104_v46  ;;  %v246_v7 = vadd.f32 %v563_v47, %v245_v2  ;;  %v318_v11 = vadd.f32 %v286_v1, %v112_v48  ;;  %v278_v12 = vadd.f32 %v563_v47, %v277_v8 }
  0xca   :  { %v416_v13 = vpop.f32.mrf.mxu0  ;;  %v424_v19 = vpop.f32.mrf.mxu1  ;;  %v99_v46 = vadd.f32 %v536_v25, %v76_v27 }
  0xcb   :  { %326 = vst [vmem:[%s652_s6 + $0x10] sm:$0xff] %v310_v6  ;;  %v308_v17 = vadd.f32 %v246_v7, %v102_v51  ;;  %v257_v18 = vadd.f32 %v416_v13, %v563_v47  ;;  %334 = vst [vmem:[%s652_s6 + $0x50] sm:$0xff] %v318_v11  ;;  %v316_v22 = vadd.f32 %v278_v12, %v110_v52  ;;  %v109_v51 = vmax.f32 %v93_v32, 0.0 }
  0xcc   :  { %v289_v23 = vadd.f32 %v424_v19, %v563_v47  ;;  %v248_v24 = vpop.f32.mrf.mxu0  ;;  %v280_v30 = vpop.f32.mrf.mxu1  ;;  %v115_v62 = vmax.f32 %v99_v46, 0.0 }
  0xcd   :  { %324 = vst [vmem:[%s652_s6] sm:$0xff] %v308_v17  ;;  %v311_v28 = vadd.f32 %v257_v18, %v105_v56  ;;  %v249_v29 = vadd.f32 %v563_v47, %v248_v24  ;;  %332 = vst [vmem:[%s652_s6 + $0x40] sm:$0xff] %v316_v22  ;;  %v281_v34 = vadd.f32 %v563_v47, %v280_v30 }
  0xce   :  { %v319_v33 = vadd.f32 %v289_v23, %v113_v57  ;;  %v419_v35 = vpop.f32.mrf.mxu0  ;;  %v427_v39 = vpop.f32.mrf.mxu1 }
  0xcf   :  { %327 = vst [vmem:[%s652_s6 + $0x18] sm:$0xff] %v311_v28  ;;  %v309_v37 = vadd.f32 %v249_v29, %v103_v3  ;;  %v270_v38 = vadd.f32 %v419_v35, %v563_v47  ;;  %v317_v42 = vadd.f32 %v281_v34, %v111_v9  ;;  %v302_v43 = vadd.f32 %v427_v39, %v563_v47 }
  0xd0   :  { %335 = vst [vmem:[%s652_s6 + $0x58] sm:$0xff] %v319_v33  ;;  %v261_v44 = vpop.f32.mrf.mxu0  ;;  %v293_v50 = vpop.f32.mrf.mxu1 }
  0xd1   :  { %325 = vst [vmem:[%s652_s6 + $0x8] sm:$0xff] %v309_v37  ;;  %v314_v48 = vadd.f32 %v270_v38, %v108_v31  ;;  %v262_v49 = vadd.f32 %v563_v47, %v261_v44  ;;  %333 = vst [vmem:[%s652_s6 + $0x48] sm:$0xff] %v317_v42  ;;  %v322_v52 = vadd.f32 %v302_v43, %v116_v16 }
  0xd2   :  { %v294_v53 = vadd.f32 %v563_v47, %v293_v50  ;;  %v420_v54 = vpop.f32.mrf.mxu0  ;;  %v428_v57 = vpop.f32.mrf.mxu1 }
  0xd3   :  { %330 = vst [vmem:[%s652_s6 + $0x30] sm:$0xff] %v314_v48  ;;  %v312_v25 = vadd.f32 %v262_v49, %v106_v40  ;;  %v273_v56 = vadd.f32 %v420_v54, %v563_v47  ;;  %338 = vst [vmem:[%s652_s6 + $0x70] sm:$0xff] %v322_v52  ;;  %v305_v60 = vadd.f32 %v428_v57, %v563_v47 }
  0xd4   :  { %v320_v59 = vadd.f32 %v294_v53, %v114_v45  ;;  %v264_v61 = vpop.f32.mrf.mxu0  ;;  %v296_v1 = vpop.f32.mrf.mxu1 }
  0xd5   :  { %328 = vst [vmem:[%s652_s6 + $0x20] sm:$0xff] %v312_v25  ;;  %v315_v63 = vadd.f32 %v273_v56, %v109_v51  ;;  %v265_v0 = vadd.f32 %v563_v47, %v264_v61  ;;  %v323_v2 = vadd.f32 %v305_v60, %v117_v55  ;;  %v297_v3 = vadd.f32 %v563_v47, %v296_v1 }
  0xd6   :  { %336 = vst [vmem:[%s652_s6 + $0x60] sm:$0xff] %v320_v59 }
  0xd7   :  { %331 = vst [vmem:[%s652_s6 + $0x38] sm:$0xff] %v315_v63  ;;  %v313_v4 = vadd.f32 %v265_v0, %v107_v58  ;;  %339 = vst [vmem:[%s652_s6 + $0x78] sm:$0xff] %v323_v2  ;;  %v321_v5 = vadd.f32 %v297_v3, %v115_v62 }
  0xd9   :  { %329 = vst [vmem:[%s652_s6 + $0x28] sm:$0xff] %v313_v4  ;;  %337 = vst [vmem:[%s652_s6 + $0x68] sm:$0xff] %v321_v5 }

// kernel: bottleneck_forward.5
= control target key start
LH: loop header
LB: loop body
LE: loop exit
PB: predicated region body
PF: predicated region fallthrough
CT: control target
= control target key end

     0   :  { %s4199_s21 = smov 0   ;;  %s4201_s22 = smov 0   ;;  %s5014_s0 = inlined_call_operand.vmem [shape: bf16[4,2,8,8,128], index: 0, kind: input, shape index: {}]   ;;  %s5015_s1 = inlined_call_operand.vmem [shape: bf16[9,128,128], index: 1, kind: input, shape index: {}]   ;;  %s5016_s2 = inlined_call_operand.vmem [shape: f32[1,128], index: 2, kind: input, shape index: {}]   ;;  %s5017_s3 = inlined_call_operand.vmem [shape: f32[1,128], index: 3, kind: input, shape index: {}]   ;;  %s5018_s4 = inlined_call_operand.vmem [shape: f32[1,128], index: 4, kind: input, shape index: {}]   ;;  %s5019_s5 = inlined_call_operand.vmem [shape: bf16[2,8,8,128], index: 5, kind: output, shape index: {0}]   ;;  %s5020_s6 = inlined_call_operand.vmem [shape: f32[2,2,128], index: 6, kind: output, shape index: {1}]  }
   0x1   :  { %s4203_s23 = smov 0  }
   0x2 LB: > { %s3261_s24 = sadd.s32 4294967295, %s4161_s23   ;;  %s4216_s25 = sadd.s32 1, %s4161_s23   ;;  %s4161_s23 = sphi %s4203_s23, %s5040_s23   ;;  %s4157_s22 = sphi %s4201_s22, %s5039_s22   ;;  %s4153_s21 = sphi %s4199_s21, %s5038_s21  }
   0x3   : > { %s21_s26 = ssub.s32 %s4161_s23, %s4216_s25  ;;  %s24_s27 = sadd.s32 1, %s4157_s22 }
   0x4   : > { %p22_p0 = scmp.eq.s32.totalorder %s21_s26, 0  ;;  %p31_p1 = scmp.ne.s32.totalorder %s4157_s22, %s4153_s21 }
   0x5   : > { %p32_p2 = scmp.eq.s32.totalorder %s4161_s23, 0  ;;  %p3264_p4 = scmp.ge.s32.totalorder %s4161_s23, 2 }
   0x6   : > { %s4225_s28 = scalar_select %p22_p0, %s4157_s22, %s24_s27  }
   0x7   : > { %p33_p3 = por %p32_p2, %p31_p1  ;;  %205 = sbr.rel (%p3264_p4) target bundleno = 24 (0x18), region = 32 }
   0xc   : > { %208 = sbr.rel (!%p33_p3) target bundleno = 24 (0x18), region = 36  ;;  %s210_s29 = sand.u32 (%p33_p3), 1, %s4157_s22  }
   0xd   : > { %s3554_s30 = sshll.u32 (%p33_p3), %s4161_s23, 5  ;;  %s3265_s7 = sshll.u32 (%p33_p3), %s210_s29, 7 }
   0xe   : > { %s4233_s10 = scalar_lea.vmem (%p33_p3), %s5014_s0, %s3554_s30  ;;  %s212_s11 = scalar_lea.vmem (%p33_p3), [#allocation4], %s3265_s7 }
   0xf   : > { %v232_v0 = vld [vmem:[%s4233_s10] sm:$0xff] (%p33_p3)   ;;  %v236_v1 = vld [vmem:[%s4233_s10 + $0x8] sm:$0xff] (%p33_p3)   ;;  %v240_v2 = vld [vmem:[%s4233_s10 + $0x10] sm:$0xff] (%p33_p3)  }
  0x10   : > { %233 = vst [vmem:[%s212_s11] sm:$0xff] (%p33_p3), %v232_v0   ;;  %237 = vst [vmem:[%s212_s11 + $0x8] sm:$0xff] (%p33_p3), %v236_v1   ;;  %v244_v3 = vld [vmem:[%s4233_s10 + $0x18] sm:$0xff] (%p33_p3)   ;;  %v248_v4 = vld [vmem:[%s4233_s10 + $0x40] sm:$0xff] (%p33_p3)  }
  0x11   : > { %241 = vst [vmem:[%s212_s11 + $0x10] sm:$0xff] %v240_v2   ;;  %v252_v5 = vld [vmem:[%s4233_s10 + $0x48] sm:$0xff]   ;;  %245 = vst [vmem:[%s212_s11 + $0x18] sm:$0xff] %v244_v3   ;;  %v256_v6 = vld [vmem:[%s4233_s10 + $0x50] sm:$0xff]  }
  0x12   : > { %249 = vst [vmem:[%s212_s11 + $0x20] sm:$0xff] %v248_v4   ;;  %253 = vst [vmem:[%s212_s11 + $0x28] sm:$0xff] %v252_v5   ;;  %v260_v7 = vld [vmem:[%s4233_s10 + $0x58] sm:$0xff]   ;;  %v264_v8 = vld [vmem:[%s4233_s10 + $0x80] sm:$0xff]  }
  0x13   : > { %257 = vst [vmem:[%s212_s11 + $0x30] sm:$0xff] %v256_v6   ;;  %261 = vst [vmem:[%s212_s11 + $0x38] sm:$0xff] %v260_v7   ;;  %v268_v9 = vld [vmem:[%s4233_s10 + $0x88] sm:$0xff]   ;;  %v272_v10 = vld [vmem:[%s4233_s10 + $0x90] sm:$0xff]  }
  0x14   : > { %265 = vst [vmem:[%s212_s11 + $0x40] sm:$0xff] %v264_v8   ;;  %v276_v11 = vld [vmem:[%s4233_s10 + $0x98] sm:$0xff]   ;;  %269 = vst [vmem:[%s212_s11 + $0x48] sm:$0xff] %v268_v9   ;;  %v280_v12 = vld [vmem:[%s4233_s10 + $0xc0] sm:$0xff]  }
  0x15   : > { %273 = vst [vmem:[%s212_s11 + $0x50] sm:$0xff] %v272_v10   ;;  %277 = vst [vmem:[%s212_s11 + $0x58] sm:$0xff] %v276_v11   ;;  %v284_v13 = vld [vmem:[%s4233_s10 + $0xc8] sm:$0xff]   ;;  %v288_v14 = vld [vmem:[%s4233_s10 + $0xd0] sm:$0xff]  }
  0x16   : > { %281 = vst [vmem:[%s212_s11 + $0x60] sm:$0xff] %v280_v12   ;;  %285 = vst [vmem:[%s212_s11 + $0x68] sm:$0xff] %v284_v13   ;;  %v292_v15 = vld [vmem:[%s4233_s10 + $0xd8] sm:$0xff]  }
  0x17   : > { %289 = vst [vmem:[%s212_s11 + $0x70] sm:$0xff] %v288_v14   ;;  %293 = vst [vmem:[%s212_s11 + $0x78] sm:$0xff] %v292_v15  }
  0x18 PF: > { %p3268_p5 = scmp.ge.s32.totalorder %s4161_s23, 1  ;;  %p382_p6 = scmp.lt.s32.totalorder %s4161_s23, 3 }
  0x1a   : > { %p383_p7 = pnand %p3268_p5, %p382_p6 }
  0x1c   : > { %386 = sbr.rel (%p383_p7) target bundleno = 449 (0x1c1), region = 77 }
  0x21   : > { %v4039_v16 = vld [vmem:[%s5015_s1 + $0x38] sm:$0xff]   ;;  %v4041_v18 = vld [vmem:[%s5015_s1 + $0x30] sm:$0xff]   ;;  %v4043_v20 = vld [vmem:[%s5015_s1 + $0x28] sm:$0xff]   ;;  %v4163_v21 = vmov 0   ;;  %s389_s10 = sand.u32 1, %s4153_s21   ;;  %vm436_vm0 = vcmask 1040384  }
  0x22   : > { %v4040_v17 = vld [vmem:[%s5015_s1 + $0x78] sm:$0xff]   ;;  %3782 = vmatprep.subr.bf16.mxu0 %v4039_v16  ;;  %v4042_v19 = vld [vmem:[%s5015_s1 + $0x70] sm:$0xff]   ;;  %539 = vst [vmem:[#allocation2 + $0xd0] sm:$0xf] %v4163_v21  ;;  %865 = vst [vmem:[#allocation2] sm:$0xf] %v4163_v21 }
  0x23   : > { %3806 = vmatprep.subr.bf16.mxu1 %v4040_v17  ;;  %3783 = vmatpush3.bf16.msra.mxu0 %v4039_v16  ;;  %776 = vst [vmem:[#allocation2 + $0x48] sm:$0xf] %v4163_v21  ;;  %v4044_v22 = vld [vmem:[%s5015_s1 + $0x68] sm:$0xff]   ;;  %v4045_v23 = vld [vmem:[%s5015_s1 + $0x20] sm:$0xff]   ;;  %v4047_v25 = vld [vmem:[%s5015_s1 + $0x18] sm:$0xff]   ;;  %s4281_s13 = sshll.u32 %s389_s10, 7 }
  0x24   : > { %3807 = vmatpush3.bf16.msra.mxu1 %v4040_v17  ;;  %3784 = vmatprep.subr.bf16.mxu0 %v4041_v18  ;;  %v4046_v24 = vld [vmem:[%s5015_s1 + $0x60] sm:$0xff]   ;;  %v439_v26 = vld [vmem:[#allocation2 + $0x11c] sm:$0x1]  ;;  %v449_v29 = vld [vmem:[#allocation2 + $0xec] sm:$0x1]  ;;  %s4321_s26 = scalar_lea.vmem [#allocation4], %s4281_s13 }
  0x25   : > { %3808 = vmatprep.subr.bf16.mxu1 %v4042_v19  ;;  %v443_v27 = vld [vmem:[#allocation2 + $0xdc] sm:$0x1]  ;;  %v446_v28 = vld [vmem:[#allocation2 + $0xe4] sm:$0x1]  ;;  %v452_v31 = vld [vmem:[#allocation2 + $0xf4] sm:$0x1] }
  0x26   : > { %v4048_v30 = vld [vmem:[%s5015_s1 + $0x58] sm:$0xff]   ;;  %v458_v33 = vld [vmem:[#allocation2 + $0x104] sm:$0x1]  ;;  %v461_v34 = vld [vmem:[#allocation2 + $0x10c] sm:$0x1]  ;;  %vm724_vm3 = vcmask 1043456  }
  0x27   : > { %3785 = vmatpush3.bf16.msra.mxu0 %v4041_v18  ;;  %v455_v32 = vld [vmem:[#allocation2 + $0xfc] sm:$0x1]  ;;  %v464_v35 = vld [vmem:[#allocation2 + $0x114] sm:$0x1]  ;;  %v777_v37 = vld [vmem:[#allocation2 + $0x4c] sm:$0x1] }
  0x28   : > { %3809 = vmatpush3.bf16.msra.mxu1 %v4042_v19  ;;  %3786 = vmatprep.subr.bf16.mxu0 %v4043_v20  ;;  %v540_v36 = vld [vmem:[#allocation2 + $0xd4] sm:$0x1]  ;;  %v786_v39 = vld [vmem:[#allocation2 + $0x5c] sm:$0x1]  ;;  %v789_v40 = vld [vmem:[#allocation2 + $0x64] sm:$0x1] }
  0x29   : > { %3810 = vmatprep.subr.bf16.mxu1 %v4044_v22  ;;  %v783_v38 = vld [vmem:[#allocation2 + $0x54] sm:$0x1]  ;;  %v792_v41 = vld [vmem:[#allocation2 + $0x6c] sm:$0x1]  ;;  %vm437_vm1 = vsmask.f32 256 }
  0x2a   : > { %v4049_v42 = vld [vmem:[%s5015_s1 + $0x10] sm:$0xff]   ;;  %v4291_v44 = vld [vmem:[#allocation2 + $0x7c] sm:$0x1]  ;;  %v4293_v45 = vld [vmem:[#allocation2 + $0x84] sm:$0x1]  ;;  %p4973_p8 = scmp.lt.s32.totalorder %s3261_s24, 1 }
  0x2b   : > { %3787 = vmatpush3.bf16.msra.mxu0 %v4043_v20  ;;  %v4289_v43 = vld [vmem:[#allocation2 + $0x74] sm:$0x1]  ;;  %v4295_v46 = vld [vmem:[#allocation2 + $0x8c] sm:$0x1]  ;;  %vm4303_vm2 = vmand %vm436_vm0, %vm437_vm1  ;;  %vm725_vm4 = vsmask.f32 7938 }
  0x2c   : > { %3811 = vmatpush3.bf16.msra.mxu1 %v4044_v22  ;;  %3788 = vmatprep.subr.bf16.mxu0 %v4045_v23  ;;  %v4300_v47 = vld [vmem:[%s5015_s1 + $0x50] sm:$0xff]   ;;  %v4310_v50 = vld [vmem:[%s5015_s1 + $0x8] sm:$0xff]   ;;  %v440_v51 = vsel %vm4303_vm2, 0, %v439_v26  ;;  %v444_v52 = vsel %vm4303_vm2, 0, %v443_v27  ;;  %v447_v53 = vsel %vm4303_vm2, 0, %v446_v28  ;;  %v450_v54 = vsel %vm4303_vm2, 0, %v449_v29  ;;  %vm4447_vm5 = vmand %vm724_vm3, %vm725_vm4 }
  0x2d   : > { %3812 = vmatprep.subr.bf16.mxu1 %v4046_v24  ;;  %v568_v49 = vld [vmem:[#allocation2 + $0xd0] sm:$0x1]  ;;  %v869_v55 = vld [vmem:[#allocation2] sm:$0x1]  ;;  %v872_v56 = vld [vmem:[#allocation2 + $0x8] sm:$0x1] }
  0x2e   : > { %v4324_v57 = vld [vmem:[%s4321_s26 + $0x60] sm:$0xff]   ;;  %v4329_v58 = vld [vmem:[%s5015_s1 + $0x48] sm:$0xff]   ;;  %441 = vst [vmem:[#allocation2 + $0x11c] sm:$0x1] %v440_v51  ;;  %445 = vst [vmem:[#allocation2 + $0xdc] sm:$0x1] %v444_v52 }
  0x2f   : > { %3789 = vmatpush3.bf16.msra.mxu0 %v4045_v23  ;;  %448 = vst [vmem:[#allocation2 + $0xe4] sm:$0x1] %v447_v53  ;;  %451 = vst [vmem:[#allocation2 + $0xec] sm:$0x1] %v450_v54  ;;  %v453_v59 = vsel %vm4303_vm2, 0, %v452_v31  ;;  %v456_v60 = vsel %vm4303_vm2, 0, %v455_v32  ;;  %v3622_v21 = vunpack.c.l.bf16 %v4324_v57  ;;  %v3623_v22 = vunpack.c.h.bf16 %v4324_v57 }
  0x30   : > { %3813 = vmatpush3.bf16.msra.mxu1 %v4046_v24  ;;  %3790 = vmatprep.subr.bf16.mxu0 %v4047_v25  ;;  %v459_v61 = vsel %vm4303_vm2, 0, %v458_v33  ;;  %v462_v62 = vsel %vm4303_vm2, 0, %v461_v34  ;;  %v4340_v63 = vld [vmem:[%s4321_s26 + $0x40] sm:$0xff]   ;;  %454 = vst [vmem:[#allocation2 + $0xf4] sm:$0x1] %v453_v59  ;;  %v465_v1 = vsel %vm4303_vm2, 0, %v464_v35 }
  0x31   : > { %3814 = vmatprep.subr.bf16.mxu1 %v4048_v30  ;;  %v4345_v0 = vld [vmem:[%s5017_s3] ss:$0 sm:$0xff]  ;;  %457 = vst [vmem:[#allocation2 + $0xfc] sm:$0x1] %v456_v60  ;;  %460 = vst [vmem:[#allocation2 + $0x104] sm:$0x1] %v459_v61  ;;  %v3606_v24 = vunpack.c.l.bf16 %v4340_v63 }
  0x32   : > { %463 = vst [vmem:[#allocation2 + $0x10c] sm:$0x1] %v462_v62  ;;  %v541_v2 = vsel %vm4303_vm2, 0, %v540_v36  ;;  %v569_v3 = vsel %vm4303_vm2, 0, %v568_v49  ;;  %v778_v4 = vsel %vm4303_vm2, 0, %v777_v37  ;;  %v784_v6 = vsel %vm4303_vm2, 0, %v783_v38 }
  0x33   : > { %3791 = vmatpush3.bf16.msra.mxu0 %v4047_v25  ;;  %v875_v5 = vld [vmem:[#allocation2 + $0x10] sm:$0x1]  ;;  %466 = vst [vmem:[#allocation2 + $0x114] sm:$0x1] %v465_v1  ;;  %542 = vst [vmem:[#allocation2 + $0xd4] sm:$0x1] %v541_v2  ;;  %v3607_v25 = vunpack.c.h.bf16 %v4340_v63  ;;  %v913_v28 = vmul.f32 %v3622_v21, %v4345_v0  ;;  %v824_v33 = vmul.f32 %v3606_v24, %v4345_v0 }
  0x34   : > { %3815 = vmatpush3.bf16.msra.mxu1 %v4048_v30  ;;  %3792 = vmatprep.subr.bf16.mxu0 %v4049_v42  ;;  %570 = vst [vmem:[#allocation2 + $0xd0] sm:$0x1] %v569_v3  ;;  %779 = vst [vmem:[#allocation2 + $0x4c] sm:$0x1] %v778_v4  ;;  %v787_v7 = vsel %vm4303_vm2, 0, %v786_v39  ;;  %v790_v8 = vsel %vm4303_vm2, 0, %v789_v40  ;;  %v914_v30 = vmul.f32 %v3623_v22, %v4345_v0 }
  0x35   : > { %3816 = vmatprep.subr.bf16.mxu1 %v4300_v47  ;;  %v793_v9 = vsel %vm4303_vm2, 0, %v792_v41  ;;  %v878_v10 = vld [vmem:[#allocation2 + $0x18] sm:$0x1]  ;;  %v4367_v11 = vld [vmem:[%s5015_s1] sm:$0xff]   ;;  %785 = vst [vmem:[#allocation2 + $0x54] sm:$0x1] %v784_v6  ;;  %v825_v34 = vmul.f32 %v3607_v25, %v4345_v0 }
  0x36   : > { %788 = vst [vmem:[#allocation2 + $0x5c] sm:$0x1] %v787_v7  ;;  %791 = vst [vmem:[#allocation2 + $0x64] sm:$0x1] %v790_v8  ;;  %v796_v12 = vsel %vm4303_vm2, 0, %v4289_v43  ;;  %v799_v13 = vsel %vm4303_vm2, 0, %v4291_v44 }
  0x37   : > { %794 = vst [vmem:[#allocation2 + $0x6c] sm:$0x1] %v793_v9  ;;  %v802_v14 = vsel %vm4303_vm2, 0, %v4293_v45  ;;  %v805_v15 = vsel %vm4303_vm2, 0, %v4295_v46  ;;  %v3668_v16 = vld [vmem:[%s4321_s26 + $0x68] sm:$0xff]   ;;  %3793 = vmatpush3.bf16.msra.mxu0 %v4049_v42  ;;  %v4054_v18 = vld [vmem:[%s5015_s1 + $0x40] sm:$0xff]  }
  0x38   : > { %v4383_v17 = vld [vmem:[%s4321_s26 + $0x48] sm:$0xff]   ;;  %797 = vst [vmem:[#allocation2 + $0x74] sm:$0x1] %v796_v12  ;;  %800 = vst [vmem:[#allocation2 + $0x7c] sm:$0x1] %v799_v13  ;;  %v870_v19 = vsel %vm4303_vm2, 0, %v869_v55  ;;  %3817 = vmatpush3.bf16.msra.mxu1 %v4300_v47  ;;  %3794 = vmatprep.subr.bf16.mxu0 %v4310_v50  ;;  %v3626_v29 = vunpack.c.l.bf16 %v3668_v16  ;;  %v3627_v35 = vunpack.c.h.bf16 %v3668_v16 }
  0x39   : > { %803 = vst [vmem:[#allocation2 + $0x84] sm:$0x1] %v802_v14  ;;  %806 = vst [vmem:[#allocation2 + $0x8c] sm:$0x1] %v805_v15  ;;  %v873_v20 = vsel %vm4303_vm2, 0, %v872_v56  ;;  %v876_v26 = vsel %vm4303_vm2, 0, %v875_v5  ;;  %3818 = vmatprep.subr.bf16.mxu1 %v4329_v58  ;;  %v3610_v31 = vunpack.c.l.bf16 %v4383_v17  ;;  %v3611_v45 = vunpack.c.h.bf16 %v4383_v17 }
  0x3a   : > { %v4399_v23 = vld [vmem:[%s5018_s4] ss:$0 sm:$0xff]  ;;  %871 = vst [vmem:[#allocation2] sm:$0x1] %v870_v19  ;;  %874 = vst [vmem:[#allocation2 + $0x8] sm:$0x1] %v873_v20  ;;  %v915_v38 = vmul.f32 %v3626_v29, %v4345_v0  ;;  %v916_v55 = vmul.f32 %v3627_v35, %v4345_v0 }
  0x3b   : > { %v879_v27 = vsel %vm4303_vm2, 0, %v878_v10  ;;  %877 = vst [vmem:[#allocation2 + $0x10] sm:$0x1] %v876_v26  ;;  %v467_v32 = vld [vmem:[#allocation2 + $0x11c] sm:$0x1]  ;;  %3795 = vmatpush3.bf16.msra.mxu0 %v4310_v50  ;;  %v921_v37 = vadd.f32 %v4399_v23, %v913_v28  ;;  %v922_v39 = vadd.f32 %v4399_v23, %v914_v30  ;;  %v832_v41 = vadd.f32 %v4399_v23, %v824_v33  ;;  %v3669_v22 = vld [vmem:[%s4321_s26 + $0x70] sm:$0xff]  }
  0x3c   : > { %880 = vst [vmem:[#allocation2 + $0x18] sm:$0x1] %v879_v27  ;;  %v468_v36 = vsel %vm4303_vm2, 0, %v467_v32  ;;  %3819 = vmatpush3.bf16.msra.mxu1 %v4329_v58  ;;  %3796 = vmatprep.subr.bf16.mxu0 %v4367_v11  ;;  %v780_v40 = vld [vmem:[#allocation2 + $0x4c] sm:$0x1]  ;;  %v826_v42 = vmul.f32 %v3610_v31, %v4345_v0  ;;  %v833_v43 = vadd.f32 %v4399_v23, %v825_v34  ;;  %v4427_v44 = vld [vmem:[%s5015_s1 + $0xb8] sm:$0xff]   ;;  %v3630_v29 = vunpack.c.l.bf16 %v3669_v22 }
  0x3d   : > { %469 = vst [vmem:[#allocation2 + $0x11c] sm:$0x1] %v468_v36  ;;  %3820 = vmatprep.subr.bf16.mxu1 %v4054_v18  ;;  %v781_v46 = vsel %vm4303_vm2, 0, %v780_v40  ;;  %v929_v47 = vmax.f32 %v921_v37, 0.0  ;;  %v923_v49 = vadd.f32 %v4399_v23, %v915_v38  ;;  %v930_v50 = vmax.f32 %v922_v39, 0.0  ;;  %v4436_v51 = vld [vmem:[%s5015_s1 + $0xf8] sm:$0xff]  }
  0x3e   : > { %782 = vst [vmem:[#allocation2 + $0x4c] sm:$0x1] %v781_v46  ;;  %v840_v52 = vmax.f32 %v832_v41, 0.0  ;;  %v834_v53 = vadd.f32 %v4399_v23, %v826_v42  ;;  %v841_v54 = vmax.f32 %v833_v43, 0.0  ;;  %v827_v62 = vmul.f32 %v3611_v45, %v4345_v0  ;;  %v881_v17 = vld [vmem:[#allocation2 + $0x20] sm:$0x1] }
  0x3f   : > { %3797 = vmatpush3.bf16.msra.mxu0 %v4367_v11  ;;  %v3564_v56 = vpack.c.bf16 %v929_v47, %v929_v47  ;;  %v931_v57 = vmax.f32 %v923_v49, 0.0  ;;  %v3565_v58 = vpack.c.bf16 %v930_v50, %v930_v50  ;;  %v924_v8 = vadd.f32 %v4399_v23, %v916_v55  ;;  %v3665_v25 = vld [vmem:[%s4321_s26 + $0x50] sm:$0xff]   ;;  %v3670_v32 = vld [vmem:[%s4321_s26 + $0x78] sm:$0xff]   ;;  %v4911_v9 = vld [vmem:[%s5015_s1 + $0x220] sm:$0xff]   ;;  %s5042_s24 = smov (!%p4973_p8, %s3261_s24), 1 }
  0x40   : > { %3821 = vmatpush3.bf16.msra.mxu1 %v4054_v18  ;;  %v848_v59 = vpack.c.bf16 %v840_v52, %v840_v52  ;;  %v842_v60 = vmax.f32 %v834_v53, 0.0  ;;  %v849_v61 = vpack.c.bf16 %v841_v54, %v841_v54  ;;  %3830 = vmatprep.subr.bf16.mxu0 %v4427_v44  ;;  %v835_v14 = vadd.f32 %v4399_v23, %v827_v62  ;;  %v884_v18 = vld [vmem:[#allocation2 + $0x28] sm:$0x1]  ;;  %v887_v31 = vld [vmem:[#allocation2 + $0x30] sm:$0x1]  ;;  %v3666_v37 = vld [vmem:[%s4321_s26 + $0x58] sm:$0xff]  }
  0x41   : > { %v970_v63 = vshrl.u32 %v3564_v56, 16  ;;  %v973_v1 = vshll.u32 %v3564_v56, 16  ;;  %v3566_v2 = vpack.c.bf16 %v931_v57, %v931_v57  ;;  %v978_v3 = vshrl.u32 %v3565_v58, 16  ;;  %3854 = vmatprep.subr.bf16.mxu1 %v4436_v51  ;;  %v1050_v4 = vld [vmem:[#allocation2 + $0x8] sm:$0xf]  ;;  %v4062_v39 = vld [vmem:[%s5015_s1 + $0xf0] sm:$0xff]  }
  0x42   : > { %857 = vst [vmem:[#allocation2 + $0x50] sm:$0xf] %v848_v59  ;;  %v981_v5 = vshll.u32 %v3565_v58, 16  ;;  %v1056_v6 = vld [vmem:[#allocation2 + $0x10] sm:$0xf]  ;;  %v850_v7 = vpack.c.bf16 %v842_v60, %v842_v60  ;;  %v882_v20 = vsel %vm4303_vm2, 0, %v881_v17  ;;  %v3614_v30 = vunpack.c.l.bf16 %v3665_v25 }
  0x43   : > { %858 = vst [vmem:[#allocation2 + $0x58] sm:$0xf] %v849_v61  ;;  %v4451_v10 = vrot.slane %v970_v63, 7  ;;  %v4453_v11 = vrot.slane %v978_v3, 7  ;;  %v986_v12 = vshrl.u32 %v3566_v2, 16  ;;  %v989_v13 = vshll.u32 %v3566_v2, 16 }
  0x44   : > { %859 = vst [vmem:[#allocation2 + $0x60] sm:$0xf] %v850_v7  ;;  %v885_v21 = vsel %vm4303_vm2, 0, %v884_v18  ;;  %v932_v24 = vmax.f32 %v924_v8, 0.0  ;;  %v1062_v28 = vld [vmem:[#allocation2 + $0x18] sm:$0xf]  ;;  %v917_v40 = vmul.f32 %v3630_v29, %v4345_v0  ;;  %v828_v41 = vmul.f32 %v3614_v30, %v4345_v0 }
  0x45   : > { %v975_v15 = vor.u32 %v973_v1, %v4451_v10  ;;  %v983_v16 = vor.u32 %v981_v5, %v4453_v11  ;;  %v4458_v19 = vrot.slane %v986_v12, 7  ;;  %883 = vst [vmem:[#allocation2 + $0x20] sm:$0x1] %v882_v20  ;;  %886 = vst [vmem:[#allocation2 + $0x28] sm:$0x1] %v885_v21  ;;  %v843_v35 = vmax.f32 %v835_v14, 0.0 }
  0x46   : > { %v3567_v34 = vpack.c.bf16 %v932_v24, %v932_v24  ;;  %v890_v36 = vld [vmem:[#allocation2 + $0x38] sm:$0x1]  ;;  %v3631_v42 = vunpack.c.h.bf16 %v3669_v22  ;;  %v3634_v43 = vunpack.c.l.bf16 %v3670_v32  ;;  %v925_v52 = vadd.f32 %v4399_v23, %v917_v40  ;;  %v4064_v1 = vld [vmem:[%s5015_s1 + $0xe8] sm:$0xff]   ;;  %v4061_v18 = vld [vmem:[%s5015_s1 + $0xb0] sm:$0xff]   ;;  %s3555_s23 = sshll.u32 %s5042_s24, 5  ;;  %s3272_s8 = sshll.u32 %s5042_s24, 1 }
  0x47   : > { %v1051_v26 = vsel %vm4447_vm5, %v975_v15, %v1050_v4  ;;  %v1057_v27 = vsel %vm4447_vm5, %v983_v16, %v1056_v6  ;;  %v991_v33 = vor.u32 %v989_v13, %v4458_v19  ;;  %v851_v49 = vpack.c.bf16 %v843_v35, %v843_v35  ;;  %v4066_v29 = vld [vmem:[%s5015_s1 + $0xe0] sm:$0xff]   ;;  %v4523_v40 = vld [vmem:[%s5015_s1 + $0xd8] sm:$0xff]   ;;  %s4994_s7 = scalar_lea.vmem %s5019_s5, %s3555_s23  ;;  %s430_s11 = scalar_lea.vmem %s5020_s6, %s3272_s8 }
  0x48   : > { %1052 = vst [vmem:[#allocation2 + $0x8] sm:$0xf] %v1051_v26  ;;  %1058 = vst [vmem:[#allocation2 + $0x10] sm:$0xf] %v1057_v27  ;;  %v994_v46 = vshrl.u32 %v3567_v34, 16  ;;  %v997_v47 = vshll.u32 %v3567_v34, 16  ;;  %v836_v53 = vadd.f32 %v4399_v23, %v828_v41  ;;  %v918_v57 = vmul.f32 %v3631_v42, %v4345_v0 }
  0x49   : > { %v4056_v38 = vld [vmem:[#allocation2 + $0x48] ss:$8 sps:$4 sm:$0xff]   ;;  %v1063_v45 = vsel %vm4447_vm5, %v991_v33, %v1062_v28  ;;  %v888_v54 = vsel %vm4303_vm2, 0, %v887_v31  ;;  %v891_v55 = vsel %vm4303_vm2, 0, %v890_v36  ;;  %860 = vst [vmem:[#allocation2 + $0x68] sm:$0xf] %v851_v49  ;;  %v919_v58 = vmul.f32 %v3634_v43, %v4345_v0 }
  0x4a   : > { %3822 = vmatprep.mubr.bf16.mxu1 %v4056_v38  ;;  %1064 = vst [vmem:[#allocation2 + $0x18] sm:$0xf] %v1063_v45  ;;  %v4486_v56 = vrot.slane %v994_v46, 7  ;;  %889 = vst [vmem:[#allocation2 + $0x30] sm:$0x1] %v888_v54  ;;  %v3615_v59 = vunpack.c.h.bf16 %v3665_v25  ;;  %v976_v60 = vrot.slane %v4451_v10, 4  ;;  %v3618_v63 = vunpack.c.l.bf16 %v3666_v37 }
  0x4b   : > { %v4058_v50 = vld [vmem:[#allocation2 + $0x58] ss:$8 sps:$4 sm:$0xff]   ;;  %892 = vst [vmem:[#allocation2 + $0x38] sm:$0x1] %v891_v55  ;;  %v933_v61 = vmax.f32 %v925_v52, 0.0  ;;  %v844_v62 = vmax.f32 %v836_v53, 0.0  ;;  %v926_v4 = vadd.f32 %v4399_v23, %v918_v57  ;;  %v927_v5 = vadd.f32 %v4399_v23, %v919_v58 }
  0x4c   : > { %3823 = vmatmul.mubr.bf16.vlgmr.msra.gmra.mxu1 %v4058_v50  ;;  %v999_v2 = vor.u32 %v997_v47, %v4486_v56  ;;  %v1068_v3 = vld [vmem:[#allocation2 + $0x20] sm:$0xf]  ;;  %v829_v6 = vmul.f32 %v3615_v59, %v4345_v0  ;;  %v830_v13 = vmul.f32 %v3618_v63, %v4345_v0  ;;  %v984_v17 = vrot.slane %v4453_v11, 4  ;;  %v4517_v34 = vld [vmem:[%s5015_s1 + $0xa8] sm:$0xff]   ;;  %v866_v47 = vld [vmem:[#allocation2 + $0x4] sm:$0x1] }
  0x4d   : > { %3855 = vmatpush3.bf16.msra.mxu1 %v4436_v51  ;;  %v3568_v8 = vpack.c.bf16 %v933_v61, %v933_v61  ;;  %v852_v12 = vpack.c.bf16 %v844_v62, %v844_v62  ;;  %v934_v14 = vmax.f32 %v926_v4, 0.0  ;;  %v935_v15 = vmax.f32 %v927_v5, 0.0  ;;  %v3659_v28 = vld [vmem:[%s4321_s26 + $0x20] sm:$0xff]   ;;  %v1074_v35 = vld [vmem:[#allocation2 + $0x28] sm:$0xf]  ;;  %v4067_v11 = vld [vmem:[%s5015_s1 + $0x98] sm:$0xff]  }
  0x4e   : > { %3856 = vmatprep.subr.bf16.mxu1 %v4062_v39  ;;  %v1069_v51 = vsel %vm4447_vm5, %v999_v2, %v1068_v3  ;;  %v837_v16 = vadd.f32 %v4399_v23, %v829_v6  ;;  %v838_v22 = vadd.f32 %v4399_v23, %v830_v13  ;;  %v3590_v32 = vunpack.c.l.bf16 %v3659_v28  ;;  %v1053_v53 = vld [vmem:[#allocation2 + $0xc] sm:$0x1]  ;;  %v1453_v55 = vld [vmem:[#allocation2] sm:$0xf]  ;;  %v1059_v5 = vld [vmem:[#allocation2 + $0x14] sm:$0x1] }
  0x4f   : > { %v4055_v7 = vld [vmem:[#allocation2] ss:$8 sps:$4 sm:$0xff]   ;;  %v1002_v20 = vshrl.u32 %v3568_v8, 16  ;;  %v1005_v21 = vshll.u32 %v3568_v8, 16  ;;  %1070 = vst [vmem:[#allocation2 + $0x20] sm:$0xf] %v1069_v51  ;;  %v3569_v25 = vpack.c.bf16 %v934_v14, %v934_v14  ;;  %v3570_v26 = vpack.c.bf16 %v935_v15, %v935_v15 }
  0x50   : > { %3798 = vmatprep.mubr.bf16.mxu0 %v4055_v7  ;;  %861 = vst [vmem:[#allocation2 + $0x70] sm:$0xf] %v852_v12  ;;  %v845_v27 = vmax.f32 %v837_v16, 0.0  ;;  %v846_v31 = vmax.f32 %v838_v22, 0.0  ;;  %v3591_v33 = vunpack.c.h.bf16 %v3659_v28  ;;  %v992_v49 = vrot.slane %v4458_v19, 4  ;;  %v4065_v58 = vld [vmem:[%s5015_s1 + $0xa0] sm:$0xff]  }
  0x51   : > { %v4057_v24 = vld [vmem:[#allocation2 + $0x10] ss:$8 sps:$4 sm:$0xff]   ;;  %3857 = vmatpush3.bf16.msra.mxu1 %v4062_v39  ;;  %v4512_v30 = vrot.slane %v1002_v20, 7  ;;  %v1010_v36 = vshrl.u32 %v3569_v25, 16  ;;  %v1013_v37 = vshll.u32 %v3569_v25, 16  ;;  %v1018_v38 = vshrl.u32 %v3570_v26, 16 }
  0x52   : > { %3858 = vmatprep.subr.bf16.mxu1 %v4064_v1  ;;  %3799 = vmatmul.mubr.bf16.vlgmr.msra.gmra.mxu0 %v4057_v24  ;;  %v1021_v39 = vshll.u32 %v3570_v26, 16  ;;  %v1080_v42 = vld [vmem:[#allocation2 + $0x30] sm:$0xf]  ;;  %v1086_v43 = vld [vmem:[#allocation2 + $0x38] sm:$0xf]  ;;  %v853_v45 = vpack.c.bf16 %v845_v27, %v845_v27  ;;  %v854_v46 = vpack.c.bf16 %v846_v31, %v846_v31  ;;  %v1054_v19 = vsel %vm4303_vm2, %v976_v60, %v1053_v53  ;;  %v4076_v25 = vld [vmem:[%s5015_s1 + $0xc8] sm:$0xff]  }
  0x53   : > { %3831 = vmatpush3.bf16.msra.mxu0 %v4427_v44  ;;  %v1007_v41 = vor.u32 %v1005_v21, %v4512_v30  ;;  %v4527_v50 = vrot.slane %v1010_v36, 7  ;;  %v4529_v52 = vrot.slane %v1018_v38, 7  ;;  %v867_v44 = vsel %vm4303_vm2, 0, %v866_v47  ;;  %v1455_v57 = vld [vmem:[#allocation2 + $0x8] sm:$0xf]  ;;  %v4074_v60 = vld [vmem:[%s5015_s1 + $0xd0] sm:$0xff]  }
  0x54   : > { %3832 = vmatprep.subr.bf16.mxu0 %v4061_v18  ;;  %vm1469_vm6 = vsmask.f32 3328  ;;  %862 = vst [vmem:[#allocation2 + $0x78] sm:$0xf] %v853_v45  ;;  %863 = vst [vmem:[#allocation2 + $0x80] sm:$0xf] %v854_v46  ;;  %v588_v63 = vmul.f32 %v3590_v32, %v4345_v0  ;;  %v589_v10 = vmul.f32 %v3591_v33, %v4345_v0  ;;  %v1060_v8 = vsel %vm4303_vm2, %v984_v17, %v1059_v5 }
  0x55   : > { %3859 = vmatpush3.bf16.msra.mxu1 %v4064_v1  ;;  %v1075_v54 = vsel %vm4447_vm5, %v1007_v41, %v1074_v35  ;;  %868 = vst [vmem:[#allocation2 + $0x4] sm:$0x1] %v867_v44  ;;  %vm1470_vm7 = vsmask.f32 7440  ;;  %v1015_v61 = vor.u32 %v1013_v37, %v4527_v50  ;;  %v1023_v62 = vor.u32 %v1021_v39, %v4529_v52  ;;  %1055 = vst [vmem:[#allocation2 + $0xc] sm:$0x1] %v1054_v19 }
  0x56   : > { %3860 = vmatprep.subr.bf16.mxu1 %v4066_v29  ;;  %1076 = vst [vmem:[#allocation2 + $0x28] sm:$0xf] %v1075_v54  ;;  %v1473_v1 = vshrl.u32 %v1453_v55, 16  ;;  %v1476_v2 = vshll.u32 %v1453_v55, 16  ;;  %v1487_v3 = vshrl.u32 %v1455_v57, 16  ;;  %v1490_v4 = vshll.u32 %v1455_v57, 16  ;;  %vm4581_vm8 = vmor %vm1469_vm6, %vm1470_vm7 }
  0x57   : > { %v4070_v59 = vld [vmem:[#allocation2 + $0x68] ss:$8 sps:$4 sm:$0xff]   ;;  %3833 = vmatpush3.bf16.msra.mxu0 %v4061_v18  ;;  %v1081_v6 = vsel %vm4447_vm5, %v1015_v61, %v1080_v42  ;;  %v1087_v7 = vsel %vm4447_vm5, %v1023_v62, %v1086_v43  ;;  %v1065_v12 = vld [vmem:[#allocation2 + $0x1c] sm:$0x1]  ;;  %v1459_v51 = vld [vmem:[#allocation2 + $0x18] sm:$0xf]  ;;  %v596_v35 = vadd.f32 %v4399_v23, %v588_v63  ;;  %v597_v36 = vadd.f32 %v4399_v23, %v589_v10 }
  0x58   : > { %3834 = vmatprep.subr.bf16.mxu0 %v4517_v34  ;;  %v1457_v13 = vld [vmem:[#allocation2 + $0x10] sm:$0xf]  ;;  %3826 = vmatprep.mubr.bf16.mxu1 %v4070_v59  ;;  %1082 = vst [vmem:[#allocation2 + $0x30] sm:$0xf] %v1081_v6  ;;  %1088 = vst [vmem:[#allocation2 + $0x38] sm:$0xf] %v1087_v7  ;;  %v1066_v17 = vsel %vm4303_vm2, %v992_v49, %v1065_v12 }
  0x59   : > { %3861 = vmatpush3.bf16.msra.mxu1 %v4066_v29  ;;  %v1475_v14 = vrot.slane %v1473_v1, 4  ;;  %v1478_v15 = vrot.slane %v1476_v2, 5  ;;  %v1489_v16 = vrot.slane %v1487_v3, 4  ;;  %v1492_v18 = vrot.slane %v1490_v4, 5  ;;  %1061 = vst [vmem:[#allocation2 + $0x14] sm:$0x1] %v1060_v8 }
  0x5a   : > { %3862 = vmatprep.subr.bf16.mxu1 %v4523_v40  ;;  %v544_v20 = vld [vmem:[#allocation2 + $0x90] sm:$0x1]  ;;  %v1501_v21 = vshrl.u32 %v1457_v13, 16  ;;  %v1504_v22 = vshll.u32 %v1457_v13, 16  ;;  %v1515_v24 = vshrl.u32 %v1459_v51, 16  ;;  %v1518_v28 = vshll.u32 %v1459_v51, 16 }
  0x5b   : > { %3835 = vmatpush3.bf16.msra.mxu0 %v4517_v34  ;;  %v1479_v26 = vor.u32 %v1478_v15, %v1475_v14  ;;  %v1493_v27 = vor.u32 %v1492_v18, %v1489_v16  ;;  %1067 = vst [vmem:[#allocation2 + $0x1c] sm:$0x1] %v1066_v17  ;;  %v545_v29 = vsel %vm4303_vm2, 0, %v544_v20  ;;  %v4072_v31 = vld [vmem:[#allocation2 + $0x78] ss:$8 sps:$4 sm:$0xff]   ;;  %v4073_v37 = vld [vmem:[%s5015_s1 + $0x90] sm:$0xff]  }
  0x5c   : > { %3836 = vmatprep.subr.bf16.mxu0 %v4065_v58  ;;  %546 = vst [vmem:[#allocation2 + $0x90] sm:$0x1] %v545_v29  ;;  %v1454_v33 = vld [vmem:[#allocation2 + $0x4] sm:$0x1]  ;;  %v547_v34 = vld [vmem:[#allocation2 + $0x98] sm:$0x1]  ;;  %3827 = vmatmul.mubr.bf16.gmra.mxu1 %v4072_v31 }
  0x5d   : > { %3863 = vmatpush3.bf16.msra.mxu1 %v4523_v40  ;;  %v4069_v32 = vld [vmem:[#allocation2 + $0x20] ss:$8 sps:$4 sm:$0xff]   ;;  %v1456_v38 = vld [vmem:[#allocation2 + $0xc] sm:$0x1]  ;;  %v1480_v39 = vrot.slane %v1479_v26, 4  ;;  %v1482_v41 = vshll.u32 %v1454_v33, 16 }
  0x5e   : > { %3864 = vmatprep.subr.bf16.mxu1 %v4074_v60  ;;  %v1494_v42 = vrot.slane %v1493_v27, 4  ;;  %v1503_v40 = vrot.slane %v1501_v21, 4  ;;  %3802 = vmatprep.mubr.bf16.mxu0 %v4069_v32  ;;  %v4078_v43 = vld [vmem:[%s5015_s1 + $0xc0] sm:$0xff]   ;;  %v1496_v46 = vshll.u32 %v1456_v38, 16  ;;  %v1506_v47 = vrot.slane %v1504_v22, 5  ;;  %v4597_v13 = vld [vmem:[%s5015_s1 + $0x178] sm:$0xff]  }
  0x5f   : > { %3837 = vmatpush3.bf16.msra.mxu0 %v4065_v58  ;;  %v1517_v49 = vrot.slane %v1515_v24, 4  ;;  %v1520_v44 = vrot.slane %v1518_v28, 5  ;;  %v4071_v53 = vld [vmem:[#allocation2 + $0x30] ss:$8 sps:$4 sm:$0xff]   ;;  %v1484_v54 = vrot.slane %v1482_v41, 5  ;;  %v548_v62 = vsel %vm4303_vm2, 0, %v547_v34 }
  0x60   : > { %3838 = vmatprep.subr.bf16.mxu0 %v4067_v11  ;;  %v1498_v19 = vrot.slane %v1496_v46, 5  ;;  %v1458_v55 = vld [vmem:[#allocation2 + $0x14] sm:$0x1]  ;;  %v1507_v57 = vor.u32 %v1506_v47, %v1503_v40  ;;  %3803 = vmatmul.mubr.bf16.gmra.mxu0 %v4071_v53  ;;  %v604_v63 = vmax.f32 %v596_v35, 0.0  ;;  %v605_v10 = vmax.f32 %v597_v36, 0.0  ;;  %v3660_v14 = vld [vmem:[%s4321_s26 + $0x28] sm:$0xff]  }
  0x61   : > { %3865 = vmatpush3.bf16.msra.mxu1 %v4074_v60  ;;  %v1521_v58 = vor.u32 %v1520_v44, %v1517_v49  ;;  %v1510_v61 = vshll.u32 %v1458_v55, 16  ;;  %v4075_v60 = vld [vmem:[%s5015_s1 + $0x88] sm:$0xff]   ;;  %v1485_v1 = vsel %vm4581_vm8, %v1480_v39, %v1484_v54  ;;  %549 = vst [vmem:[#allocation2 + $0x98] sm:$0x1] %v548_v62  ;;  %v550_v5 = vld [vmem:[#allocation2 + $0xa0] sm:$0x1]  ;;  %v3594_v20 = vunpack.c.l.bf16 %v3660_v14 }
  0x62   : > { %3866 = vmatprep.subr.bf16.mxu1 %v4076_v25  ;;  %v1460_v59 = vld [vmem:[#allocation2 + $0x1c] sm:$0x1]  ;;  %v1499_v2 = vsel %vm4581_vm8, %v1494_v42, %v1498_v19  ;;  %v1508_v3 = vrot.slane %v1507_v57, 4  ;;  %v3556_v12 = vpack.c.bf16 %v604_v63, %v604_v63  ;;  %v553_v51 = vld [vmem:[#allocation2 + $0xa8] sm:$0x1]  ;;  %v3557_v15 = vpack.c.bf16 %v605_v10, %v605_v10  ;;  %v4077_v31 = vld [vmem:[%s5015_s1 + $0x80] sm:$0xff]  }
  0x63   : > { %3839 = vmatpush3.bf16.msra.mxu0 %v4067_v11  ;;  %v1522_v4 = vrot.slane %v1521_v58, 4  ;;  %v3371_v6 = vcombine.low %v1485_v1, %v1499_v2  ;;  %v1512_v7 = vrot.slane %v1510_v61, 5  ;;  %v1524_v8 = vshll.u32 %v1460_v59, 16  ;;  %v727_v26 = vld [vmem:[#allocation2 + $0x90] sm:$0xf]  ;;  %v4080_v19 = vld [vmem:[%s5015_s1 + $0x138] sm:$0xff]  }
  0x64   : > { %3840 = vmatprep.subr.bf16.mxu0 %v4073_v37  ;;  %v551_v16 = vsel %vm4303_vm2, 0, %v550_v5  ;;  %v554_v18 = vsel %vm4303_vm2, 0, %v553_v51  ;;  %v645_v21 = vshrl.u32 %v3556_v12, 16  ;;  %v648_v22 = vshll.u32 %v3556_v12, 16  ;;  %v1071_v29 = vld [vmem:[#allocation2 + $0x24] sm:$0x1] }
  0x65   : > { %3867 = vmatpush3.bf16.msra.mxu1 %v4076_v25  ;;  %3846 = vmatprep.mubr.bf16.mxu0 %v3371_v6  ;;  %v1513_v11 = vsel %vm4581_vm8, %v1508_v3, %v1512_v7  ;;  %v1526_v17 = vrot.slane %v1524_v8, 5  ;;  %552 = vst [vmem:[#allocation2 + $0xa0] sm:$0x1] %v551_v16  ;;  %555 = vst [vmem:[#allocation2 + $0xa8] sm:$0x1] %v554_v18  ;;  %v653_v24 = vshrl.u32 %v3557_v15, 16  ;;  %v3595_v27 = vunpack.c.h.bf16 %v3660_v14 }
  0x66   : > { %3868 = vmatprep.subr.bf16.mxu1 %v4078_v43  ;;  %v656_v25 = vshll.u32 %v3557_v15, 16  ;;  %v590_v28 = vmul.f32 %v3594_v20, %v4345_v0  ;;  %v4612_v33 = vrot.slane %v645_v21, 7  ;;  %v1000_v34 = vrot.slane %v4486_v56, 4  ;;  %v1077_v36 = vld [vmem:[#allocation2 + $0x2c] sm:$0x1]  ;;  %v4636_v2 = vld [vmem:[%s4321_s26 + $0x30] sm:$0xff]  }
  0x67   : > { %3841 = vmatpush3.bf16.msra.mxu0 %v4073_v37  ;;  %v1527_v32 = vsel %vm4581_vm8, %v1522_v4, %v1526_v17  ;;  %v1008_v35 = vrot.slane %v4512_v30, 4  ;;  %v4616_v38 = vrot.slane %v653_v24, 7  ;;  %v591_v39 = vmul.f32 %v3595_v27, %v4345_v0  ;;  %v1461_v42 = vld [vmem:[#allocation2 + $0x20] sm:$0xf]  ;;  %v1463_v40 = vld [vmem:[#allocation2 + $0x28] sm:$0xf] }
  0x68   : > { %3842 = vmatprep.subr.bf16.mxu0 %v4075_v60  ;;  %v3372_v37 = vcombine.low %v1513_v11, %v1527_v32  ;;  %v598_v41 = vadd.f32 %v4399_v23, %v590_v28  ;;  %v733_v46 = vld [vmem:[#allocation2 + $0x98] sm:$0xf]  ;;  %v1072_v56 = vsel %vm4303_vm2, %v1000_v34, %v1071_v29  ;;  %v1529_v47 = vshrl.u32 %v1461_v42, 16  ;;  %v1083_v59 = vld [vmem:[#allocation2 + $0x34] sm:$0x1] }
  0x69   : > { %3869 = vmatpush3.bf16.msra.mxu1 %v4078_v43  ;;  %v650_v43 = vor.u32 %v648_v22, %v4612_v33  ;;  %v1078_v30 = vsel %vm4303_vm2, %v1008_v35, %v1077_v36  ;;  %v658_v49 = vor.u32 %v656_v25, %v4616_v38  ;;  %v599_v44 = vadd.f32 %v4399_v23, %v591_v39  ;;  %v1465_v1 = vld [vmem:[#allocation2 + $0x30] sm:$0xf]  ;;  %v1467_v14 = vld [vmem:[#allocation2 + $0x38] sm:$0xf] }
  0x6a   : > { %3902 = vmatprep.subr.bf16.mxu1 %v4597_v13  ;;  %v606_v0 = vmax.f32 %v598_v41, 0.0  ;;  %1073 = vst [vmem:[#allocation2 + $0x24] sm:$0x1] %v1072_v56  ;;  %1079 = vst [vmem:[#allocation2 + $0x2c] sm:$0x1] %v1078_v30  ;;  %v1532_v53 = vshll.u32 %v1461_v42, 16  ;;  %v3598_v32 = vunpack.c.l.bf16 %v4636_v2  ;;  %v3599_v34 = vunpack.c.h.bf16 %v4636_v2 }
  0x6b   : > { %3843 = vmatpush3.bf16.msra.mxu0 %v4075_v60  ;;  %v728_v54 = vsel %vm4447_vm5, %v650_v43, %v727_v26  ;;  %v1531_v55 = vrot.slane %v1529_v47, 4  ;;  %v1543_v57 = vshrl.u32 %v1463_v40, 16  ;;  %v1546_v58 = vshll.u32 %v1463_v40, 16  ;;  %v1089_v60 = vld [vmem:[#allocation2 + $0x3c] sm:$0x1]  ;;  %v4083_v16 = vld [vmem:[%s5015_s1 + $0x130] sm:$0xff]  }
  0x6c   : > { %3844 = vmatprep.subr.bf16.mxu0 %v4077_v31  ;;  %729 = vst [vmem:[#allocation2 + $0x90] sm:$0xf] %v728_v54  ;;  %v734_v61 = vsel %vm4447_vm5, %v658_v49, %v733_v46  ;;  %v607_v62 = vmax.f32 %v599_v44, 0.0  ;;  %v3558_v63 = vpack.c.bf16 %v606_v0, %v606_v0  ;;  %v1534_v10 = vrot.slane %v1532_v53, 5  ;;  %v739_v15 = vld [vmem:[#allocation2 + $0xa0] sm:$0xf] }
  0x6d   : > { %735 = vst [vmem:[#allocation2 + $0x98] sm:$0xf] %v734_v61  ;;  %v1545_v3 = vrot.slane %v1543_v57, 4  ;;  %v1548_v4 = vrot.slane %v1546_v58, 5  ;;  %v1016_v5 = vrot.slane %v4527_v50, 4  ;;  %v1024_v6 = vrot.slane %v4529_v52, 4 }
  0x6e   : > { %v3559_v7 = vpack.c.bf16 %v607_v62, %v607_v62  ;;  %v661_v8 = vshrl.u32 %v3558_v63, 16  ;;  %v664_v12 = vshll.u32 %v3558_v63, 16  ;;  %v1535_v51 = vor.u32 %v1534_v10, %v1531_v55  ;;  %v556_v11 = vld [vmem:[#allocation2 + $0xb0] sm:$0x1]  ;;  %v559_v25 = vld [vmem:[#allocation2 + $0xb8] sm:$0x1] }
  0x6f   : > { %3845 = vmatpush3.bf16.msra.mxu0 %v4077_v31  ;;  %v1549_v18 = vor.u32 %v1548_v4, %v1545_v3  ;;  %v1084_v20 = vsel %vm4303_vm2, %v1016_v5, %v1083_v59  ;;  %v1090_v50 = vsel %vm4303_vm2, %v1024_v6, %v1089_v60  ;;  %v1557_v52 = vshrl.u32 %v1465_v1, 16  ;;  %v745_v26 = vld [vmem:[#allocation2 + $0xa8] sm:$0xf]  ;;  %v562_v42 = vld [vmem:[#allocation2 + $0xc0] sm:$0x1]  ;;  %v3662_v53 = vld [vmem:[%s4321_s26 + $0x38] sm:$0xff]  }
  0x70   : > { %3878 = vmatprep.subr.bf16.mxu0 %v4080_v19  ;;  %v4647_v17 = vrot.slane %v661_v8, 7  ;;  %v669_v21 = vshrl.u32 %v3559_v7, 16  ;;  %v672_v22 = vshll.u32 %v3559_v7, 16  ;;  %v1536_v24 = vrot.slane %v1535_v51, 4  ;;  %1085 = vst [vmem:[#allocation2 + $0x34] sm:$0x1] %v1084_v20 }
  0x71   : > { %1091 = vst [vmem:[#allocation2 + $0x3c] sm:$0x1] %v1090_v50  ;;  %v1462_v27 = vld [vmem:[#allocation2 + $0x24] sm:$0x1]  ;;  %v1464_v28 = vld [vmem:[#allocation2 + $0x2c] sm:$0x1] }
  0x72   : > { %3847 = vmatmul.mubr.bf16.vlgmr.msra.gmra.mxu0 %v3372_v37  ;;  %v1550_v29 = vrot.slane %v1549_v18, 4  ;;  %v1559_v31 = vrot.slane %v1557_v52, 4  ;;  %v666_v35 = vor.u32 %v664_v12, %v4647_v17  ;;  %v4652_v36 = vrot.slane %v669_v21, 7  ;;  %v4085_v37 = vld [vmem:[%s5015_s1 + $0x128] sm:$0xff]   ;;  %v4089_v10 = vld [vmem:[%s5015_s1 + $0x120] sm:$0xff]  }
  0x73   : > { %3879 = vmatpush3.bf16.msra.mxu0 %v4080_v19  ;;  %v1538_v39 = vshll.u32 %v1462_v27, 16  ;;  %v1552_v41 = vshll.u32 %v1464_v28, 16  ;;  %v1560_v40 = vshll.u32 %v1465_v1, 16  ;;  %v1571_v43 = vshrl.u32 %v1467_v14, 16  ;;  %v565_v58 = vld [vmem:[#allocation2 + $0xc8] sm:$0x1] }
  0x74   : > { %3880 = vmatprep.subr.bf16.mxu0 %v4083_v16  ;;  %v1574_v46 = vshll.u32 %v1467_v14, 16  ;;  %v557_v56 = vsel %vm4303_vm2, 0, %v556_v11  ;;  %v4079_v30 = vld [vmem:[#allocation2 + $0x90] ss:$8 sps:$4 sm:$0xff]   ;;  %v674_v47 = vor.u32 %v672_v22, %v4652_v36  ;;  %v740_v49 = vsel %vm4447_vm5, %v666_v35, %v739_v15  ;;  %v4679_v5 = vld [vmem:[%s5017_s3] ss:$0 sm:$0xff] }
  0x75   : > { %v1540_v44 = vrot.slane %v1538_v39, 5  ;;  %v1554_v0 = vrot.slane %v1552_v41, 5  ;;  %558 = vst [vmem:[#allocation2 + $0xb0] sm:$0x1] %v557_v56  ;;  %741 = vst [vmem:[#allocation2 + $0xa0] sm:$0xf] %v740_v49  ;;  %3870 = vmatprep.mubr.bf16.mxu1 %v4079_v30  ;;  %v592_v6 = vmul.f32 %v4679_v5, %v3598_v32  ;;  %v593_v12 = vmul.f32 %v4679_v5, %v3599_v34 }
  0x76   : > { %v1562_v54 = vrot.slane %v1560_v40, 5  ;;  %v1573_v19 = vrot.slane %v1571_v43, 4  ;;  %v1576_v55 = vrot.slane %v1574_v46, 5  ;;  %v560_v57 = vsel %vm4303_vm2, 0, %v559_v25  ;;  %v4689_v52 = vld [vmem:[%s5018_s4] ss:$0 sm:$0xff] }
  0x77   : > { %v746_v59 = vsel %vm4447_vm5, %v674_v47, %v745_v26  ;;  %3881 = vmatpush3.bf16.msra.mxu0 %v4083_v16  ;;  %v1541_v61 = vsel %vm4581_vm8, %v1536_v24, %v1540_v44  ;;  %v1555_v62 = vsel %vm4581_vm8, %v1550_v29, %v1554_v0  ;;  %561 = vst [vmem:[#allocation2 + $0xb8] sm:$0x1] %v560_v57  ;;  %v563_v63 = vsel %vm4303_vm2, 0, %v562_v42  ;;  %v1466_v1 = vld [vmem:[#allocation2 + $0x34] sm:$0x1]  ;;  %v4086_v49 = vld [vmem:[%s5015_s1 + $0x168] sm:$0xff]  }
  0x78   : > { %747 = vst [vmem:[#allocation2 + $0xa8] sm:$0xf] %v746_v59  ;;  %v3373_v60 = vcombine.low %v1541_v61, %v1555_v62  ;;  %v1468_v2 = vld [vmem:[#allocation2 + $0x3c] sm:$0x1]  ;;  %v1563_v3 = vor.u32 %v1562_v54, %v1559_v31  ;;  %v1577_v4 = vor.u32 %v1576_v55, %v1573_v19  ;;  %3882 = vmatprep.subr.bf16.mxu0 %v4085_v37  ;;  %564 = vst [vmem:[#allocation2 + $0xc0] sm:$0x1] %v563_v63 }
  0x79   : > { %v1566_v7 = vshll.u32 %v1466_v1, 16  ;;  %v1580_v8 = vshll.u32 %v1468_v2, 16  ;;  %v566_v51 = vsel %vm4303_vm2, 0, %v565_v58  ;;  %v600_v16 = vadd.f32 %v4399_v23, %v592_v6  ;;  %v4091_v23 = vld [vmem:[%s5015_s1 + $0x118] sm:$0xff]   ;;  %v4084_v35 = vld [vmem:[%s5015_s1 + $0x170] sm:$0xff]   ;;  %v4095_v55 = vld [vmem:[%s5015_s1 + $0x108] sm:$0xff]  }
  0x7a   : > { %3850 = vmatprep.mubr.bf16.mxu0 %v3373_v60  ;;  %v1564_v14 = vrot.slane %v1563_v3, 4  ;;  %v1578_v15 = vrot.slane %v1577_v4, 4  ;;  %567 = vst [vmem:[#allocation2 + $0xc8] sm:$0x1] %v566_v51  ;;  %v3602_v18 = vunpack.c.l.bf16 %v3662_v53  ;;  %v601_v11 = vadd.f32 %v4689_v52, %v593_v12  ;;  %v4093_v43 = vld [vmem:[%s5015_s1 + $0x110] sm:$0xff]   ;;  %v3656_v60 = vld [vmem:[%s4321_s26 + $0x8] sm:$0xff]  }
  0x7b   : > { %v1568_v20 = vrot.slane %v1566_v7, 5  ;;  %v1582_v50 = vrot.slane %v1580_v8, 5  ;;  %3883 = vmatpush3.bf16.msra.mxu0 %v4085_v37  ;;  %v3603_v21 = vunpack.c.h.bf16 %v3662_v53  ;;  %v608_v22 = vmax.f32 %v600_v16, 0.0  ;;  %v730_v7 = vld [vmem:[#allocation2 + $0x94] sm:$0x1]  ;;  %v4090_v51 = vld [vmem:[%s5015_s1 + $0x160] sm:$0xff]  }
  0x7c   : > { %v594_v24 = vmul.f32 %v4679_v5, %v3602_v18  ;;  %3884 = vmatprep.subr.bf16.mxu0 %v4089_v10  ;;  %v609_v27 = vmax.f32 %v601_v11, 0.0  ;;  %v751_v30 = vld [vmem:[#allocation2 + $0xb0] sm:$0xf]  ;;  %v736_v16 = vld [vmem:[#allocation2 + $0x9c] sm:$0x1] }
  0x7d   : > { %v1569_v25 = vsel %vm4581_vm8, %v1564_v14, %v1568_v20  ;;  %v1583_v26 = vsel %vm4581_vm8, %v1578_v15, %v1582_v50  ;;  %v595_v28 = vmul.f32 %v4679_v5, %v3603_v21  ;;  %v3560_v31 = vpack.c.bf16 %v608_v22, %v608_v22  ;;  %v2126_v18 = vld [vmem:[#allocation2 + $0x90] sm:$0xf]  ;;  %v4097_v50 = vld [vmem:[%s5015_s1 + $0x100] sm:$0xff]  }
  0x7e   : > { %v3374_v29 = vcombine.low %v1569_v25, %v1583_v26  ;;  %v602_v32 = vadd.f32 %v4689_v52, %v594_v24  ;;  %v3561_v39 = vpack.c.bf16 %v609_v27, %v609_v27  ;;  %v757_v0 = vld [vmem:[#allocation2 + $0xb8] sm:$0xf]  ;;  %v3578_v14 = vunpack.c.l.bf16 %v3656_v60 }
  0x7f   : > { %v4082_v34 = vld [vmem:[#allocation2 + $0xa0] ss:$8 sps:$4 sm:$0xff]   ;;  %v603_v41 = vadd.f32 %v4689_v52, %v595_v28  ;;  %3885 = vmatpush3.bf16.msra.mxu0 %v4089_v10  ;;  %v677_v37 = vshrl.u32 %v3560_v31, 16  ;;  %v680_v42 = vshll.u32 %v3560_v31, 16  ;;  %v3579_v15 = vunpack.c.h.bf16 %v3656_v60 }
  0x80   : > { %3851 = vmatmul.mubr.bf16.gmra.mxu0 %v3374_v29  ;;  %v610_v40 = vmax.f32 %v602_v32, 0.0  ;;  %3886 = vmatprep.subr.bf16.mxu0 %v4091_v23  ;;  %v685_v46 = vshrl.u32 %v3561_v39, 16  ;;  %v688_v56 = vshll.u32 %v3561_v39, 16  ;;  %v763_v63 = vld [vmem:[#allocation2 + $0xc0] sm:$0xf]  ;;  %v651_v22 = vrot.slane %v4612_v33, 4 }
  0x81   : > { %3871 = vmatmul.mubr.bf16.vlgmr.msra.gmra.mxu1 %v4082_v34  ;;  %v611_v47 = vmax.f32 %v603_v41, 0.0  ;;  %v4713_v44 = vrot.slane %v677_v37, 7  ;;  %v3573_v10 = vld [vmem:[%s4321_s26] sm:$0xff]   ;;  %v769_v3 = vld [vmem:[#allocation2 + $0xc8] sm:$0xf]  ;;  %v495_v25 = vmul.f32 %v4679_v5, %v3579_v15  ;;  %v659_v26 = vrot.slane %v4616_v38, 4 }
  0x82   : > { %3903 = vmatpush3.bf16.msra.mxu1 %v4597_v13  ;;  %v3562_v53 = vpack.c.bf16 %v610_v40, %v610_v40  ;;  %v4715_v54 = vrot.slane %v685_v46, 7  ;;  %v3574_v4 = vunpack.c.l.bf16 %v3573_v10  ;;  %v3575_v6 = vunpack.c.h.bf16 %v3573_v10  ;;  %v2128_v33 = vld [vmem:[#allocation2 + $0x98] sm:$0xf]  ;;  %v2130_v41 = vld [vmem:[#allocation2 + $0xa0] sm:$0xf] }
  0x83   : > { %3904 = vmatprep.subr.bf16.mxu1 %v4084_v35  ;;  %v3563_v19 = vpack.c.bf16 %v611_v47, %v611_v47  ;;  %3887 = vmatpush3.bf16.msra.mxu0 %v4091_v23  ;;  %v682_v13 = vor.u32 %v680_v42, %v4713_v44  ;;  %v494_v23 = vmul.f32 %v4679_v5, %v3578_v14  ;;  %v4092_v38 = vld [vmem:[%s5015_s1 + $0x158] sm:$0xff]   ;;  %v2143_v39 = vshrl.u32 %v2126_v18, 16  ;;  %v4094_v47 = vld [vmem:[%s5015_s1 + $0x150] sm:$0xff]  }
  0x84   : > { %v693_v57 = vshrl.u32 %v3562_v53, 16  ;;  %v696_v58 = vshll.u32 %v3562_v53, 16  ;;  %3888 = vmatprep.subr.bf16.mxu0 %v4093_v43  ;;  %v690_v59 = vor.u32 %v688_v56, %v4715_v54  ;;  %v492_v11 = vmul.f32 %v4679_v5, %v3574_v4  ;;  %v4764_v46 = vld [vmem:[%s5015_s1 + $0x1b8] sm:$0xff]   ;;  %v742_v56 = vld [vmem:[#allocation2 + $0xa4] sm:$0x1] }
  0x85   : > { %v701_v61 = vshrl.u32 %v3563_v19, 16  ;;  %v704_v62 = vshll.u32 %v3563_v19, 16  ;;  %v752_v1 = vsel %vm4447_vm5, %v682_v13, %v751_v30  ;;  %v493_v21 = vmul.f32 %v4679_v5, %v3575_v6  ;;  %v2132_v30 = vld [vmem:[#allocation2 + $0xa8] sm:$0xf] }
  0x86   : > { %3905 = vmatpush3.bf16.msra.mxu1 %v4084_v35  ;;  %v4726_v2 = vrot.slane %v693_v57, 7  ;;  %753 = vst [vmem:[#allocation2 + $0xb0] sm:$0xf] %v752_v1  ;;  %v758_v8 = vsel %vm4447_vm5, %v690_v59, %v757_v0  ;;  %v506_v28 = vadd.f32 %v4689_v52, %v492_v11  ;;  %v731_v31 = vsel %vm4303_vm2, %v651_v22, %v730_v7  ;;  %v3657_v7 = vld [vmem:[%s4321_s26 + $0x10] sm:$0xff]  }
  0x87   : > { %3906 = vmatprep.subr.bf16.mxu1 %v4086_v49  ;;  %v4730_v12 = vrot.slane %v701_v61, 7  ;;  %3889 = vmatpush3.bf16.msra.mxu0 %v4093_v43  ;;  %759 = vst [vmem:[#allocation2 + $0xb8] sm:$0xf] %v758_v8  ;;  %v507_v29 = vadd.f32 %v4689_v52, %v493_v21  ;;  %v508_v34 = vadd.f32 %v4689_v52, %v494_v23  ;;  %732 = vst [vmem:[#allocation2 + $0x94] sm:$0x1] %v731_v31  ;;  %v4096_v8 = vld [vmem:[%s5015_s1 + $0x148] sm:$0xff]  }
  0x88   : > { %v698_v20 = vor.u32 %v696_v58, %v4726_v2  ;;  %3890 = vmatprep.subr.bf16.mxu0 %v4095_v55  ;;  %v509_v35 = vadd.f32 %v4689_v52, %v495_v25  ;;  %v514_v37 = vmax.f32 %v506_v28, 0.0  ;;  %v737_v40 = vsel %vm4303_vm2, %v659_v26, %v736_v16  ;;  %v3658_v16 = vld [vmem:[%s4321_s26 + $0x18] sm:$0xff]  }
  0x89   : > { %v706_v24 = vor.u32 %v704_v62, %v4730_v12  ;;  %v515_v42 = vmax.f32 %v507_v29, 0.0  ;;  %v2146_v43 = vshll.u32 %v2126_v18, 16  ;;  %738 = vst [vmem:[#allocation2 + $0x9c] sm:$0x1] %v737_v40  ;;  %v2145_v53 = vrot.slane %v2143_v39, 4 }
  0x8a   : > { %3907 = vmatpush3.bf16.msra.mxu1 %v4086_v49  ;;  %v764_v27 = vsel %vm4447_vm5, %v698_v20, %v763_v63  ;;  %v516_v49 = vmax.f32 %v508_v34, 0.0  ;;  %v517_v0 = vmax.f32 %v509_v35, 0.0  ;;  %v2157_v19 = vshrl.u32 %v2128_v33, 16  ;;  %v4098_v35 = vld [vmem:[%s5015_s1 + $0x140] sm:$0xff]  }
  0x8b   : > { %765 = vst [vmem:[#allocation2 + $0xc0] sm:$0xf] %v764_v27  ;;  %v770_v32 = vsel %vm4447_vm5, %v706_v24, %v769_v3  ;;  %3908 = vmatprep.subr.bf16.mxu1 %v4090_v51  ;;  %3891 = vmatpush3.bf16.msra.mxu0 %v4095_v55  ;;  %v748_v55 = vld [vmem:[#allocation2 + $0xac] sm:$0x1]  ;;  %v522_v13 = vpack.c.bf16 %v514_v37, %v514_v37  ;;  %v2148_v58 = vrot.slane %v2146_v43, 5  ;;  %v2160_v59 = vshll.u32 %v2128_v33, 16 }
  0x8c   : > { %771 = vst [vmem:[#allocation2 + $0xc8] sm:$0xf] %v770_v32  ;;  %3892 = vmatprep.subr.bf16.mxu0 %v4097_v50  ;;  %v523_v57 = vpack.c.bf16 %v515_v42, %v515_v42  ;;  %v524_v62 = vpack.c.bf16 %v516_v49, %v516_v49  ;;  %v525_v63 = vpack.c.bf16 %v517_v0, %v517_v0  ;;  %v2159_v10 = vrot.slane %v2157_v19, 4  ;;  %v754_v19 = vld [vmem:[#allocation2 + $0xb4] sm:$0x1] }
  0x8d   : > { %v667_v60 = vrot.slane %v4647_v17, 4  ;;  %530 = vst [vmem:[#allocation2 + $0xd8] sm:$0xf] %v522_v13  ;;  %v2149_v1 = vor.u32 %v2148_v58, %v2145_v53  ;;  %v2162_v3 = vrot.slane %v2160_v59, 5  ;;  %v675_v4 = vrot.slane %v4652_v36, 4  ;;  %v4801_v13 = vld [vmem:[%s5015_s1 + $0x1f8] sm:$0xff]  }
  0x8e   : > { %3909 = vmatpush3.bf16.msra.mxu1 %v4090_v51  ;;  %v4087_v61 = vld [vmem:[#allocation2 + $0xb0] ss:$8 sps:$4 sm:$0xff]   ;;  %531 = vst [vmem:[#allocation2 + $0xe0] sm:$0xf] %v523_v57  ;;  %v2171_v6 = vshrl.u32 %v2130_v41, 16  ;;  %v2174_v51 = vshll.u32 %v2130_v41, 16  ;;  %v3582_v23 = vunpack.c.l.bf16 %v3657_v7  ;;  %v3583_v25 = vunpack.c.h.bf16 %v3657_v7 }
  0x8f   : > { %3910 = vmatprep.subr.bf16.mxu1 %v4092_v38  ;;  %3893 = vmatpush3.bf16.msra.mxu0 %v4097_v50  ;;  %532 = vst [vmem:[#allocation2 + $0xe8] sm:$0xf] %v524_v62  ;;  %533 = vst [vmem:[#allocation2 + $0xf0] sm:$0xf] %v525_v63  ;;  %v743_v17 = vsel %vm4303_vm2, %v667_v60, %v742_v56  ;;  %v2185_v14 = vshrl.u32 %v2132_v30, 16  ;;  %v2188_v15 = vshll.u32 %v2132_v30, 16  ;;  %v3586_v31 = vunpack.c.l.bf16 %v3658_v16 }
  0x90   : > { %3926 = vmatprep.subr.bf16.mxu0 %v4764_v46  ;;  %3874 = vmatprep.mubr.bf16.mxu1 %v4087_v61  ;;  %v2127_v18 = vld [vmem:[#allocation2 + $0x94] sm:$0x1]  ;;  %v2150_v20 = vrot.slane %v2149_v1, 4  ;;  %v2163_v36 = vor.u32 %v2162_v3, %v2159_v10  ;;  %744 = vst [vmem:[#allocation2 + $0xa4] sm:$0x1] %v743_v17  ;;  %v749_v50 = vsel %vm4303_vm2, %v675_v4, %v748_v55  ;;  %v2173_v11 = vrot.slane %v2171_v6, 4 }
  0x91   : > { %v2152_v22 = vshll.u32 %v2127_v18, 16  ;;  %750 = vst [vmem:[#allocation2 + $0xac] sm:$0x1] %v749_v50  ;;  %v2176_v24 = vrot.slane %v2174_v51, 5  ;;  %v2129_v26 = vld [vmem:[#allocation2 + $0x9c] sm:$0x1]  ;;  %v496_v34 = vmul.f32 %v4679_v5, %v3582_v23  ;;  %v497_v37 = vmul.f32 %v4679_v5, %v3583_v25 }
  0x92   : > { %3911 = vmatpush3.bf16.msra.mxu1 %v4092_v38  ;;  %v2164_v27 = vrot.slane %v2163_v36, 4  ;;  %v2187_v28 = vrot.slane %v2185_v14, 4  ;;  %v2190_v29 = vrot.slane %v2188_v15, 5  ;;  %v2166_v32 = vshll.u32 %v2129_v26, 16  ;;  %v4788_v41 = vld [vmem:[%s5015_s1 + $0x1b0] sm:$0xff]   ;;  %v4107_v3 = vld [vmem:[%s5015_s1 + $0x1a8] sm:$0xff]  }
  0x93   : > { %v4088_v21 = vld [vmem:[#allocation2 + $0xc0] ss:$8 sps:$4 sm:$0xff]   ;;  %3912 = vmatprep.subr.bf16.mxu1 %v4094_v47  ;;  %v2154_v33 = vrot.slane %v2152_v22, 5  ;;  %v2177_v38 = vor.u32 %v2176_v24, %v2173_v11  ;;  %v3587_v42 = vunpack.c.h.bf16 %v3658_v16  ;;  %v498_v40 = vmul.f32 %v4679_v5, %v3586_v31  ;;  %v760_v17 = vld [vmem:[#allocation2 + $0xbc] sm:$0x1]  ;;  %v4104_v23 = vld [vmem:[%s5015_s1 + $0x1f0] sm:$0xff]  }
  0x94   : > { %3875 = vmatmul.mubr.bf16.gmra.mxu1 %v4088_v21  ;;  %v2191_v39 = vor.u32 %v2190_v29, %v2187_v28  ;;  %v510_v56 = vadd.f32 %v4689_v52, %v496_v34  ;;  %v511_v49 = vadd.f32 %v4689_v52, %v497_v37  ;;  %v2168_v55 = vrot.slane %v2166_v32, 5  ;;  %v2134_v51 = vld [vmem:[#allocation2 + $0xb0] sm:$0xf]  ;;  %v2138_v36 = vld [vmem:[#allocation2 + $0xc0] sm:$0xf] }
  0x95   : > { %v4099_v43 = vld [vmem:[#allocation2 + $0xd8] ss:$8 sps:$4 sm:$0xff]   ;;  %v499_v0 = vmul.f32 %v4679_v5, %v3587_v42  ;;  %v512_v53 = vadd.f32 %v4689_v52, %v498_v40  ;;  %v2178_v58 = vrot.slane %v2177_v38, 4  ;;  %v691_v21 = vrot.slane %v4715_v54, 4  ;;  %v766_v22 = vld [vmem:[#allocation2 + $0xc4] sm:$0x1] }
  0x96   : > { %3913 = vmatpush3.bf16.msra.mxu1 %v4094_v47  ;;  %v4100_v30 = vld [vmem:[#allocation2 + $0xe8] ss:$8 sps:$4 sm:$0xff]   ;;  %v2155_v47 = vsel %vm4581_vm8, %v2150_v20, %v2154_v33  ;;  %3894 = vmatprep.mubr.bf16.mxu0 %v4099_v43  ;;  %v2192_v59 = vrot.slane %v2191_v39, 4  ;;  %v518_v61 = vmax.f32 %v510_v56, 0.0  ;;  %v519_v10 = vmax.f32 %v511_v49, 0.0  ;;  %v4109_v39 = vld [vmem:[%s5015_s1 + $0x1a0] sm:$0xff]  }
  0x97   : > { %3914 = vmatprep.subr.bf16.mxu1 %v4096_v8  ;;  %v2131_v57 = vld [vmem:[#allocation2 + $0xa4] sm:$0x1]  ;;  %3895 = vmatmul.mubr.bf16.vlgmr.msra.gmra.mxu0 %v4100_v30  ;;  %v513_v60 = vadd.f32 %v4689_v52, %v499_v0  ;;  %v520_v1 = vmax.f32 %v512_v53, 0.0  ;;  %v2169_v4 = vsel %vm4581_vm8, %v2164_v27, %v2168_v55  ;;  %v2136_v20 = vld [vmem:[#allocation2 + $0xb8] sm:$0xf]  ;;  %v2199_v26 = vshrl.u32 %v2134_v51, 16 }
  0x98   : > { %v2133_v62 = vld [vmem:[#allocation2 + $0xac] sm:$0x1]  ;;  %v2180_v63 = vshll.u32 %v2131_v57, 16  ;;  %3927 = vmatpush3.bf16.msra.mxu0 %v4764_v46  ;;  %v526_v7 = vpack.c.bf16 %v518_v61, %v518_v61  ;;  %v3455_v14 = vcombine.low %v2155_v47, %v2169_v4  ;;  %v527_v16 = vpack.c.bf16 %v519_v10, %v519_v10 }
  0x99   : > { %v2194_v6 = vshll.u32 %v2133_v62, 16  ;;  %3928 = vmatprep.subr.bf16.mxu0 %v4788_v41  ;;  %v521_v18 = vmax.f32 %v513_v60, 0.0  ;;  %v528_v11 = vpack.c.bf16 %v520_v1, %v520_v1  ;;  %v2202_v27 = vshll.u32 %v2134_v51, 16  ;;  %v772_v54 = vld [vmem:[#allocation2 + $0xcc] sm:$0x1] }
  0x9a   : > { %3915 = vmatpush3.bf16.msra.mxu1 %v4096_v8  ;;  %v683_v8 = vrot.slane %v4713_v44, 4  ;;  %v2182_v15 = vrot.slane %v2180_v63, 5  ;;  %534 = vst [vmem:[#allocation2 + $0xf8] sm:$0xf] %v526_v7  ;;  %v2140_v44 = vld [vmem:[#allocation2 + $0xc8] sm:$0xf]  ;;  %3918 = vmatprep.mubr.bf16.mxu1 %v3455_v14  ;;  %v761_v29 = vsel %vm4303_vm2, %v691_v21, %v760_v17 }
  0x9b   : > { %3916 = vmatprep.subr.bf16.mxu1 %v4098_v35  ;;  %v2196_v50 = vrot.slane %v2194_v6, 5  ;;  %535 = vst [vmem:[#allocation2 + $0x100] sm:$0xf] %v527_v16  ;;  %v529_v25 = vpack.c.bf16 %v521_v18, %v521_v18  ;;  %536 = vst [vmem:[#allocation2 + $0x108] sm:$0xf] %v528_v11  ;;  %v2213_v31 = vshrl.u32 %v2136_v20, 16 }
  0x9c   : > { %v755_v46 = vsel %vm4303_vm2, %v683_v8, %v754_v19  ;;  %v2183_v24 = vsel %vm4581_vm8, %v2178_v58, %v2182_v15  ;;  %3929 = vmatpush3.bf16.msra.mxu0 %v4788_v41  ;;  %v2216_v33 = vshll.u32 %v2136_v20, 16  ;;  %762 = vst [vmem:[#allocation2 + $0xbc] sm:$0x1] %v761_v29  ;;  %v2201_v38 = vrot.slane %v2199_v26, 4  ;;  %v4110_v63 = vld [vmem:[%s5015_s1 + $0x1e0] sm:$0xff]   ;;  %v4113_v8 = vld [vmem:[%s5015_s1 + $0x190] sm:$0xff]  }
  0x9d   : > { %756 = vst [vmem:[#allocation2 + $0xb4] sm:$0x1] %v755_v46  ;;  %v2197_v28 = vsel %vm4581_vm8, %v2192_v59, %v2196_v50  ;;  %537 = vst [vmem:[#allocation2 + $0x110] sm:$0xf] %v529_v25  ;;  %3930 = vmatprep.subr.bf16.mxu0 %v4107_v3  ;;  %v2204_v34 = vrot.slane %v2202_v27, 5  ;;  %v2215_v37 = vrot.slane %v2213_v31, 4 }
  0x9e   : > { %3917 = vmatpush3.bf16.msra.mxu1 %v4098_v35  ;;  %v3456_v32 = vcombine.low %v2183_v24, %v2197_v28  ;;  %v699_v35 = vrot.slane %v4726_v2, 4  ;;  %v2218_v41 = vrot.slane %v2216_v33, 5  ;;  %v707_v42 = vrot.slane %v4730_v12, 4  ;;  %v4108_v12 = vld [vmem:[%s5015_s1 + $0x1e8] sm:$0xff]   ;;  %v4137_v17 = vld [vmem:[%s4321_s26 + $0x78] sm:$0xff]   ;;  %v4114_v33 = vld [vmem:[%s5015_s1 + $0x1d0] sm:$0xff]  }
  0x9f   : > { %3950 = vmatprep.subr.bf16.mxu1 %v4801_v13  ;;  %v2227_v40 = vshrl.u32 %v2138_v36, 16  ;;  %v2205_v43 = vor.u32 %v2204_v34, %v2201_v38  ;;  %v2230_v30 = vshll.u32 %v2138_v36, 16  ;;  %v2241_v47 = vshrl.u32 %v2140_v44, 16  ;;  %v4112_v18 = vld [vmem:[%s5015_s1 + $0x1d8] sm:$0xff]   ;;  %v4115_v25 = vld [vmem:[%s5015_s1 + $0x188] sm:$0xff]  }
  0xa0   : > { %v767_v56 = vsel %vm4303_vm2, %v699_v35, %v766_v22  ;;  %3931 = vmatpush3.bf16.msra.mxu0 %v4107_v3  ;;  %v773_v2 = vsel %vm4303_vm2, %v707_v42, %v772_v54  ;;  %v2244_v0 = vshll.u32 %v2140_v44, 16  ;;  %v2219_v53 = vor.u32 %v2218_v41, %v2215_v37  ;;  %v4138_v20 = vld [vmem:[%s4321_s26 + $0x58] sm:$0xff]   ;;  %v4119_v29 = vld [vmem:[#allocation2 + $0x8] ss:$8 sps:$4 sm:$0xff]   ;;  %v893_v41 = vld [vmem:[#allocation2 + $0x40] sm:$0x1] }
  0xa1   : > { %3919 = vmatmul.mubr.bf16.vlgmr.msra.gmra.mxu1 %v3456_v32  ;;  %768 = vst [vmem:[#allocation2 + $0xc4] sm:$0x1] %v767_v56  ;;  %v2229_v49 = vrot.slane %v2227_v40, 4  ;;  %774 = vst [vmem:[#allocation2 + $0xcc] sm:$0x1] %v773_v2  ;;  %v2232_v19 = vrot.slane %v2230_v30, 5  ;;  %3932 = vmatprep.subr.bf16.mxu0 %v4109_v39  ;;  %v3635_v51 = vunpack.c.h.bf16 %v4137_v17  ;;  %v3619_v36 = vunpack.c.h.bf16 %v4138_v20 }
  0xa2   : > { %3951 = vmatpush3.bf16.msra.mxu1 %v4801_v13  ;;  %v2243_v55 = vrot.slane %v2241_v47, 4  ;;  %v4111_v13 = vld [vmem:[%s5015_s1 + $0x198] sm:$0xff]   ;;  %v2206_v59 = vrot.slane %v2205_v43, 4  ;;  %v2246_v62 = vrot.slane %v2244_v0, 5  ;;  %v2220_v4 = vrot.slane %v2219_v53, 4  ;;  %v4118_v43 = vld [vmem:[%s5015_s1 + $0x1c0] sm:$0xff]  }
  0xa3   : > { %3952 = vmatprep.subr.bf16.mxu1 %v4104_v23  ;;  %v4105_v57 = vld [vmem:[#allocation2 + $0xf8] ss:$8 sps:$4 sm:$0xff]   ;;  %v2137_v60 = vld [vmem:[#allocation2 + $0xbc] sm:$0x1]  ;;  %v2233_v1 = vor.u32 %v2232_v19, %v2229_v49  ;;  %v920_v26 = vmul.f32 %v4679_v5, %v3635_v51  ;;  %v831_v54 = vmul.f32 %v4679_v5, %v3619_v36  ;;  %v894_v42 = vsel %vm4303_vm2, 0, %v893_v41  ;;  %v4890_v47 = vld [vmem:[%s5015_s1 + $0x230] sm:$0xff]  }
  0xa4   : > { %v2135_v58 = vld [vmem:[#allocation2 + $0xb4] sm:$0x1]  ;;  %3898 = vmatprep.mubr.bf16.mxu0 %v4105_v57  ;;  %v4106_v10 = vld [vmem:[#allocation2 + $0x108] ss:$8 sps:$4 sm:$0xff]   ;;  %v2222_v6 = vshll.u32 %v2137_v60, 16  ;;  %v2247_v7 = vor.u32 %v2246_v62, %v2243_v55  ;;  %3933 = vmatpush3.bf16.msra.mxu0 %v4109_v39  ;;  %v4117_v5 = vld [vmem:[%s5015_s1 + $0x180] sm:$0xff]  }
  0xa5   : > { %v2208_v61 = vshll.u32 %v2135_v58, 16  ;;  %3899 = vmatmul.mubr.bf16.gmra.mxu0 %v4106_v10  ;;  %3934 = vmatprep.subr.bf16.mxu0 %v4111_v13  ;;  %v2234_v11 = vrot.slane %v2233_v1, 4  ;;  %v928_v38 = vadd.f32 %v4689_v52, %v920_v26  ;;  %v4121_v34 = vld [vmem:[#allocation2 + $0x50] ss:$8 sps:$4 sm:$0xff]   ;;  %v839_v35 = vadd.f32 %v4689_v52, %v831_v54  ;;  %v4116_v39 = vld [vmem:[%s5015_s1 + $0x1c8] sm:$0xff]  }
  0xa6   : > { %3953 = vmatpush3.bf16.msra.mxu1 %v4104_v23  ;;  %v2224_v15 = vrot.slane %v2222_v6, 5  ;;  %v2248_v22 = vrot.slane %v2247_v7, 4  ;;  %3942 = vmatprep.mubr.bf16.mxu0 %v4119_v29  ;;  %v4880_v37 = vld [vmem:[%s5015_s1 + $0x238] sm:$0xff]   ;;  %895 = vst [vmem:[#allocation2 + $0x40] sm:$0x1] %v894_v42  ;;  %v4901_v57 = vld [vmem:[%s5015_s1 + $0x228] sm:$0xff]  }
  0xa7   : > { %3954 = vmatprep.subr.bf16.mxu1 %v4108_v12  ;;  %v2210_v3 = vrot.slane %v2208_v61, 5  ;;  %v936_v40 = vmax.f32 %v928_v38, 0.0  ;;  %v847_v52 = vmax.f32 %v839_v35, 0.0  ;;  %v4120_v56 = vld [vmem:[#allocation2 + $0x18] ss:$8 sps:$4 sm:$0xff]  }
  0xa8   : > { %v2139_v16 = vld [vmem:[#allocation2 + $0xc4] sm:$0x1]  ;;  %v2141_v50 = vld [vmem:[#allocation2 + $0xcc] sm:$0x1]  ;;  %v2225_v46 = vsel %vm4581_vm8, %v2220_v4, %v2224_v15  ;;  %3935 = vmatpush3.bf16.msra.mxu0 %v4111_v13  ;;  %v4123_v19 = vld [vmem:[#allocation2 + $0x60] ss:$8 sps:$4 sm:$0xff]  }
  0xa9   : > { %v2211_v14 = vsel %vm4581_vm8, %v2206_v59, %v2210_v3  ;;  %v2236_v21 = vshll.u32 %v2139_v16, 16  ;;  %v2250_v44 = vshll.u32 %v2141_v50, 16  ;;  %3936 = vmatprep.subr.bf16.mxu0 %v4113_v8  ;;  %v3571_v30 = vpack.c.bf16 %v936_v40, %v936_v40  ;;  %v2796_v58 = vld [vmem:[#allocation2 + $0x8] sm:$0xf]  ;;  %v4128_v59 = vld [vmem:[#allocation2 + $0x70] ss:$8 sps:$4 sm:$0xff]  }
  0xaa   : > { %3955 = vmatpush3.bf16.msra.mxu1 %v4108_v12  ;;  %v3457_v24 = vcombine.low %v2211_v14, %v2225_v46  ;;  %v855_v2 = vpack.c.bf16 %v847_v52, %v847_v52  ;;  %v4125_v12 = vld [vmem:[#allocation2 + $0x28] ss:$8 sps:$4 sm:$0xff]   ;;  %v2797_v61 = vld [vmem:[#allocation2 + $0xc] sm:$0x1]  ;;  %v2813_v60 = vshrl.u32 %v2796_v58, 16  ;;  %v2816_v1 = vshll.u32 %v2796_v58, 16 }
  0xab   : > { %3956 = vmatprep.subr.bf16.mxu1 %v4110_v63  ;;  %v2238_v23 = vrot.slane %v2236_v21, 5  ;;  %v2252_v27 = vrot.slane %v2250_v44, 5  ;;  %v1026_v49 = vshrl.u32 %v3571_v30, 16  ;;  %v1029_v0 = vshll.u32 %v3571_v30, 16  ;;  %v2798_v62 = vld [vmem:[#allocation2 + $0x10] sm:$0xf] }
  0xac   : > { %3922 = vmatprep.mubr.bf16.mxu1 %v3457_v24  ;;  %3937 = vmatpush3.bf16.msra.mxu0 %v4113_v8  ;;  %864 = vst [vmem:[#allocation2 + $0x88] sm:$0xf] %v855_v2  ;;  %v2822_v3 = vshll.u32 %v2797_v61, 16  ;;  %v2804_v4 = vld [vmem:[#allocation2 + $0x28] sm:$0xf]  ;;  %v2827_v6 = vshrl.u32 %v2798_v62, 16 }
  0xad   : > { %v2239_v28 = vsel %vm4581_vm8, %v2234_v11, %v2238_v23  ;;  %v2253_v31 = vsel %vm4581_vm8, %v2248_v22, %v2252_v27  ;;  %3938 = vmatprep.subr.bf16.mxu0 %v4115_v25  ;;  %v4893_v53 = vrot.slane %v1026_v49, 7  ;;  %v1092_v13 = vld [vmem:[#allocation2 + $0x40] sm:$0xf]  ;;  %v2830_v7 = vshll.u32 %v2798_v62, 16  ;;  %v2805_v17 = vld [vmem:[#allocation2 + $0x2c] sm:$0x1] }
  0xae   : > { %3957 = vmatpush3.bf16.msra.mxu1 %v4110_v63  ;;  %v3458_v32 = vcombine.low %v2239_v28, %v2253_v31  ;;  %v2799_v63 = vld [vmem:[#allocation2 + $0x14] sm:$0x1]  ;;  %v2869_v51 = vshrl.u32 %v2804_v4, 16  ;;  %v2815_v14 = vrot.slane %v2813_v60, 4  ;;  %v2818_v15 = vrot.slane %v2816_v1, 5  ;;  %v4919_v28 = vld [vmem:[%s5015_s1 + $0x218] sm:$0xff]  }
  0xaf   : > { %3958 = vmatprep.subr.bf16.mxu1 %v4112_v18  ;;  %v1031_v55 = vor.u32 %v1029_v0, %v4893_v53  ;;  %v2836_v8 = vshll.u32 %v2799_v63, 16  ;;  %v2824_v16 = vrot.slane %v2822_v3, 5  ;;  %v2832_v20 = vrot.slane %v2830_v7, 5  ;;  %v2806_v50 = vld [vmem:[#allocation2 + $0x30] sm:$0xf] }
  0xb0   : > { %3923 = vmatmul.mubr.bf16.gmra.mxu1 %v3458_v32  ;;  %3939 = vmatpush3.bf16.msra.mxu0 %v4115_v25  ;;  %v2819_v11 = vor.u32 %v2818_v15, %v2815_v14  ;;  %v2807_v21 = vld [vmem:[#allocation2 + $0x34] sm:$0x1]  ;;  %v2871_v46 = vrot.slane %v2869_v51, 4  ;;  %v2872_v22 = vshll.u32 %v2804_v4, 16  ;;  %v2878_v44 = vshll.u32 %v2805_v17, 16 }
  0xb1   : > { %3940 = vmatprep.subr.bf16.mxu0 %v4117_v5  ;;  %3966 = vmatprep.mubr.bf16.mxu1 %v4121_v34  ;;  %v1093_v10 = vsel %vm4447_vm5, %v1031_v55, %v1092_v13  ;;  %v2838_v36 = vrot.slane %v2836_v8, 5  ;;  %v2883_v23 = vshrl.u32 %v2806_v50, 16  ;;  %v2886_v25 = vshll.u32 %v2806_v50, 16  ;;  %v2800_v27 = vld [vmem:[#allocation2 + $0x18] sm:$0xf] }
  0xb2   : > { %3959 = vmatpush3.bf16.msra.mxu1 %v4112_v18  ;;  %1094 = vst [vmem:[#allocation2 + $0x40] sm:$0xf] %v1093_v10  ;;  %v2829_v18 = vrot.slane %v2827_v6, 4  ;;  %v2892_v26 = vshll.u32 %v2807_v21, 16  ;;  %v2820_v29 = vrot.slane %v2819_v11, 4  ;;  %v2874_v31 = vrot.slane %v2872_v22, 5 }
  0xb3   : > { %3960 = vmatprep.subr.bf16.mxu1 %v4114_v33  ;;  %v4129_v54 = vld [vmem:[#allocation2 + $0x80] ss:$8 sps:$4 sm:$0xff]   ;;  %v2885_v32 = vrot.slane %v2883_v23, 4  ;;  %v2841_v34 = vshrl.u32 %v2800_v27, 16  ;;  %v1032_v35 = vrot.slane %v4893_v53, 4  ;;  %v2880_v42 = vrot.slane %v2878_v44, 5 }
  0xb4   : > { %3941 = vmatpush3.bf16.msra.mxu0 %v4117_v5  ;;  %v2833_v24 = vor.u32 %v2832_v20, %v2829_v18  ;;  %v2888_v5 = vrot.slane %v2886_v25, 5  ;;  %v2802_v38 = vld [vmem:[#allocation2 + $0x20] sm:$0xf]  ;;  %v2875_v41 = vor.u32 %v2874_v31, %v2871_v46  ;;  %v1095_v30 = vld [vmem:[#allocation2 + $0x44] sm:$0x1] }
  0xb5   : > { %3974 = vmatprep.subr.bf16.mxu0 %v4880_v37  ;;  %v2801_v0 = vld [vmem:[#allocation2 + $0x1c] sm:$0x1]  ;;  %v2855_v53 = vshrl.u32 %v2802_v38, 16  ;;  %v2843_v55 = vrot.slane %v2841_v34, 4  ;;  %v2858_v13 = vshll.u32 %v2802_v38, 16  ;;  %v1096_v63 = vsel %vm4303_vm2, %v1032_v35, %v1095_v30  ;;  %v4134_v22 = vld [vmem:[%s5015_s1 + $0x200] sm:$0xff]  }
  0xb6   : > { %3961 = vmatpush3.bf16.msra.mxu1 %v4114_v33  ;;  %v2834_v33 = vrot.slane %v2833_v24, 4  ;;  %v2889_v52 = vor.u32 %v2888_v5, %v2885_v32  ;;  %v2876_v49 = vrot.slane %v2875_v41, 4  ;;  %v2808_v58 = vld [vmem:[#allocation2 + $0x38] sm:$0xf]  ;;  %v2850_v1 = vshll.u32 %v2801_v0, 16 }
  0xb7   : > { %3962 = vmatprep.subr.bf16.mxu1 %v4116_v39  ;;  %3943 = vmatmul.mubr.bf16.vlgmr.msra.gmra.mxu0 %v4120_v56  ;;  %v2844_v56 = vshll.u32 %v2800_v27, 16  ;;  %v2857_v62 = vrot.slane %v2855_v53, 4  ;;  %v2860_v3 = vrot.slane %v2858_v13, 5  ;;  %1097 = vst [vmem:[#allocation2 + $0x44] sm:$0x1] %v1096_v63  ;;  %v2897_v7 = vshrl.u32 %v2808_v58, 16 }
  0xb8   : > { %3975 = vmatpush3.bf16.msra.mxu0 %v4880_v37  ;;  %3946 = vmatprep.mubr.bf16.mxu0 %v4125_v12  ;;  %v2839_v40 = vsel %vm4581_vm8, %v2834_v33, %v2838_v36  ;;  %v2803_v12 = vld [vmem:[#allocation2 + $0x24] sm:$0x1]  ;;  %v2881_v61 = vsel %vm4581_vm8, %v2876_v49, %v2880_v42  ;;  %v2900_v8 = vshll.u32 %v2808_v58, 16  ;;  %v2809_v36 = vld [vmem:[#allocation2 + $0x3c] sm:$0x1]  ;;  %v2852_v11 = vrot.slane %v2850_v1, 5 }
  0xb9   : > { %3976 = vmatprep.subr.bf16.mxu0 %v4890_v47  ;;  %v2810_v10 = vld [vmem:[#allocation2 + $0x40] sm:$0xf]  ;;  %v2864_v6 = vshll.u32 %v2803_v12, 16  ;;  %v2861_v17 = vor.u32 %v2860_v3, %v2857_v62  ;;  %v2899_v15 = vrot.slane %v2897_v7, 4  ;;  %v2906_v24 = vshll.u32 %v2809_v36, 16 }
  0xba   : > { %3963 = vmatpush3.bf16.msra.mxu1 %v4116_v39  ;;  %v4126_v39 = vld [vmem:[#allocation2 + $0x38] ss:$8 sps:$4 sm:$0xff]   ;;  %v2911_v51 = vshrl.u32 %v2810_v10, 16  ;;  %v2914_v14 = vshll.u32 %v2810_v10, 16 }
  0xbb   : > { %3964 = vmatprep.subr.bf16.mxu1 %v4118_v43  ;;  %v2862_v21 = vrot.slane %v2861_v17, 4  ;;  %v2866_v46 = vrot.slane %v2864_v6, 5 }
  0xbc   : > { %3977 = vmatpush3.bf16.msra.mxu0 %v4890_v47  ;;  %v2913_v18 = vrot.slane %v2911_v51, 4  ;;  %v2916_v20 = vrot.slane %v2914_v14, 5 }
  0xbd   : > { %3978 = vmatprep.subr.bf16.mxu0 %v4901_v57  ;;  %v2867_v27 = vsel %vm4581_vm8, %v2862_v21, %v2866_v46 }
  0xbe   : > { %3965 = vmatpush3.bf16.msra.mxu1 %v4118_v43  ;;  %v2894_v43 = vrot.slane %v2892_v26, 5  ;;  %v2811_v44 = vld [vmem:[#allocation2 + $0x44] sm:$0x1]  ;;  %v2917_v23 = vor.u32 %v2916_v20, %v2913_v18 }
  0xbf   : > { %3998 = vmatprep.subr.bf16.mxu1 %v4880_v37  ;;  %3947 = vmatmul.mubr.bf16.gmra.mxu0 %v4126_v39  ;;  %v2920_v25 = vshll.u32 %v2811_v44, 16 }
  0xc0   : > { %3979 = vmatpush3.bf16.msra.mxu0 %v4901_v57  ;;  %v2918_v31 = vrot.slane %v2917_v23, 4 }
  0xc1   : > { %3967 = vmatmul.mubr.bf16.vlgmr.msra.gmra.mxu1 %v4123_v19  ;;  %3980 = vmatprep.subr.bf16.mxu0 %v4911_v9  ;;  %v2890_v19 = vrot.slane %v2889_v52, 4  ;;  %v2922_v33 = vrot.slane %v2920_v25, 5 }
  0xc2   : > { %4006 = vmatpush3.bf16.msra.mxu1 %v4880_v37  ;;  %3970 = vmatprep.mubr.bf16.mxu1 %v4128_v59  ;;  %v2825_v37 = vsel %vm4581_vm8, %v2820_v29, %v2824_v16  ;;  %v4132_v59 = vld [vmem:[%s5015_s1 + $0x210] sm:$0xff]   ;;  %v2902_v16 = vrot.slane %v2900_v8, 5  ;;  %v2908_v29 = vrot.slane %v2906_v24, 5 }
  0xc3   : > { %3999 = vmatprep.subr.bf16.mxu1 %v4890_v47  ;;  %v3539_v2 = vcombine.low %v2825_v37, %v2839_v40  ;;  %v2895_v60 = vsel %vm4581_vm8, %v2890_v19, %v2894_v43  ;;  %v2923_v5 = vsel %vm4581_vm8, %v2918_v31, %v2922_v33 }
  0xc4   : > { %3981 = vmatpush3.bf16.msra.mxu0 %v4911_v9  ;;  %v3541_v4 = vcombine.low %v2881_v61, %v2895_v60 }
  0xc5   : > { %3982 = vmatprep.subr.bf16.mxu0 %v4919_v28  ;;  %3990 = vmatprep.mubr.bf16.mxu0 %v3539_v2 }
  0xc6   : > { %4007 = vmatpush3.bf16.msra.mxu1 %v4890_v47  ;;  %v2846_v47 = vrot.slane %v2844_v56, 5 }
  0xc7   : > { %4000 = vmatprep.subr.bf16.mxu1 %v4901_v57 }
  0xc8   : > { %3983 = vmatpush3.bf16.msra.mxu0 %v4919_v28  ;;  %v2847_v48 = vor.u32 %v2846_v47, %v2843_v55 }
  0xc9   : > { %3971 = vmatmul.mubr.bf16.gmra.mxu1 %v4129_v54  ;;  %3984 = vmatprep.subr.bf16.mxu0 %v4132_v59 }
  0xca   : > { %4008 = vmatpush3.bf16.msra.mxu1 %v4901_v57  ;;  %v4133_v57 = vld [vmem:[%s5015_s1 + $0x208] sm:$0xff]   ;;  %3994 = vmatprep.mubr.bf16.mxu1 %v3541_v4  ;;  %v2848_v50 = vrot.slane %v2847_v48, 4 }
  0xcb   : > { %4001 = vmatprep.subr.bf16.mxu1 %v4911_v9 }
  0xcc   : > { %3985 = vmatpush3.bf16.msra.mxu0 %v4132_v59  ;;  %v2853_v26 = vsel %vm4581_vm8, %v2848_v50, %v2852_v11 }
  0xcd   : > { %3986 = vmatprep.subr.bf16.mxu0 %v4133_v57 }
  0xce   : > { %4009 = vmatpush3.bf16.msra.mxu1 %v4911_v9  ;;  %v2903_v9 = vor.u32 %v2902_v16, %v2899_v15 }
  0xcf   : > { %4002 = vmatprep.subr.bf16.mxu1 %v4919_v28 }
  0xd0   : > { %3987 = vmatpush3.bf16.msra.mxu0 %v4133_v57  ;;  %v2904_v54 = vrot.slane %v2903_v9, 4 }
  0xd1   : > { %3988 = vmatprep.subr.bf16.mxu0 %v4134_v22 }
  0xd2   : > { %4010 = vmatpush3.bf16.msra.mxu1 %v4919_v28  ;;  %v3540_v28 = vcombine.low %v2853_v26, %v2867_v27  ;;  %v2909_v32 = vsel %vm4581_vm8, %v2904_v54, %v2908_v29 }
  0xd3   : > { %4003 = vmatprep.subr.bf16.mxu1 %v4132_v59  ;;  %v3542_v38 = vcombine.low %v2909_v32, %v2923_v5 }
  0xd4   : > { %3989 = vmatpush3.bf16.msra.mxu0 %v4134_v22 }
  0xd6   : > { %4011 = vmatpush3.bf16.msra.mxu1 %v4132_v59 }
  0xd7   : > { %4004 = vmatprep.subr.bf16.mxu1 %v4133_v57  ;;  %3991 = vmatmul.mubr.bf16.vlgmr.msra.gmra.mxu0 %v3540_v28 }
  0xda   : > { %4012 = vmatpush3.bf16.msra.mxu1 %v4133_v57 }
  0xdb   : > { %4005 = vmatprep.subr.bf16.mxu1 %v4134_v22 }
  0xde   : > { %4013 = vmatpush3.bf16.msra.mxu1 %v4134_v22 }
  0xe1   : > { %3995 = vmatmul.mubr.bf16.vlgmr.msra.gmra.mxu1 %v3542_v38 }
 0x10c   : > { %v3824_v39 = vpop.f32.mrf.mxu1 }
 0x10e   : > { %v1398_v41 = vpop.f32.mrf.mxu1 }
 0x110   : > { %v3825_v40 = vpop.f32.mrf.mxu1 }
 0x112   : > { %v3800_v34 = vpop.f32.mrf.mxu0  ;;  %v1401_v43 = vpop.f32.mrf.mxu1 }
 0x113   : > { %v1439_v26 = vadd.f32 %v3824_v39, %v3800_v34 }
 0x114   : > { %v1228_v35 = vpop.f32.mrf.mxu0 }
 0x115   : > { %v1437_v27 = vadd.f32 %v1398_v41, %v1228_v35 }
 0x116   : > { %v3801_v37 = vpop.f32.mrf.mxu0 }
 0x117   : > { %v1440_v29 = vadd.f32 %v3825_v40, %v3801_v37 }
 0x118   : > { %v1231_v42 = vpop.f32.mrf.mxu0 }
 0x119   : > { %v1438_v32 = vadd.f32 %v1401_v43, %v1231_v42 }
 0x11c   : > { %v3828_v30 = vpop.f32.mrf.mxu1 }
 0x11e   : > { %v1414_v49 = vpop.f32.mrf.mxu1 }
 0x120   : > { %v3804_v52 = vpop.f32.mrf.mxu0  ;;  %v3829_v0 = vpop.f32.mrf.mxu1 }
 0x121   : > { %v1443_v38 = vadd.f32 %v3828_v30, %v3804_v52 }
 0x122   : > { %v1244_v56 = vpop.f32.mrf.mxu0  ;;  %v1417_v53 = vpop.f32.mrf.mxu1 }
 0x124   : > { %v3805_v2 = vpop.f32.mrf.mxu0 }
 0x125   : > { %v1444_v35 = vadd.f32 %v3829_v0, %v3805_v2 }
 0x126   : > { %v4960_v45 = vpop.f32.mrf.mxu0 }
 0x127   : > { %5027 = vst [vmem:[#allocation5_spill] sm:$0xff] %v4960_v45  ;;  %v1441_v45 = vadd.f32 %v1414_v49, %v1244_v56 }
 0x132   : > { %v3848_v12 = vpop.f32.mrf.mxu0 }
 0x133   : > { %v1740_v31 = vadd.f32 %v3848_v12, %v1439_v26 }
 0x134   : > { %v1699_v19 = vpop.f32.mrf.mxu0 }
 0x135   : > { %v1738_v33 = vadd.f32 %v1699_v19, %v1437_v27  ;;  %v5032_v19 = vld [vmem:[#allocation5_spill] sm:$0xff] }
 0x136   : > { %v3849_v47 = vpop.f32.mrf.mxu0  ;;  %v1442_v27 = vadd.f32 %v1417_v53, %v5032_v19 }
 0x137   : > { %v1741_v5 = vadd.f32 %v3849_v47, %v1440_v29 }
 0x138   : > { %v1702_v58 = vpop.f32.mrf.mxu0 }
 0x140   : > { %v3852_v61 = vpop.f32.mrf.mxu0 }
 0x141   : > { %v3872_v55 = vpop.f32.mrf.mxu1  ;;  %v1744_v34 = vadd.f32 %v3852_v61, %v1443_v38 }
 0x142   : > { %v1715_v63 = vpop.f32.mrf.mxu0 }
 0x143   : > { %v1885_v13 = vpop.f32.mrf.mxu1  ;;  %v1742_v40 = vadd.f32 %v1715_v63, %v1441_v45 }
 0x144   : > { %v3853_v60 = vpop.f32.mrf.mxu0 }
 0x145   : > { %v3873_v59 = vpop.f32.mrf.mxu1  ;;  %v1745_v43 = vadd.f32 %v3853_v60, %v1444_v35 }
 0x146   : > { %v1718_v3 = vpop.f32.mrf.mxu0  ;;  %v1927_v41 = vadd.f32 %v3873_v59, %v1741_v5 }
 0x147   : > { %v1888_v62 = vpop.f32.mrf.mxu1 }
 0x154   : > { %v3876_v10 = vpop.f32.mrf.mxu1 }
 0x155   : > { %v1930_v52 = vadd.f32 %v3876_v10, %v1744_v34 }
 0x156   : > { %v1901_v1 = vpop.f32.mrf.mxu1 }
 0x157   : > { %v3896_v6 = vpop.f32.mrf.mxu0  ;;  %v1928_v49 = vadd.f32 %v1901_v1, %v1742_v40 }
 0x158   : > { %v3877_v4 = vpop.f32.mrf.mxu1 }
 0x159   : > { %v2071_v8 = vpop.f32.mrf.mxu0  ;;  %v1931_v0 = vadd.f32 %v3877_v4, %v1745_v43 }
 0x15a   : > { %v4962_v7 = vpop.f32.mrf.mxu1 }
 0x15b   : > { %5028 = vst [vmem:[#allocation6_spill] sm:$0xff] %v4962_v7  ;;  %v3897_v17 = vpop.f32.mrf.mxu0  ;;  %v1739_v7 = vadd.f32 %v1702_v58, %v1438_v32 }
 0x15c   : > { %v2113_v47 = vadd.f32 %v3897_v17, %v1927_v41 }
 0x15d   : > { %v2074_v14 = vpop.f32.mrf.mxu0  ;;  %v1925_v42 = vadd.f32 %v1888_v62, %v1739_v7 }
 0x15f   : > { %v2111_v56 = vadd.f32 %v2074_v14, %v1925_v42 }
 0x161   : > { %v3920_v48 = vpop.f32.mrf.mxu1 }
 0x162   : > { %v5034_v10 = vld [vmem:[#allocation6_spill] sm:$0xff] }
 0x163   : > { %v2369_v51 = vpop.f32.mrf.mxu1 }
 0x165   : > { %v3921_v57 = vpop.f32.mrf.mxu1  ;;  %v3900_v15 = vpop.f32.mrf.mxu0 }
 0x166   : > { %v2116_v61 = vadd.f32 %v3900_v15, %v1930_v52  ;;  %v2411_v59 = vadd.f32 %v3921_v57, %v2113_v47 }
 0x167   : > { %v2372_v16 = vpop.f32.mrf.mxu1  ;;  %v2087_v18 = vpop.f32.mrf.mxu0 }
 0x168   : > { %v2114_v53 = vadd.f32 %v2087_v18, %v1928_v49 }
 0x169   : > { %v3901_v36 = vpop.f32.mrf.mxu0 }
 0x16a   : > { %v2117_v1 = vadd.f32 %v3901_v36, %v1931_v0 }
 0x16b   : > { %v2090_v11 = vpop.f32.mrf.mxu0 }
 0x170   : > { %v3924_v20 = vpop.f32.mrf.mxu1 }
 0x171   : > { %v2414_v7 = vadd.f32 %v3924_v20, %v2116_v61 }
 0x172   : > { %v4964_v50 = vpop.f32.mrf.mxu1 }
 0x173   : > { %5029 = vst [vmem:[#allocation7_spill] sm:$0xff] %v4964_v50 }
 0x174   : > { %v4966_v21 = vpop.f32.mrf.mxu1 }
 0x175   : > { %5030 = vst [vmem:[#allocation8_spill] sm:$0xff] %v4966_v21  ;;  %v1926_v21 = vadd.f32 %v3872_v55, %v1740_v31  ;;  %v1743_v55 = vadd.f32 %v1718_v3, %v1442_v27  ;;  %v2409_v3 = vadd.f32 %v2372_v16, %v2111_v56 }
 0x176   : > { %v4968_v22 = vpop.f32.mrf.mxu1 }
 0x177   : > { %v3944_v46 = vpop.f32.mrf.mxu0  ;;  %5031 = vst [vmem:[#allocation9_spill] sm:$0xff] %v4968_v22  ;;  %v1924_v22 = vadd.f32 %v1885_v13, %v1738_v33  ;;  %v2112_v37 = vadd.f32 %v3896_v6, %v1926_v21  ;;  %v1929_v60 = vadd.f32 %v5034_v10, %v1743_v55 }
 0x179   : > { %v2555_v44 = vpop.f32.mrf.mxu0  ;;  %v2110_v12 = vadd.f32 %v2071_v8, %v1924_v22  ;;  %v2410_v58 = vadd.f32 %v3920_v48, %v2112_v37  ;;  %v2115_v48 = vadd.f32 %v2090_v11, %v1929_v60  ;;  %v3551_v11 = vld [vmem:[%s5016_s2] ss:$0 sm:$0xff] }
 0x17a   : > { %v5035_v14 = vld [vmem:[#allocation7_spill] sm:$0xff] }
 0x17b   : > { %v3945_v24 = vpop.f32.mrf.mxu0  ;;  %v2408_v13 = vadd.f32 %v2369_v51, %v2110_v12  ;;  %v2596_v45 = vadd.f32 %v3944_v46, %v2410_v58  ;;  %v2412_v57 = vadd.f32 %v5035_v14, %v2114_v53 }
 0x17c   : > { %v2597_v6 = vadd.f32 %v3945_v24, %v2411_v59  ;;  %v5036_v46 = vld [vmem:[#allocation8_spill] sm:$0xff] }
 0x17d   : > { %v2558_v25 = vpop.f32.mrf.mxu0  ;;  %v2594_v62 = vadd.f32 %v2555_v44, %v2408_v13  ;;  %v2415_v16 = vadd.f32 %v5036_v46, %v2117_v1 }
 0x17e   : > { %v2595_v51 = vadd.f32 %v2558_v25, %v2409_v3  ;;  %v5037_v25 = vld [vmem:[#allocation9_spill] sm:$0xff] }
 0x17f   : > { %v3948_v28 = vpop.f32.mrf.mxu0  ;;  %v2413_v29 = vadd.f32 %v5037_v25, %v2115_v48 }
 0x180   : > { %v2600_v18 = vadd.f32 %v3948_v28, %v2414_v7 }
 0x181   : > { %v3968_v9 = vpop.f32.mrf.mxu1  ;;  %v2571_v39 = vpop.f32.mrf.mxu0 }
 0x182   : > { %v2782_v17 = vadd.f32 %v3968_v9, %v2596_v45  ;;  %v2598_v20 = vadd.f32 %v2571_v39, %v2412_v57 }
 0x183   : > { %v2741_v23 = vpop.f32.mrf.mxu1  ;;  %v3949_v30 = vpop.f32.mrf.mxu0 }
 0x184   : > { %v2780_v15 = vadd.f32 %v2741_v23, %v2594_v62  ;;  %v2601_v33 = vadd.f32 %v3949_v30, %v2415_v16 }
 0x185   : > { %v3969_v54 = vpop.f32.mrf.mxu1  ;;  %v2574_v63 = vpop.f32.mrf.mxu0 }
 0x186   : > { %v2783_v36 = vadd.f32 %v3969_v54, %v2597_v6  ;;  %v2599_v38 = vadd.f32 %v2574_v63, %v2413_v29 }
 0x187   : > { %v2744_v50 = vpop.f32.mrf.mxu1 }
 0x188   : > { %v2781_v31 = vadd.f32 %v2744_v50, %v2595_v51 }
 0x189   : > { %v3972_v26 = vpop.f32.mrf.mxu1 }
 0x18a   : > { %v2786_v28 = vadd.f32 %v3972_v26, %v2600_v18 }
 0x18b   : > { %v2757_v2 = vpop.f32.mrf.mxu1 }
 0x18c   : > { %v2784_v35 = vadd.f32 %v2757_v2, %v2598_v20 }
 0x18d   : > { %v3973_v8 = vpop.f32.mrf.mxu1 }
 0x18e   : > { %v2787_v50 = vadd.f32 %v3973_v8, %v2601_v33 }
 0x18f   : > { %v2760_v44 = vpop.f32.mrf.mxu1 }
 0x190   : > { %v2785_v42 = vadd.f32 %v2760_v44, %v2599_v38 }
 0x197   : > { %v3992_v4 = vpop.f32.mrf.mxu0 }
 0x198   : > { %v3080_v22 = vadd.f32 %v3992_v4, %v2782_v17 }
 0x199   : > { %v3039_v21 = vpop.f32.mrf.mxu0 }
 0x19a   : > { %v3078_v9 = vadd.f32 %v3039_v21, %v2780_v15  ;;  %v3111_v54 = vadd.f32 %v3551_v11, %v3080_v22 }
 0x19b   : > { %v3993_v24 = vpop.f32.mrf.mxu0 }
 0x19c   : > { %v3081_v23 = vadd.f32 %v3993_v24, %v2783_v36  ;;  %v3109_v41 = vadd.f32 %v3551_v11, %v3078_v9  ;;  %v3149_v61 = vmul.f32 %v3111_v54, %v3111_v54 }
 0x19d   : > { %v3042_v5 = vpop.f32.mrf.mxu0 }
 0x19e   : > { %v3112_v34 = vadd.f32 %v3551_v11, %v3081_v23  ;;  %v3079_v39 = vadd.f32 %v3042_v5, %v2781_v31  ;;  %v3147_v47 = vmul.f32 %v3109_v41, %v3109_v41 }
 0x1a0   : > { %v3644_v12 = vpack.c.bf16 %v3112_v34, %v3111_v54  ;;  %v3110_v27 = vadd.f32 %v3551_v11, %v3079_v39  ;;  %v3150_v62 = vmul.f32 %v3112_v34, %v3112_v34 }
 0x1a1   : > { %v3996_v32 = vpop.f32.mrf.mxu1 }
 0x1a2   : > { %v3084_v40 = vadd.f32 %v3996_v32, %v2786_v28  ;;  %3671 = vst [vmem:[%s4994_s7 + $0x8] sm:$0xff] %v3644_v12   ;;  %v3639_v52 = vpack.c.bf16 %v3110_v27, %v3109_v41  ;;  %v3133_v30 = vadd.f32 %v3110_v27, %v3109_v41  ;;  %v3148_v55 = vmul.f32 %v3110_v27, %v3110_v27 }
 0x1a3   : > { %v3055_v37 = vpop.f32.mrf.mxu1 }
 0x1a4   : > { %v3082_v19 = vadd.f32 %v3055_v37, %v2784_v35  ;;  %v3115_v56 = vadd.f32 %v3551_v11, %v3084_v40  ;;  %3640 = vst [vmem:[%s4994_s7] sm:$0xff] %v3639_v52   ;;  %v3134_v0 = vadd.f32 %v3133_v30, %v3111_v54  ;;  %v3155_v59 = vadd.f32 %v3148_v55, %v3147_v47 }
 0x1a5   : > { %v3997_v26 = vpop.f32.mrf.mxu1 }
 0x1a6   : > { %v3085_v43 = vadd.f32 %v3997_v26, %v2787_v50  ;;  %v3113_v2 = vadd.f32 %v3551_v11, %v3082_v19  ;;  %v3156_v63 = vadd.f32 %v3155_v59, %v3149_v61  ;;  %v3135_v10 = vadd.f32 %v3134_v0, %v3112_v34 }
 0x1a7   : > { %v3058_v58 = vpop.f32.mrf.mxu1  ;;  %v3153_v48 = vmul.f32 %v3115_v56, %v3115_v56 }
 0x1a8   : > { %v3116_v49 = vadd.f32 %v3551_v11, %v3085_v43  ;;  %v3083_v13 = vadd.f32 %v3058_v58, %v2785_v42  ;;  %v3151_v3 = vmul.f32 %v3113_v2, %v3113_v2  ;;  %v3136_v1 = vadd.f32 %v3135_v10, %v3113_v2 }
 0x1a9   : > { %v3157_v6 = vadd.f32 %v3156_v63, %v3150_v62 }
 0x1aa   : > { %v3654_v45 = vpack.c.bf16 %v3116_v49, %v3115_v56  ;;  %v3114_v53 = vadd.f32 %v3551_v11, %v3083_v13  ;;  %v3154_v14 = vmul.f32 %v3116_v49, %v3116_v49 }
 0x1ab   : > { %v3158_v4 = vadd.f32 %v3157_v6, %v3151_v3 }
 0x1ac   : > { %3673 = vst [vmem:[%s4994_s7 + $0x18] sm:$0xff] %v3654_v45   ;;  %v3649_v60 = vpack.c.bf16 %v3114_v53, %v3113_v2  ;;  %v3137_v7 = vadd.f32 %v3136_v1, %v3114_v53  ;;  %v3152_v8 = vmul.f32 %v3114_v53, %v3114_v53 }
 0x1ae   : > { %3672 = vst [vmem:[%s4994_s7 + $0x10] sm:$0xff] %v3649_v60   ;;  %v3138_v17 = vadd.f32 %v3137_v7, %v3115_v56  ;;  %v3159_v51 = vadd.f32 %v3158_v4, %v3152_v8 }
 0x1b0   : > { %v3139_v57 = vadd.f32 %v3138_v17, %v3116_v49  ;;  %v3160_v15 = vadd.f32 %v3159_v51, %v3153_v48 }
 0x1b2   : > { %v3140_v18 = vrot.slane %v3139_v57, 4  ;;  %v3161_v21 = vadd.f32 %v3160_v15, %v3154_v14 }
 0x1b4   : > { %v3141_v46 = vadd.f32 %v3140_v18, %v3139_v57  ;;  %v3162_v16 = vrot.slane %v3161_v21, 4 }
 0x1b6   : > { %v3142_v36 = vrot.slane %v3141_v46, 2  ;;  %v3163_v22 = vadd.f32 %v3162_v16, %v3161_v21 }
 0x1b8   : > { %v3143_v20 = vadd.f32 %v3142_v36, %v3141_v46  ;;  %v3164_v44 = vrot.slane %v3163_v22, 2 }
 0x1ba   : > { %v3144_v11 = vrot.slane %v3143_v20, 1  ;;  %v3165_v9 = vadd.f32 %v3164_v44, %v3163_v22 }
 0x1bc   : > { %v3145_v24 = vadd.f32 %v3144_v11, %v3143_v20  ;;  %v3166_v25 = vrot.slane %v3165_v9, 1 }
 0x1be   : > { %3146 = vst [vmem:[%s430_s11] sm:$0x1] %v3145_v24  ;;  %v3167_v29 = vadd.f32 %v3166_v25, %v3165_v9 }
 0x1c0   : > { %3168 = vst [vmem:[%s430_s11 + $0x1] sm:$0x1] %v3167_v29 }
 0x1c1 PF: > { %p14_p9 = scmp.ge.s32.totalorder %s4216_s25, 4   ;;  %s5038_s21 = smov %s4157_s22 }
 0x1c2   : > { %s5039_s22 = smov %s4225_s28  ;;  %s5040_s23 = smov %s4216_s25 }
 0x1c3   :  { %16 = sbr.rel (!%p14_p9) target bundleno = 2 (0x2), region = 146 }

</bundles_post_ra>
